<compile_context>
chip_gen: v5e
topology: v5e:2x2
jax: 0.10.0
libtpu: 0.0.40
codegen_flags: <defaults>
</compile_context>

<pallas_src>
import math

import jax
import jax.numpy as jnp
from jax import lax
from jax.experimental import pallas as pl
from jax.experimental.pallas import tpu as pltpu

HIDDEN = 128
NUM_PATCHES = 16
SEQ = NUM_PATCHES + 1          # 17 valid positions (16 patches + cls)
SEQ_PAD = 24                   # padded to a multiple of 8 sublanes
CLS_POS = NUM_PATCHES          # cls token stored in row 16 (last valid row)
NUM_HEADS = 4
HEAD_DIM = HIDDEN // NUM_HEADS
MLP_DIM = 256
NUM_LAYERS = 6
MSA_LAYER = 6                  # block (MSA_LAYER-1) runs the adversarial branch
AD_HIDDEN = HEAD_DIM           # TVT local discriminator hidden size
LN_EPS = 1e-6
ENT_EPS = 1e-10


# ----------------------------- in-kernel math -----------------------------

def _layernorm(x, g, b):
    mu = jnp.mean(x, axis=-1, keepdims=True)
    xc = x - mu
    var = jnp.mean(xc * xc, axis=-1, keepdims=True)
    return xc * lax.rsqrt(var + LN_EPS) * g + b


def _gelu_tanh(x):
    # TODO(synk): torch.nn.functional.gelu defaults to exact erf; the tanh
    # approximation (max abs dev ~1e-3) is used so the transcendental runs on
    # the EUP instead of a long VALU polynomial.
    c = math.sqrt(2.0 / math.pi)
    return 0.5 * x * (1.0 + jnp.tanh(c * (x + 0.044715 * x * x * x)))


def _sigmoid(x):
    return 1.0 / (1.0 + jnp.exp(-x))


# ------------------------------- fused kernel ------------------------------

def make_encoder_kernel(bb):
    """Fused encoder kernel for a batch block of `bb` samples, one layer per grid step."""
    block_rows = bb * SEQ_PAD
    bh = bb * NUM_HEADS
    scale = 1.0 / math.sqrt(HEAD_DIM)

    def split_heads(t):
        # (block_rows, HIDDEN) -> (NUM_HEADS*bb, SEQ_PAD, HEAD_DIM) head-major batch,
        # built from 32-lane static slices + sublane-aligned concat (no transposes).
        parts = [t[:, h * HEAD_DIM:(h + 1) * HEAD_DIM] for h in range(NUM_HEADS)]
        return jnp.concatenate(parts, axis=0).reshape(bh, SEQ_PAD, HEAD_DIM)

    def merge_heads(t):
        # (NUM_HEADS*bb, SEQ_PAD, HEAD_DIM) -> (block_rows, HIDDEN), heads along lanes.
        t = t.reshape(NUM_HEADS, block_rows, HEAD_DIM)
        return jnp.concatenate([t[h] for h in range(NUM_HEADS)], axis=-1)

    def kernel(x_ref, emb_ref,
               wqkv, bqkv, wo, bo, ln1g, ln1b, ln2g, ln2b, w1, b1, w2, b2,
               lnfg, lnfb, a1w, a1b, a2w, a2b, a3w, a3b,
               out_ref, ad_ref,
               x_scr, ent_scr):
        l = pl.program_id(1)

        kpos = lax.broadcasted_iota(jnp.int32, (1, 1, SEQ_PAD), 2)
        key_bias = jnp.where(kpos < SEQ, 0.0, -1e30)           # mask padded key columns
        qpos = lax.broadcasted_iota(jnp.int32, (1, SEQ_PAD, 1), 1)
        is_cls_q = qpos == CLS_POS
        is_patch_s = qpos < NUM_PATCHES                         # patch (key) rows 0..15

        # ---- first layer of each batch block: build the embedded sequence ----
        @pl.when(l == 0)
        def _():
            emb = emb_ref[...]                                  # (SEQ_PAD, HIDDEN)
            x_scr[:, :NUM_PATCHES, :] = x_ref[...] + emb[:NUM_PATCHES][None]
            x_scr[:, NUM_PATCHES:, :] = jnp.broadcast_to(
                emb[NUM_PATCHES:][None], (bb, SEQ_PAD - NUM_PATCHES, HIDDEN))
            ent_scr[...] = jnp.ones((bh, SEQ_PAD, HEAD_DIM), jnp.float32)

        x = x_scr[...].reshape(block_rows, HIDDEN)              # f32 residual stream

        # ------------------------------ attention ------------------------------
        res1 = x
        xn_b = _layernorm(x, ln1g[0], ln1b[0]).astype(jnp.bfloat16)

        qkv = jnp.dot(xn_b, wqkv[0], preferred_element_type=jnp.float32) + bqkv[0]
        q = qkv[:, 0:HIDDEN]
        k = qkv[:, HIDDEN:2 * HIDDEN]
        v = qkv[:, 2 * HIDDEN:3 * HIDDEN]

        q3 = split_heads(q).astype(jnp.bfloat16)
        k3 = split_heads(k).astype(jnp.bfloat16)
        v3 = split_heads(v)                                     # f32

        s = jnp.einsum('bqd,bkd->bqk', q3, k3,
                       preferred_element_type=jnp.float32) * scale + key_bias
        m = jnp.max(s, axis=-1, keepdims=True)
        e = jnp.exp(s - m)
        p = e * pl.reciprocal(jnp.sum(e, axis=-1, keepdims=True), approx=True)
        p_b = p.astype(jnp.bfloat16)
        ctx = jnp.einsum('bqk,bkd->bqd', p_b, v3.astype(jnp.bfloat16),
                         preferred_element_type=jnp.float32)

        # ---- TVT local adversarial head, only at layer MSA_LAYER-1 (last layer) ----
        @pl.when(l == MSA_LAYER - 1)
        def _():
            # Shared 3-layer MLP applied per head via block-diagonal weights on the
            # full (rows, 128) mixed key slab (lane-dense GEMMs).
            k_b = k.astype(jnp.bfloat16)
            z = jnp.dot(k_b, a1w[...], preferred_element_type=jnp.float32) + a1b[...]
            z = jnp.maximum(z, 0.0).astype(jnp.bfloat16)
            z = jnp.dot(z, a2w[...], preferred_element_type=jnp.float32) + a2b[...]
            z = jnp.maximum(z, 0.0).astype(jnp.bfloat16)
            logit = jnp.dot(z, a3w[...], preferred_element_type=jnp.float32) + a3b[...]
            prob = _sigmoid(logit)                              # (rows, 128): cols 0..3 real
            ad_ref[...] = prob                                  # lane-dense store

            p4 = prob[:, 0:NUM_HEADS]
            ent = (-p4 * jnp.log2(p4 + ENT_EPS)
                   - (1.0 - p4) * jnp.log2(1.0 - p4 + ENT_EPS))  # (rows, NUM_HEADS)
            ent_h = jnp.concatenate(
                [ent[:, h:h + 1].reshape(bb, SEQ_PAD, 1) for h in range(NUM_HEADS)],
                axis=0)                                          # (bh, SEQ_PAD, 1)
            ent_h = jnp.where(is_patch_s, ent_h, 1.0)            # cls & padded keys -> 1
            ent_scr[...] = jnp.broadcast_to(ent_h, (bh, SEQ_PAD, HEAD_DIM))

        # cls-query row attends with entropy-scaled values (ent == 1 => no-op at
        # non-MSA layers; reference rescales only attention_probs[:, :, cls, :]).
        v_ent_b = (v3 * ent_scr[...]).astype(jnp.bfloat16)
        ctx_cls = jnp.einsum('bqk,bkd->bqd', p_b[:, CLS_POS:CLS_POS + 1, :], v_ent_b,
                             preferred_element_type=jnp.float32)
        ctx = jnp.where(is_cls_q, ctx_cls, ctx)

        ctx2 = merge_heads(ctx).astype(jnp.bfloat16)
        attn = jnp.dot(ctx2, wo[0], preferred_element_type=jnp.float32) + bo[0]
        x = attn + res1

        # --------------------------------- MLP ---------------------------------
        res2 = x
        xn2 = _layernorm(x, ln2g[0], ln2b[0]).astype(jnp.bfloat16)
        h1 = jnp.dot(xn2, w1[0], preferred_element_type=jnp.float32) + b1[0]
        h1 = _gelu_tanh(h1).astype(jnp.bfloat16)
        h2 = jnp.dot(h1, w2[0], preferred_element_type=jnp.float32) + b2[0]
        x = h2 + res2

        x_scr[...] = x.reshape(bb, SEQ_PAD, HIDDEN)

        @pl.when(l == NUM_LAYERS - 1)
        def _():
            out_ref[...] = _layernorm(x, lnfg[...], lnfb[...])

    return kernel


# ------------------------------- wrappers ----------------------------------

_LAYER_PARAMS = ('wqkv', 'bqkv', 'wo', 'bo', 'ln1_g', 'ln1_b', 'ln2_g', 'ln2_b',
                 'w1', 'b1', 'w2', 'b2')
_CONST_PARAMS = ('enc_ln_g', 'enc_ln_b', 'a1w', 'a1b', 'a2w', 'a2b', 'a3w', 'a3b')


def _layer_spec(arr):
    nd = arr.ndim
    return pl.BlockSpec((1,) + arr.shape[1:],
                        lambda i, l, _nd=nd: (l,) + (0,) * (_nd - 1))


def _const_spec(arr):
    nd = arr.ndim
    return pl.BlockSpec(arr.shape, lambda i, l, _nd=nd: (0,) * _nd)


def encoder_fused(patches, packed, bb):
    b_pad = patches.shape[0]
    nblk = b_pad // bb
    block_rows = bb * SEQ_PAD
    rows_total = b_pad * SEQ_PAD

    layer_ws = [packed[n] for n in _LAYER_PARAMS]
    const_ws = [packed[n] for n in _CONST_PARAMS]

    in_specs = ([pl.BlockSpec((bb, NUM_PATCHES, HIDDEN), lambda i, l: (i, 0, 0)),
                 _const_spec(packed['embed'])]
                + [_layer_spec(w) for w in layer_ws]
                + [_const_spec(w) for w in const_ws])
    row_spec = pl.BlockSpec((block_rows, HIDDEN), lambda i, l: (i, 0))

    out, ad = pl.pallas_call(
        make_encoder_kernel(bb),
        out_shape=(jax.ShapeDtypeStruct((rows_total, HIDDEN), jnp.float32),
                   jax.ShapeDtypeStruct((rows_total, HIDDEN), jnp.float32)),
        grid=(nblk, NUM_LAYERS),
        in_specs=in_specs,
        out_specs=(row_spec, row_spec),
        scratch_shapes=[pltpu.VMEM((bb, SEQ_PAD, HIDDEN), jnp.float32),
                        pltpu.VMEM((bb * NUM_HEADS, SEQ_PAD, HEAD_DIM), jnp.float32)],
        compiler_params=pltpu.CompilerParams(
            dimension_semantics=("parallel", "arbitrary")),
    )(patches, packed['embed'], *layer_ws, *const_ws)
    return out, ad


def _pick_bb(b_total):
    # >=2 batch blocks when possible (both v7x TensorCores get work), coarse
    # blocks (cap 32 samples = 768 MXU rows) for single-TC v5e/v6e.
    return max(1, min(32, (b_total + 1) // 2))


def vit_forward(img_s, img_t, packed):
    xs = img_s.reshape(-1, NUM_PATCHES, HIDDEN)
    xt = img_t.reshape(-1, NUM_PATCHES, HIDDEN)
    bs, bt = xs.shape[0], xt.shape[0]
    b_total = bs + bt
    patches = jnp.concatenate([xs, xt], axis=0)           # (B_total, 16, 128)

    bb = _pick_bb(b_total)
    b_pad = -(-b_total // bb) * bb
    if b_pad != b_total:
        patches = jnp.pad(patches, ((0, b_pad - b_total), (0, 0), (0, 0)))

    out_rows, ad_rows = encoder_fused(patches, packed, bb)

    out = out_rows.reshape(b_pad, SEQ_PAD, HIDDEN)
    enc_s = out[:bs, CLS_POS, :]
    enc_t = out[bs:b_total, CLS_POS, :]

    ad = ad_rows.reshape(b_pad, SEQ_PAD, HIDDEN)[:, :NUM_PATCHES, :NUM_HEADS]
    ad_s, ad_t = ad[:bs], ad[bs:b_total]

    # TODO(synk): lossZoo.adv_local / ad_net_local source not provided with the
    # module; the standard TVT local adversarial head (3-layer MLP + sigmoid)
    # with BCELoss is implemented: source domain label 1, target domain label 0.
    def _bce(p, label):
        logp = jnp.maximum(jnp.log(p), -100.0)
        log1mp = jnp.maximum(jnp.log(1.0 - p), -100.0)
        return -jnp.mean(label * logp + (1.0 - label) * log1mp)

    loss_ad = 0.5 * (_bce(ad_s, 1.0) + _bce(ad_t, 0.0))
    return enc_s, enc_t, loss_ad


# ------------------------- params: init & packing ---------------------------

def init_params(key):
    keys = jax.random.split(key, 64)
    kit = iter(keys)

    def nrm(shape, std=0.02):
        return std * jax.random.normal(next(kit), shape, dtype=jnp.float32)

    params = {
        'cls_token': jax.random.normal(next(kit), (1, 1, HIDDEN), dtype=jnp.float32),
        'pos_embedding': jax.random.normal(next(kit), (1, NUM_PATCHES + 1, HIDDEN),
                                           dtype=jnp.float32),
        'enc_ln_g': jnp.ones((1, HIDDEN), jnp.float32),
        'enc_ln_b': jnp.zeros((1, HIDDEN), jnp.float32),
        'ad_net': {
            'a1w': nrm((HEAD_DIM, AD_HIDDEN), 0.1),
            'a1b': jnp.zeros((1, AD_HIDDEN), jnp.float32),
            'a2w': nrm((AD_HIDDEN, AD_HIDDEN), 0.1),
            'a2b': jnp.zeros((1, AD_HIDDEN), jnp.float32),
            'a3w': nrm((AD_HIDDEN, 1), 0.1),
            'a3b': jnp.zeros((1, 1), jnp.float32),
        },
        'layers': [],
    }
    for _ in range(NUM_LAYERS):
        lp = {
            'ln1_g': jnp.ones((1, HIDDEN), jnp.float32),
            'ln1_b': jnp.zeros((1, HIDDEN), jnp.float32),
            'ln2_g': jnp.ones((1, HIDDEN), jnp.float32),
            'ln2_b': jnp.zeros((1, HIDDEN), jnp.float32),
            'wq': nrm((HIDDEN, HIDDEN)), 'bq': jnp.zeros((1, HIDDEN), jnp.float32),
            'wk': nrm((HIDDEN, HIDDEN)), 'bk': jnp.zeros((1, HIDDEN), jnp.float32),
            'wv': nrm((HIDDEN, HIDDEN)), 'bv': jnp.zeros((1, HIDDEN), jnp.float32),
            'wo': nrm((HIDDEN, HIDDEN)), 'bo': jnp.zeros((1, HIDDEN), jnp.float32),
            'w1': nrm((HIDDEN, MLP_DIM)), 'b1': jnp.zeros((1, MLP_DIM), jnp.float32),
            'w2': nrm((MLP_DIM, HIDDEN)), 'b2': jnp.zeros((1, HIDDEN), jnp.float32),
        }
        params['layers'].append(lp)
    return params


def pack_params(params):
    """Stack per-layer weights, fuse QKV, build block-diag ad-net, bake cls+pos."""
    L = NUM_LAYERS
    lay = params['layers']

    def stack(name):
        return jnp.stack([lay[i][name] for i in range(L)], axis=0)

    wqkv = jnp.concatenate([stack('wq'), stack('wk'), stack('wv')], axis=-1)  # (L,128,384)
    bqkv = jnp.concatenate([stack('bq'), stack('bk'), stack('bv')], axis=-1)  # (L,1,384)

    # Embedding prefix: rows 0..15 = pos[1:17] (patch positions), row 16 = cls+pos[0],
    # rows 17..23 = 0 (padding).  Patch rows first, cls last => no row shift in-kernel.
    pos = params['pos_embedding'][0]
    cls = params['cls_token'][0, 0]
    embed = jnp.zeros((SEQ_PAD, HIDDEN), jnp.float32)
    embed = embed.at[:NUM_PATCHES].set(pos[1:SEQ])
    embed = embed.at[CLS_POS].set(pos[0] + cls)

    ad = params['ad_net']
    eye = jnp.eye(NUM_HEADS, dtype=jnp.float32)
    a1_bd = jnp.kron(eye, ad['a1w'])                                  # (128,128)
    a2_bd = jnp.kron(eye, ad['a2w'])                                  # (128,128)
    a3_bd = jnp.pad(jnp.kron(eye, ad['a3w']),
                    ((0, 0), (0, HIDDEN - NUM_HEADS)))                # (128,128), 4 live cols
    a1b_t = jnp.tile(ad['a1b'], (1, NUM_HEADS))                       # (1,128)
    a2b_t = jnp.tile(ad['a2b'], (1, NUM_HEADS))
    a3b_t = jnp.pad(jnp.tile(ad['a3b'], (1, NUM_HEADS)),
                    ((0, 0), (0, HIDDEN - NUM_HEADS)))

    return {
        'embed': embed,
        'wqkv': wqkv.astype(jnp.bfloat16), 'bqkv': bqkv,
        'wo': stack('wo').astype(jnp.bfloat16), 'bo': stack('bo'),
        'ln1_g': stack('ln1_g'), 'ln1_b': stack('ln1_b'),
        'ln2_g': stack('ln2_g'), 'ln2_b': stack('ln2_b'),
        'w1': stack('w1').astype(jnp.bfloat16), 'b1': stack('b1'),
        'w2': stack('w2').astype(jnp.bfloat16), 'b2': stack('b2'),
        'enc_ln_g': params['enc_ln_g'], 'enc_ln_b': params['enc_ln_b'],
        'a1w': a1_bd.astype(jnp.bfloat16), 'a1b': a1b_t,
        'a2w': a2_bd.astype(jnp.bfloat16), 'a2b': a2b_t,
        'a3w': a3_bd.astype(jnp.bfloat16), 'a3b': a3b_t,
    }


if __name__ == "__main__":
    key = jax.random.PRNGKey(0)
    kp, ks, kt = jax.random.split(key, 3)
    params = init_params(kp)
    packed = pack_params(params)

    B = 2
    img_s = jax.random.normal(ks, (B, NUM_PATCHES * HIDDEN), dtype=jnp.float32)
    img_t = jax.random.normal(kt, (B, NUM_PATCHES * HIDDEN), dtype=jnp.float32)

    fwd = jax.jit(vit_forward)
    enc_s, enc_t, loss_ad = fwd(img_s, img_t, packed)
    enc_s, enc_t, loss_ad = jax.block_until_ready((enc_s, enc_t, loss_ad))

    assert enc_s.shape == (B, HIDDEN) and enc_t.shape == (B, HIDDEN)
    assert bool(jnp.all(jnp.isfinite(enc_s))) and bool(jnp.all(jnp.isfinite(enc_t)))
    assert bool(jnp.isfinite(loss_ad))
    print("KERNEL_OK")
</pallas_src>

<mosaic_0001>
module attributes {stable_mosaic.version = 11 : i64} {
  func.func @kernel(%arg0: i32, %arg1: i32, %arg2: memref<2x16x128xf32, #tpu.memory_space<vmem>>, %arg3: memref<24x128xf32, #tpu.memory_space<vmem>>, %arg4: memref<1x128x384xbf16, #tpu.memory_space<vmem>>, %arg5: memref<1x1x384xf32, #tpu.memory_space<vmem>>, %arg6: memref<1x128x128xbf16, #tpu.memory_space<vmem>>, %arg7: memref<1x1x128xf32, #tpu.memory_space<vmem>>, %arg8: memref<1x1x128xf32, #tpu.memory_space<vmem>>, %arg9: memref<1x1x128xf32, #tpu.memory_space<vmem>>, %arg10: memref<1x1x128xf32, #tpu.memory_space<vmem>>, %arg11: memref<1x1x128xf32, #tpu.memory_space<vmem>>, %arg12: memref<1x128x256xbf16, #tpu.memory_space<vmem>>, %arg13: memref<1x1x256xf32, #tpu.memory_space<vmem>>, %arg14: memref<1x256x128xbf16, #tpu.memory_space<vmem>>, %arg15: memref<1x1x128xf32, #tpu.memory_space<vmem>>, %arg16: memref<1x128xf32, #tpu.memory_space<vmem>>, %arg17: memref<1x128xf32, #tpu.memory_space<vmem>>, %arg18: memref<128x128xbf16, #tpu.memory_space<vmem>>, %arg19: memref<1x128xf32, #tpu.memory_space<vmem>>, %arg20: memref<128x128xbf16, #tpu.memory_space<vmem>>, %arg21: memref<1x128xf32, #tpu.memory_space<vmem>>, %arg22: memref<128x128xbf16, #tpu.memory_space<vmem>>, %arg23: memref<1x128xf32, #tpu.memory_space<vmem>>, %arg24: memref<48x128xf32, #tpu.memory_space<vmem>>, %arg25: memref<48x128xf32, #tpu.memory_space<vmem>>, %arg26: memref<2x24x128xf32, #tpu.memory_space<vmem>>, %arg27: memref<8x24x32xf32, #tpu.memory_space<vmem>>) attributes {dimension_semantics = [#tpu.dimension_semantics<parallel>, #tpu.dimension_semantics<arbitrary>], iteration_bounds = array<i64: 2, 6>, scalar_prefetch = 0 : i64, scratch_operands = 2 : i64, tpu.core_type = #tpu.core_type<tc>, window_params = [{transform_indices = @transform_0, window_bounds = array<i64: 2, 16, 128>}, {pipeline_mode = #tpu.pipeline_mode<synchronous>, transform_indices = @transform_1, window_bounds = array<i64: 24, 128>}, {transform_indices = @transform_2, window_bounds = array<i64: 1, 128, 384>}, {transform_indices = @transform_3, window_bounds = array<i64: 1, 1, 384>}, {transform_indices = @transform_4, window_bounds = array<i64: 1, 128, 128>}, {transform_indices = @transform_5, window_bounds = array<i64: 1, 1, 128>}, {transform_indices = @transform_6, window_bounds = array<i64: 1, 1, 128>}, {transform_indices = @transform_7, window_bounds = array<i64: 1, 1, 128>}, {transform_indices = @transform_8, window_bounds = array<i64: 1, 1, 128>}, {transform_indices = @transform_9, window_bounds = array<i64: 1, 1, 128>}, {transform_indices = @transform_10, window_bounds = array<i64: 1, 128, 256>}, {transform_indices = @transform_11, window_bounds = array<i64: 1, 1, 256>}, {transform_indices = @transform_12, window_bounds = array<i64: 1, 256, 128>}, {transform_indices = @transform_13, window_bounds = array<i64: 1, 1, 128>}, {pipeline_mode = #tpu.pipeline_mode<synchronous>, transform_indices = @transform_14, window_bounds = array<i64: 1, 128>}, {pipeline_mode = #tpu.pipeline_mode<synchronous>, transform_indices = @transform_15, window_bounds = array<i64: 1, 128>}, {pipeline_mode = #tpu.pipeline_mode<synchronous>, transform_indices = @transform_16, window_bounds = array<i64: 128, 128>}, {pipeline_mode = #tpu.pipeline_mode<synchronous>, transform_indices = @transform_17, window_bounds = array<i64: 1, 128>}, {pipeline_mode = #tpu.pipeline_mode<synchronous>, transform_indices = @transform_18, window_bounds = array<i64: 128, 128>}, {pipeline_mode = #tpu.pipeline_mode<synchronous>, transform_indices = @transform_19, window_bounds = array<i64: 1, 128>}, {pipeline_mode = #tpu.pipeline_mode<synchronous>, transform_indices = @transform_20, window_bounds = array<i64: 128, 128>}, {pipeline_mode = #tpu.pipeline_mode<synchronous>, transform_indices = @transform_21, window_bounds = array<i64: 1, 128>}, {transform_indices = @transform_22, window_bounds = array<i64: 48, 128>}, {transform_indices = @transform_23, window_bounds = array<i64: 48, 128>}]} {
    %0 = tpu.iota {dimensions = array<i32: 2>} : vector<1x1x24xi32>
    %c17_i32 = arith.constant 17 : i32
    %1 = vector.broadcast %c17_i32 : i32 to vector<1x1x24xi32>
    %2 = arith.cmpi slt, %0, %1 : vector<1x1x24xi32>
    %cst = arith.constant 0.000000e+00 : f32
    %cst_0 = arith.constant -1.000000e+30 : f32
    %3 = vector.broadcast %cst : f32 to vector<1x1x24xf32>
    %4 = vector.broadcast %cst_0 : f32 to vector<1x1x24xf32>
    %5 = arith.select %2, %3, %4 : vector<1x1x24xi1>, vector<1x1x24xf32>
    %6 = tpu.iota {dimensions = array<i32: 1>} : vector<1x24x1xi32>
    %c16_i32 = arith.constant 16 : i32
    %7 = vector.broadcast %c16_i32 : i32 to vector<1x24x1xi32>
    %8 = arith.cmpi eq, %6, %7 : vector<1x24x1xi32>
    %c16_i32_1 = arith.constant 16 : i32
    %9 = vector.broadcast %c16_i32_1 : i32 to vector<1x24x1xi32>
    %10 = arith.cmpi slt, %6, %9 : vector<1x24x1xi32>
    %c0_i32 = arith.constant 0 : i32
    %11 = arith.cmpi eq, %arg1, %c0_i32 : i32
    %12 = arith.extui %11 : i1 to i32
    %c0_i32_2 = arith.constant 0 : i32
    %13 = arith.cmpi ne, %12, %c0_i32_2 : i32
    scf.if %13 {
      %c0_74 = arith.constant 0 : index
      %c0_75 = arith.constant 0 : index
      %180 = vector.load %arg3[%c0_74, %c0_75] : memref<24x128xf32, #tpu.memory_space<vmem>>, vector<24x128xf32>
      %c0_76 = arith.constant 0 : index
      %c0_77 = arith.constant 0 : index
      %c0_78 = arith.constant 0 : index
      %181 = vector.load %arg2[%c0_76, %c0_77, %c0_78] : memref<2x16x128xf32, #tpu.memory_space<vmem>>, vector<2x16x128xf32>
      %182 = vector.extract_strided_slice %180 {offsets = [0, 0], sizes = [16, 128], strides = [1, 1]} : vector<24x128xf32> to vector<16x128xf32>
      %183 = vector.shape_cast %182 : vector<16x128xf32> to vector<1x16x128xf32>
      %184 = vector.broadcast %183 : vector<1x16x128xf32> to vector<2x16x128xf32>
      %185 = arith.addf %181, %184 : vector<2x16x128xf32>
      %c0_79 = arith.constant 0 : index
      %c0_80 = arith.constant 0 : index
      %c0_81 = arith.constant 0 : index
      %186 = vector.load %arg26[%c0_79, %c0_80, %c0_81] : memref<2x24x128xf32, #tpu.memory_space<vmem>>, vector<2x16x128xf32>
      tpu.vector_store %arg26[%c0_79, %c0_80, %c0_81], %185 {strides = array<i32>} : memref<2x24x128xf32, #tpu.memory_space<vmem>>, vector<2x16x128xf32>,
      %187 = vector.extract_strided_slice %180 {offsets = [16, 0], sizes = [8, 128], strides = [1, 1]} : vector<24x128xf32> to vector<8x128xf32>
      %188 = vector.shape_cast %187 : vector<8x128xf32> to vector<1x8x128xf32>
      %189 = vector.shape_cast %188 : vector<1x8x128xf32> to vector<1x8x128xf32>
      %190 = vector.broadcast %189 : vector<1x8x128xf32> to vector<2x8x128xf32>
      %c0_82 = arith.constant 0 : index
      %c16 = arith.constant 16 : index
      %c0_83 = arith.constant 0 : index
      %191 = vector.load %arg26[%c0_82, %c16, %c0_83] : memref<2x24x128xf32, #tpu.memory_space<vmem>>, vector<2x8x128xf32>
      tpu.vector_store %arg26[%c0_82, %c16, %c0_83], %190 {strides = array<i32>} : memref<2x24x128xf32, #tpu.memory_space<vmem>>, vector<2x8x128xf32>,
      %cst_84 = arith.constant 1.000000e+00 : f32
      %192 = vector.broadcast %cst_84 : f32 to vector<8x24x32xf32>
      %c0_85 = arith.constant 0 : index
      %c0_86 = arith.constant 0 : index
      %c0_87 = arith.constant 0 : index
      %193 = vector.load %arg27[%c0_85, %c0_86, %c0_87] : memref<8x24x32xf32, #tpu.memory_space<vmem>>, vector<8x24x32xf32>
      tpu.vector_store %arg27[%c0_85, %c0_86, %c0_87], %192 {strides = array<i32>} : memref<8x24x32xf32, #tpu.memory_space<vmem>>, vector<8x24x32xf32>,
    } else {
    }
    %c0 = arith.constant 0 : index
    %c0_3 = arith.constant 0 : index
    %c0_4 = arith.constant 0 : index
    %14 = vector.load %arg26[%c0, %c0_3, %c0_4] : memref<2x24x128xf32, #tpu.memory_space<vmem>>, vector<2x24x128xf32>
    %15 = vector.shape_cast %14 : vector<2x24x128xf32> to vector<48x128xf32>
    %c0_5 = arith.constant 0 : index
    %c0_6 = arith.constant 0 : index
    %c0_7 = arith.constant 0 : index
    %16 = vector.load %arg8[%c0_5, %c0_6, %c0_7] : memref<1x1x128xf32, #tpu.memory_space<vmem>>, vector<1x1x128xf32>
    %17 = vector.shape_cast %16 : vector<1x1x128xf32> to vector<1x128xf32>
    %c0_8 = arith.constant 0 : index
    %c0_9 = arith.constant 0 : index
    %c0_10 = arith.constant 0 : index
    %18 = vector.load %arg9[%c0_8, %c0_9, %c0_10] : memref<1x1x128xf32, #tpu.memory_space<vmem>>, vector<1x1x128xf32>
    %19 = vector.shape_cast %18 : vector<1x1x128xf32> to vector<1x128xf32>
    %cst_11 = arith.constant dense<0.000000e+00> : vector<48xf32>
    %20 = vector.multi_reduction <add>, %15, %cst_11 [1] : vector<48x128xf32> to vector<48xf32>
    %21 = vector.shape_cast %20 : vector<48xf32> to vector<48x1xf32>
    %cst_12 = arith.constant 1.280000e+02 : f32
    %22 = vector.broadcast %cst_12 : f32 to vector<48x1xf32>
    %23 = arith.divf %21, %22 : vector<48x1xf32>
    %24 = vector.broadcast %23 : vector<48x1xf32> to vector<48x128xf32>
    %25 = arith.subf %15, %24 : vector<48x128xf32>
    %26 = arith.mulf %25, %25 : vector<48x128xf32>
    %cst_13 = arith.constant dense<0.000000e+00> : vector<48xf32>
    %27 = vector.multi_reduction <add>, %26, %cst_13 [1] : vector<48x128xf32> to vector<48xf32>
    %28 = vector.shape_cast %27 : vector<48xf32> to vector<48x1xf32>
    %cst_14 = arith.constant 1.280000e+02 : f32
    %29 = vector.broadcast %cst_14 : f32 to vector<48x1xf32>
    %30 = arith.divf %28, %29 : vector<48x1xf32>
    %cst_15 = arith.constant 9.99999997E-7 : f32
    %31 = vector.broadcast %cst_15 : f32 to vector<48x1xf32>
    %32 = arith.addf %30, %31 : vector<48x1xf32>
    %33 = math.rsqrt %32 : vector<48x1xf32>
    %34 = vector.broadcast %33 : vector<48x1xf32> to vector<48x128xf32>
    %35 = arith.mulf %25, %34 : vector<48x128xf32>
    %36 = vector.broadcast %17 : vector<1x128xf32> to vector<48x128xf32>
    %37 = arith.mulf %35, %36 : vector<48x128xf32>
    %38 = vector.broadcast %19 : vector<1x128xf32> to vector<48x128xf32>
    %39 = arith.addf %37, %38 : vector<48x128xf32>
    %40 = arith.truncf %39 : vector<48x128xf32> to vector<48x128xbf16>
    %c0_16 = arith.constant 0 : index
    %c0_17 = arith.constant 0 : index
    %c0_18 = arith.constant 0 : index
    %41 = vector.load %arg4[%c0_16, %c0_17, %c0_18] : memref<1x128x384xbf16, #tpu.memory_space<vmem>>, vector<1x128x384xbf16>
    %42 = vector.shape_cast %41 : vector<1x128x384xbf16> to vector<128x384xbf16>
    %cst_19 = arith.constant dense<0.000000e+00> : vector<48x384xf32>
    %43 = tpu.matmul %40, %42, %cst_19 {dimension_numbers = #tpu.dot_dimension_numbers<[1], [0], [0], [1], [0, 0, 1, 1], [], []>} : vector<48x128xbf16>, vector<128x384xbf16>, vector<48x384xf32> -> vector<48x384xf32>
    %c0_20 = arith.constant 0 : index
    %c0_21 = arith.constant 0 : index
    %c0_22 = arith.constant 0 : index
    %44 = vector.load %arg5[%c0_20, %c0_21, %c0_22] : memref<1x1x384xf32, #tpu.memory_space<vmem>>, vector<1x1x384xf32>
    %45 = vector.shape_cast %44 : vector<1x1x384xf32> to vector<1x384xf32>
    %46 = vector.broadcast %45 : vector<1x384xf32> to vector<48x384xf32>
    %47 = arith.addf %43, %46 : vector<48x384xf32>
    %48 = vector.extract_strided_slice %47 {offsets = [0, 0], sizes = [48, 128], strides = [1, 1]} : vector<48x384xf32> to vector<48x128xf32>
    %49 = vector.extract_strided_slice %47 {offsets = [0, 128], sizes = [48, 128], strides = [1, 1]} : vector<48x384xf32> to vector<48x128xf32>
    %50 = vector.extract_strided_slice %47 {offsets = [0, 256], sizes = [48, 128], strides = [1, 1]} : vector<48x384xf32> to vector<48x128xf32>
    %51 = vector.extract_strided_slice %48 {offsets = [0, 0], sizes = [48, 32], strides = [1, 1]} : vector<48x128xf32> to vector<48x32xf32>
    %52 = vector.extract_strided_slice %48 {offsets = [0, 32], sizes = [48, 32], strides = [1, 1]} : vector<48x128xf32> to vector<48x32xf32>
    %53 = vector.extract_strided_slice %48 {offsets = [0, 64], sizes = [48, 32], strides = [1, 1]} : vector<48x128xf32> to vector<48x32xf32>
    %54 = vector.extract_strided_slice %48 {offsets = [0, 96], sizes = [48, 32], strides = [1, 1]} : vector<48x128xf32> to vector<48x32xf32>
    %55 = tpu.concatenate %51, %52, %53, %54 in 0 : vector<48x32xf32>, vector<48x32xf32>, vector<48x32xf32>, vector<48x32xf32> -> vector<192x32xf32>
    %56 = vector.shape_cast %55 : vector<192x32xf32> to vector<8x24x32xf32>
    %57 = arith.truncf %56 : vector<8x24x32xf32> to vector<8x24x32xbf16>
    %58 = vector.extract_strided_slice %49 {offsets = [0, 0], sizes = [48, 32], strides = [1, 1]} : vector<48x128xf32> to vector<48x32xf32>
    %59 = vector.extract_strided_slice %49 {offsets = [0, 32], sizes = [48, 32], strides = [1, 1]} : vector<48x128xf32> to vector<48x32xf32>
    %60 = vector.extract_strided_slice %49 {offsets = [0, 64], sizes = [48, 32], strides = [1, 1]} : vector<48x128xf32> to vector<48x32xf32>
    %61 = vector.extract_strided_slice %49 {offsets = [0, 96], sizes = [48, 32], strides = [1, 1]} : vector<48x128xf32> to vector<48x32xf32>
    %62 = tpu.concatenate %58, %59, %60, %61 in 0 : vector<48x32xf32>, vector<48x32xf32>, vector<48x32xf32>, vector<48x32xf32> -> vector<192x32xf32>
    %63 = vector.shape_cast %62 : vector<192x32xf32> to vector<8x24x32xf32>
    %64 = arith.truncf %63 : vector<8x24x32xf32> to vector<8x24x32xbf16>
    %65 = vector.extract_strided_slice %50 {offsets = [0, 0], sizes = [48, 32], strides = [1, 1]} : vector<48x128xf32> to vector<48x32xf32>
    %66 = vector.extract_strided_slice %50 {offsets = [0, 32], sizes = [48, 32], strides = [1, 1]} : vector<48x128xf32> to vector<48x32xf32>
    %67 = vector.extract_strided_slice %50 {offsets = [0, 64], sizes = [48, 32], strides = [1, 1]} : vector<48x128xf32> to vector<48x32xf32>
    %68 = vector.extract_strided_slice %50 {offsets = [0, 96], sizes = [48, 32], strides = [1, 1]} : vector<48x128xf32> to vector<48x32xf32>
    %69 = tpu.concatenate %65, %66, %67, %68 in 0 : vector<48x32xf32>, vector<48x32xf32>, vector<48x32xf32>, vector<48x32xf32> -> vector<192x32xf32>
    %70 = vector.shape_cast %69 : vector<192x32xf32> to vector<8x24x32xf32>
    "tpu.trace_start"() <{level = 10 : i32, message = "bqd,bkd->bqk"}> : () -> ()
    %cst_23 = arith.constant dense<0.000000e+00> : vector<8x24x24xf32>
    %71 = tpu.matmul %57, %64, %cst_23 {dimension_numbers = #tpu.dot_dimension_numbers<[2], [2], [1], [1], [0, 0, 0, 1, 1, 1], [0], [0]>} : vector<8x24x32xbf16>, vector<8x24x32xbf16>, vector<8x24x24xf32> -> vector<8x24x24xf32>
    "tpu.trace_stop"() : () -> ()
    %cst_24 = arith.constant 0.176776692 : f32
    %72 = vector.broadcast %cst_24 : f32 to vector<8x24x24xf32>
    %73 = arith.mulf %71, %72 : vector<8x24x24xf32>
    %74 = vector.broadcast %5 : vector<1x1x24xf32> to vector<8x24x24xf32>
    %75 = arith.addf %73, %74 : vector<8x24x24xf32>
    %cst_25 = arith.constant dense<0xFF800000> : vector<8x24xf32>
    %76 = vector.multi_reduction <maximumf>, %75, %cst_25 [2] : vector<8x24x24xf32> to vector<8x24xf32>
    %77 = vector.shape_cast %76 : vector<8x24xf32> to vector<8x24x1xf32>
    %78 = vector.broadcast %77 : vector<8x24x1xf32> to vector<8x24x24xf32>
    %79 = arith.subf %75, %78 : vector<8x24x24xf32>
    %80 = math.exp %79 : vector<8x24x24xf32>
    %cst_26 = arith.constant dense<0.000000e+00> : vector<8x24xf32>
    %81 = vector.multi_reduction <add>, %80, %cst_26 [2] : vector<8x24x24xf32> to vector<8x24xf32>
    %82 = vector.shape_cast %81 : vector<8x24xf32> to vector<8x24x1xf32>
    %83 = tpu.reciprocal %82 {approx = true} : vector<8x24x1xf32> -> vector<8x24x1xf32>
    %84 = vector.broadcast %83 : vector<8x24x1xf32> to vector<8x24x24xf32>
    %85 = arith.mulf %80, %84 : vector<8x24x24xf32>
    %86 = arith.truncf %85 : vector<8x24x24xf32> to vector<8x24x24xbf16>
    %87 = arith.truncf %70 : vector<8x24x32xf32> to vector<8x24x32xbf16>
    "tpu.trace_start"() <{level = 10 : i32, message = "bqk,bkd->bqd"}> : () -> ()
    %cst_27 = arith.constant dense<0.000000e+00> : vector<8x24x32xf32>
    %88 = tpu.matmul %86, %87, %cst_27 {dimension_numbers = #tpu.dot_dimension_numbers<[2], [1], [1], [2], [0, 0, 0, 1, 1, 2], [0], [0]>} : vector<8x24x24xbf16>, vector<8x24x32xbf16>, vector<8x24x32xf32> -> vector<8x24x32xf32>
    %c5_i32 = arith.constant 5 : i32
    "tpu.trace_stop"() : () -> ()
    %89 = arith.cmpi eq, %arg1, %c5_i32 : i32
    %90 = arith.extui %89 : i1 to i32
    %c0_i32_28 = arith.constant 0 : i32
    %91 = arith.cmpi ne, %90, %c0_i32_28 : i32
    scf.if %91 {
      %180 = arith.truncf %49 : vector<48x128xf32> to vector<48x128xbf16>
      %c0_74 = arith.constant 0 : index
      %c0_75 = arith.constant 0 : index
      %181 = vector.load %arg18[%c0_74, %c0_75] : memref<128x128xbf16, #tpu.memory_space<vmem>>, vector<128x128xbf16>
      %cst_76 = arith.constant dense<0.000000e+00> : vector<48x128xf32>
      %182 = tpu.matmul %180, %181, %cst_76 {dimension_numbers = #tpu.dot_dimension_numbers<[1], [0], [0], [1], [0, 0, 1, 1], [], []>} : vector<48x128xbf16>, vector<128x128xbf16>, vector<48x128xf32> -> vector<48x128xf32>
      %c0_77 = arith.constant 0 : index
      %c0_78 = arith.constant 0 : index
      %183 = vector.load %arg19[%c0_77, %c0_78] : memref<1x128xf32, #tpu.memory_space<vmem>>, vector<1x128xf32>
      %184 = vector.broadcast %183 : vector<1x128xf32> to vector<48x128xf32>
      %185 = arith.addf %182, %184 : vector<48x128xf32>
      %cst_79 = arith.constant 0.000000e+00 : f32
      %186 = vector.broadcast %cst_79 : f32 to vector<48x128xf32>
      %187 = arith.maximumf %185, %186 : vector<48x128xf32>
      %188 = arith.truncf %187 : vector<48x128xf32> to vector<48x128xbf16>
      %c0_80 = arith.constant 0 : index
      %c0_81 = arith.constant 0 : index
      %189 = vector.load %arg20[%c0_80, %c0_81] : memref<128x128xbf16, #tpu.memory_space<vmem>>, vector<128x128xbf16>
      %cst_82 = arith.constant dense<0.000000e+00> : vector<48x128xf32>
      %190 = tpu.matmul %188, %189, %cst_82 {dimension_numbers = #tpu.dot_dimension_numbers<[1], [0], [0], [1], [0, 0, 1, 1], [], []>} : vector<48x128xbf16>, vector<128x128xbf16>, vector<48x128xf32> -> vector<48x128xf32>
      %c0_83 = arith.constant 0 : index
      %c0_84 = arith.constant 0 : index
      %191 = vector.load %arg21[%c0_83, %c0_84] : memref<1x128xf32, #tpu.memory_space<vmem>>, vector<1x128xf32>
      %192 = vector.broadcast %191 : vector<1x128xf32> to vector<48x128xf32>
      %193 = arith.addf %190, %192 : vector<48x128xf32>
      %cst_85 = arith.constant 0.000000e+00 : f32
      %194 = vector.broadcast %cst_85 : f32 to vector<48x128xf32>
      %195 = arith.maximumf %193, %194 : vector<48x128xf32>
      %196 = arith.truncf %195 : vector<48x128xf32> to vector<48x128xbf16>
      %c0_86 = arith.constant 0 : index
      %c0_87 = arith.constant 0 : index
      %197 = vector.load %arg22[%c0_86, %c0_87] : memref<128x128xbf16, #tpu.memory_space<vmem>>, vector<128x128xbf16>
      %cst_88 = arith.constant dense<0.000000e+00> : vector<48x128xf32>
      %198 = tpu.matmul %196, %197, %cst_88 {dimension_numbers = #tpu.dot_dimension_numbers<[1], [0], [0], [1], [0, 0, 1, 1], [], []>} : vector<48x128xbf16>, vector<128x128xbf16>, vector<48x128xf32> -> vector<48x128xf32>
      %c0_89 = arith.constant 0 : index
      %c0_90 = arith.constant 0 : index
      %199 = vector.load %arg23[%c0_89, %c0_90] : memref<1x128xf32, #tpu.memory_space<vmem>>, vector<1x128xf32>
      %200 = vector.broadcast %199 : vector<1x128xf32> to vector<48x128xf32>
      %201 = arith.addf %198, %200 : vector<48x128xf32>
      %cst_91 = arith.constant 0.000000e+00 : f32
      %202 = vector.broadcast %cst_91 : f32 to vector<48x128xf32>
      %203 = arith.subf %202, %201 : vector<48x128xf32>
      %204 = math.exp %203 : vector<48x128xf32>
      %cst_92 = arith.constant 1.000000e+00 : f32
      %205 = vector.broadcast %cst_92 : f32 to vector<48x128xf32>
      %206 = arith.addf %205, %204 : vector<48x128xf32>
      %cst_93 = arith.constant 1.000000e+00 : f32
      %207 = vector.broadcast %cst_93 : f32 to vector<48x128xf32>
      %208 = arith.divf %207, %206 : vector<48x128xf32>
      %c0_94 = arith.constant 0 : index
      %c0_95 = arith.constant 0 : index
      %209 = vector.load %arg25[%c0_94, %c0_95] : memref<48x128xf32, #tpu.memory_space<vmem>>, vector<48x128xf32>
      tpu.vector_store %arg25[%c0_94, %c0_95], %208 {strides = array<i32>} : memref<48x128xf32, #tpu.memory_space<vmem>>, vector<48x128xf32>,
      %210 = vector.extract_strided_slice %208 {offsets = [0, 0], sizes = [48, 4], strides = [1, 1]} : vector<48x128xf32> to vector<48x4xf32>
      %cst_96 = arith.constant 0.000000e+00 : f32
      %211 = vector.broadcast %cst_96 : f32 to vector<48x4xf32>
      %212 = arith.subf %211, %210 : vector<48x4xf32>
      %cst_97 = arith.constant 1.000000e-10 : f32
      %213 = vector.broadcast %cst_97 : f32 to vector<48x4xf32>
      %214 = arith.addf %210, %213 : vector<48x4xf32>
      %215 = math.log %214 : vector<48x4xf32>
      %cst_98 = arith.constant 2.000000e+00 : f32
      %216 = math.log %cst_98 : f32
      %217 = vector.broadcast %216 : f32 to vector<48x4xf32>
      %218 = arith.divf %215, %217 : vector<48x4xf32>
      %219 = arith.mulf %212, %218 : vector<48x4xf32>
      %cst_99 = arith.constant 1.000000e+00 : f32
      %220 = vector.broadcast %cst_99 : f32 to vector<48x4xf32>
      %221 = arith.subf %220, %210 : vector<48x4xf32>
      %cst_100 = arith.constant 1.000000e+00 : f32
      %222 = vector.broadcast %cst_100 : f32 to vector<48x4xf32>
      %223 = arith.subf %222, %210 : vector<48x4xf32>
      %cst_101 = arith.constant 1.000000e-10 : f32
      %224 = vector.broadcast %cst_101 : f32 to vector<48x4xf32>
      %225 = arith.addf %223, %224 : vector<48x4xf32>
      %226 = math.log %225 : vector<48x4xf32>
      %cst_102 = arith.constant 2.000000e+00 : f32
      %227 = math.log %cst_102 : f32
      %228 = vector.broadcast %227 : f32 to vector<48x4xf32>
      %229 = arith.divf %226, %228 : vector<48x4xf32>
      %230 = arith.mulf %221, %229 : vector<48x4xf32>
      %231 = arith.subf %219, %230 : vector<48x4xf32>
      %232 = vector.extract_strided_slice %231 {offsets = [0, 0], sizes = [48, 1], strides = [1, 1]} : vector<48x4xf32> to vector<48x1xf32>
      %233 = vector.shape_cast %232 : vector<48x1xf32> to vector<2x24x1xf32>
      %234 = vector.extract_strided_slice %231 {offsets = [0, 1], sizes = [48, 1], strides = [1, 1]} : vector<48x4xf32> to vector<48x1xf32>
      %235 = vector.shape_cast %234 : vector<48x1xf32> to vector<2x24x1xf32>
      %236 = vector.extract_strided_slice %231 {offsets = [0, 2], sizes = [48, 1], strides = [1, 1]} : vector<48x4xf32> to vector<48x1xf32>
      %237 = vector.shape_cast %236 : vector<48x1xf32> to vector<2x24x1xf32>
      %238 = vector.extract_strided_slice %231 {offsets = [0, 3], sizes = [48, 1], strides = [1, 1]} : vector<48x4xf32> to vector<48x1xf32>
      %239 = vector.shape_cast %238 : vector<48x1xf32> to vector<2x24x1xf32>
      %240 = tpu.concatenate %233, %235, %237, %239 in 0 : vector<2x24x1xf32>, vector<2x24x1xf32>, vector<2x24x1xf32>, vector<2x24x1xf32> -> vector<8x24x1xf32>
      %cst_103 = arith.constant 1.000000e+00 : f32
      %241 = vector.shape_cast %10 : vector<1x24x1xi1> to vector<1x24x1xi1>
      %242 = vector.broadcast %241 : vector<1x24x1xi1> to vector<8x24x1xi1>
      %243 = vector.broadcast %cst_103 : f32 to vector<8x24x1xf32>
      %244 = arith.select %242, %240, %243 : vector<8x24x1xi1>, vector<8x24x1xf32>
      %245 = vector.shape_cast %244 : vector<8x24x1xf32> to vector<8x24x1xf32>
      %246 = vector.broadcast %245 : vector<8x24x1xf32> to vector<8x24x32xf32>
      %c0_104 = arith.constant 0 : index
      %c0_105 = arith.constant 0 : index
      %c0_106 = arith.constant 0 : index
      %247 = vector.load %arg27[%c0_104, %c0_105, %c0_106] : memref<8x24x32xf32, #tpu.memory_space<vmem>>, vector<8x24x32xf32>
      tpu.vector_store %arg27[%c0_104, %c0_105, %c0_106], %246 {strides = array<i32>} : memref<8x24x32xf32, #tpu.memory_space<vmem>>, vector<8x24x32xf32>,
    } else {
    }
    %c0_29 = arith.constant 0 : index
    %c0_30 = arith.constant 0 : index
    %c0_31 = arith.constant 0 : index
    %92 = vector.load %arg27[%c0_29, %c0_30, %c0_31] : memref<8x24x32xf32, #tpu.memory_space<vmem>>, vector<8x24x32xf32>
    %93 = arith.mulf %70, %92 : vector<8x24x32xf32>
    %94 = arith.truncf %93 : vector<8x24x32xf32> to vector<8x24x32xbf16>
    %95 = vector.extract_strided_slice %86 {offsets = [0, 16, 0], sizes = [8, 1, 24], strides = [1, 1, 1]} : vector<8x24x24xbf16> to vector<8x1x24xbf16>
    "tpu.trace_start"() <{level = 10 : i32, message = "bqk,bkd->bqd"}> : () -> ()
    %cst_32 = arith.constant dense<0.000000e+00> : vector<8x1x32xf32>
    %96 = tpu.matmul %95, %94, %cst_32 {dimension_numbers = #tpu.dot_dimension_numbers<[2], [1], [1], [2], [0, 0, 0, 1, 1, 2], [0], [0]>} : vector<8x1x24xbf16>, vector<8x24x32xbf16>, vector<8x1x32xf32> -> vector<8x1x32xf32>
    "tpu.trace_stop"() : () -> ()
    %97 = vector.shape_cast %8 : vector<1x24x1xi1> to vector<1x24x1xi1>
    %98 = vector.broadcast %97 : vector<1x24x1xi1> to vector<8x24x32xi1>
    %99 = vector.shape_cast %96 : vector<8x1x32xf32> to vector<8x1x32xf32>
    %100 = vector.broadcast %99 : vector<8x1x32xf32> to vector<8x24x32xf32>
    %101 = arith.select %98, %100, %88 : vector<8x24x32xi1>, vector<8x24x32xf32>
    %102 = vector.shape_cast %101 : vector<8x24x32xf32> to vector<4x48x32xf32>
    %103 = vector.extract_strided_slice %102 {offsets = [0, 0, 0], sizes = [1, 48, 32], strides = [1, 1, 1]} : vector<4x48x32xf32> to vector<1x48x32xf32>
    %104 = vector.shape_cast %103 : vector<1x48x32xf32> to vector<48x32xf32>
    %105 = vector.extract_strided_slice %102 {offsets = [1, 0, 0], sizes = [1, 48, 32], strides = [1, 1, 1]} : vector<4x48x32xf32> to vector<1x48x32xf32>
    %106 = vector.shape_cast %105 : vector<1x48x32xf32> to vector<48x32xf32>
    %107 = vector.extract_strided_slice %102 {offsets = [2, 0, 0], sizes = [1, 48, 32], strides = [1, 1, 1]} : vector<4x48x32xf32> to vector<1x48x32xf32>
    %108 = vector.shape_cast %107 : vector<1x48x32xf32> to vector<48x32xf32>
    %109 = vector.extract_strided_slice %102 {offsets = [3, 0, 0], sizes = [1, 48, 32], strides = [1, 1, 1]} : vector<4x48x32xf32> to vector<1x48x32xf32>
    %110 = vector.shape_cast %109 : vector<1x48x32xf32> to vector<48x32xf32>
    %111 = tpu.concatenate %104, %106, %108, %110 in 1 : vector<48x32xf32>, vector<48x32xf32>, vector<48x32xf32>, vector<48x32xf32> -> vector<48x128xf32>
    %112 = arith.truncf %111 : vector<48x128xf32> to vector<48x128xbf16>
    %c0_33 = arith.constant 0 : index
    %c0_34 = arith.constant 0 : index
    %c0_35 = arith.constant 0 : index
    %113 = vector.load %arg6[%c0_33, %c0_34, %c0_35] : memref<1x128x128xbf16, #tpu.memory_space<vmem>>, vector<1x128x128xbf16>
    %114 = vector.shape_cast %113 : vector<1x128x128xbf16> to vector<128x128xbf16>
    %cst_36 = arith.constant dense<0.000000e+00> : vector<48x128xf32>
    %115 = tpu.matmul %112, %114, %cst_36 {dimension_numbers = #tpu.dot_dimension_numbers<[1], [0], [0], [1], [0, 0, 1, 1], [], []>} : vector<48x128xbf16>, vector<128x128xbf16>, vector<48x128xf32> -> vector<48x128xf32>
    %c0_37 = arith.constant 0 : index
    %c0_38 = arith.constant 0 : index
    %c0_39 = arith.constant 0 : index
    %116 = vector.load %arg7[%c0_37, %c0_38, %c0_39] : memref<1x1x128xf32, #tpu.memory_space<vmem>>, vector<1x1x128xf32>
    %117 = vector.shape_cast %116 : vector<1x1x128xf32> to vector<1x128xf32>
    %118 = vector.broadcast %117 : vector<1x128xf32> to vector<48x128xf32>
    %119 = arith.addf %115, %118 : vector<48x128xf32>
    %120 = arith.addf %119, %15 : vector<48x128xf32>
    %c0_40 = arith.constant 0 : index
    %c0_41 = arith.constant 0 : index
    %c0_42 = arith.constant 0 : index
    %121 = vector.load %arg10[%c0_40, %c0_41, %c0_42] : memref<1x1x128xf32, #tpu.memory_space<vmem>>, vector<1x1x128xf32>
    %122 = vector.shape_cast %121 : vector<1x1x128xf32> to vector<1x128xf32>
    %c0_43 = arith.constant 0 : index
    %c0_44 = arith.constant 0 : index
    %c0_45 = arith.constant 0 : index
    %123 = vector.load %arg11[%c0_43, %c0_44, %c0_45] : memref<1x1x128xf32, #tpu.memory_space<vmem>>, vector<1x1x128xf32>
    %124 = vector.shape_cast %123 : vector<1x1x128xf32> to vector<1x128xf32>
    %cst_46 = arith.constant dense<0.000000e+00> : vector<48xf32>
    %125 = vector.multi_reduction <add>, %120, %cst_46 [1] : vector<48x128xf32> to vector<48xf32>
    %126 = vector.shape_cast %125 : vector<48xf32> to vector<48x1xf32>
    %cst_47 = arith.constant 1.280000e+02 : f32
    %127 = vector.broadcast %cst_47 : f32 to vector<48x1xf32>
    %128 = arith.divf %126, %127 : vector<48x1xf32>
    %129 = vector.broadcast %128 : vector<48x1xf32> to vector<48x128xf32>
    %130 = arith.subf %120, %129 : vector<48x128xf32>
    %131 = arith.mulf %130, %130 : vector<48x128xf32>
    %cst_48 = arith.constant dense<0.000000e+00> : vector<48xf32>
    %132 = vector.multi_reduction <add>, %131, %cst_48 [1] : vector<48x128xf32> to vector<48xf32>
    %133 = vector.shape_cast %132 : vector<48xf32> to vector<48x1xf32>
    %cst_49 = arith.constant 1.280000e+02 : f32
    %134 = vector.broadcast %cst_49 : f32 to vector<48x1xf32>
    %135 = arith.divf %133, %134 : vector<48x1xf32>
    %cst_50 = arith.constant 9.99999997E-7 : f32
    %136 = vector.broadcast %cst_50 : f32 to vector<48x1xf32>
    %137 = arith.addf %135, %136 : vector<48x1xf32>
    %138 = math.rsqrt %137 : vector<48x1xf32>
    %139 = vector.broadcast %138 : vector<48x1xf32> to vector<48x128xf32>
    %140 = arith.mulf %130, %139 : vector<48x128xf32>
    %141 = vector.broadcast %122 : vector<1x128xf32> to vector<48x128xf32>
    %142 = arith.mulf %140, %141 : vector<48x128xf32>
    %143 = vector.broadcast %124 : vector<1x128xf32> to vector<48x128xf32>
    %144 = arith.addf %142, %143 : vector<48x128xf32>
    %145 = arith.truncf %144 : vector<48x128xf32> to vector<48x128xbf16>
    %c0_51 = arith.constant 0 : index
    %c0_52 = arith.constant 0 : index
    %c0_53 = arith.constant 0 : index
    %146 = vector.load %arg12[%c0_51, %c0_52, %c0_53] : memref<1x128x256xbf16, #tpu.memory_space<vmem>>, vector<1x128x256xbf16>
    %147 = vector.shape_cast %146 : vector<1x128x256xbf16> to vector<128x256xbf16>
    %cst_54 = arith.constant dense<0.000000e+00> : vector<48x256xf32>
    %148 = tpu.matmul %145, %147, %cst_54 {dimension_numbers = #tpu.dot_dimension_numbers<[1], [0], [0], [1], [0, 0, 1, 1], [], []>} : vector<48x128xbf16>, vector<128x256xbf16>, vector<48x256xf32> -> vector<48x256xf32>
    %c0_55 = arith.constant 0 : index
    %c0_56 = arith.constant 0 : index
    %c0_57 = arith.constant 0 : index
    %149 = vector.load %arg13[%c0_55, %c0_56, %c0_57] : memref<1x1x256xf32, #tpu.memory_space<vmem>>, vector<1x1x256xf32>
    %150 = vector.shape_cast %149 : vector<1x1x256xf32> to vector<1x256xf32>
    %151 = vector.broadcast %150 : vector<1x256xf32> to vector<48x256xf32>
    %152 = arith.addf %148, %151 : vector<48x256xf32>
    %cst_58 = arith.constant 5.000000e-01 : f32
    %153 = vector.broadcast %cst_58 : f32 to vector<48x256xf32>
    %154 = arith.mulf %153, %152 : vector<48x256xf32>
    %cst_59 = arith.constant 4.471500e-02 : f32
    %155 = vector.broadcast %cst_59 : f32 to vector<48x256xf32>
    %156 = arith.mulf %155, %152 : vector<48x256xf32>
    %157 = arith.mulf %156, %152 : vector<48x256xf32>
    %158 = arith.mulf %157, %152 : vector<48x256xf32>
    %159 = arith.addf %152, %158 : vector<48x256xf32>
    %cst_60 = arith.constant 0.797884583 : f32
    %160 = vector.broadcast %cst_60 : f32 to vector<48x256xf32>
    %161 = arith.mulf %160, %159 : vector<48x256xf32>
    %162 = math.tanh %161 : vector<48x256xf32>
    %cst_61 = arith.constant 1.000000e+00 : f32
    %163 = vector.broadcast %cst_61 : f32 to vector<48x256xf32>
    %164 = arith.addf %163, %162 : vector<48x256xf32>
    %165 = arith.mulf %154, %164 : vector<48x256xf32>
    %166 = arith.truncf %165 : vector<48x256xf32> to vector<48x256xbf16>
    %c0_62 = arith.constant 0 : index
    %c0_63 = arith.constant 0 : index
    %c0_64 = arith.constant 0 : index
    %167 = vector.load %arg14[%c0_62, %c0_63, %c0_64] : memref<1x256x128xbf16, #tpu.memory_space<vmem>>, vector<1x256x128xbf16>
    %168 = vector.shape_cast %167 : vector<1x256x128xbf16> to vector<256x128xbf16>
    %cst_65 = arith.constant dense<0.000000e+00> : vector<48x128xf32>
    %169 = tpu.matmul %166, %168, %cst_65 {dimension_numbers = #tpu.dot_dimension_numbers<[1], [0], [0], [1], [0, 0, 1, 1], [], []>} : vector<48x256xbf16>, vector<256x128xbf16>, vector<48x128xf32> -> vector<48x128xf32>
    %c0_66 = arith.constant 0 : index
    %c0_67 = arith.constant 0 : index
    %c0_68 = arith.constant 0 : index
    %170 = vector.load %arg15[%c0_66, %c0_67, %c0_68] : memref<1x1x128xf32, #tpu.memory_space<vmem>>, vector<1x1x128xf32>
    %171 = vector.shape_cast %170 : vector<1x1x128xf32> to vector<1x128xf32>
    %172 = vector.broadcast %171 : vector<1x128xf32> to vector<48x128xf32>
    %173 = arith.addf %169, %172 : vector<48x128xf32>
    %174 = arith.addf %173, %120 : vector<48x128xf32>
    %175 = vector.shape_cast %174 : vector<48x128xf32> to vector<2x24x128xf32>
    %c0_69 = arith.constant 0 : index
    %c0_70 = arith.constant 0 : index
    %c0_71 = arith.constant 0 : index
    %176 = vector.load %arg26[%c0_69, %c0_70, %c0_71] : memref<2x24x128xf32, #tpu.memory_space<vmem>>, vector<2x24x128xf32>
    tpu.vector_store %arg26[%c0_69, %c0_70, %c0_71], %175 {strides = array<i32>} : memref<2x24x128xf32, #tpu.memory_space<vmem>>, vector<2x24x128xf32>,
    %c5_i32_72 = arith.constant 5 : i32
    %177 = arith.cmpi eq, %arg1, %c5_i32_72 : i32
    %178 = arith.extui %177 : i1 to i32
    %c0_i32_73 = arith.constant 0 : i32
    %179 = arith.cmpi ne, %178, %c0_i32_73 : i32
    scf.if %179 {
      %c0_74 = arith.constant 0 : index
      %c0_75 = arith.constant 0 : index
      %180 = vector.load %arg16[%c0_74, %c0_75] : memref<1x128xf32, #tpu.memory_space<vmem>>, vector<1x128xf32>
      %c0_76 = arith.constant 0 : index
      %c0_77 = arith.constant 0 : index
      %181 = vector.load %arg17[%c0_76, %c0_77] : memref<1x128xf32, #tpu.memory_space<vmem>>, vector<1x128xf32>
      %cst_78 = arith.constant dense<0.000000e+00> : vector<48xf32>
      %182 = vector.multi_reduction <add>, %174, %cst_78 [1] : vector<48x128xf32> to vector<48xf32>
      %183 = vector.shape_cast %182 : vector<48xf32> to vector<48x1xf32>
      %cst_79 = arith.constant 1.280000e+02 : f32
      %184 = vector.broadcast %cst_79 : f32 to vector<48x1xf32>
      %185 = arith.divf %183, %184 : vector<48x1xf32>
      %186 = vector.broadcast %185 : vector<48x1xf32> to vector<48x128xf32>
      %187 = arith.subf %174, %186 : vector<48x128xf32>
      %188 = arith.mulf %187, %187 : vector<48x128xf32>
      %cst_80 = arith.constant dense<0.000000e+00> : vector<48xf32>
      %189 = vector.multi_reduction <add>, %188, %cst_80 [1] : vector<48x128xf32> to vector<48xf32>
      %190 = vector.shape_cast %189 : vector<48xf32> to vector<48x1xf32>
      %cst_81 = arith.constant 1.280000e+02 : f32
      %191 = vector.broadcast %cst_81 : f32 to vector<48x1xf32>
      %192 = arith.divf %190, %191 : vector<48x1xf32>
      %cst_82 = arith.constant 9.99999997E-7 : f32
      %193 = vector.broadcast %cst_82 : f32 to vector<48x1xf32>
      %194 = arith.addf %192, %193 : vector<48x1xf32>
      %195 = math.rsqrt %194 : vector<48x1xf32>
      %196 = vector.broadcast %195 : vector<48x1xf32> to vector<48x128xf32>
      %197 = arith.mulf %187, %196 : vector<48x128xf32>
      %198 = vector.broadcast %180 : vector<1x128xf32> to vector<48x128xf32>
      %199 = arith.mulf %197, %198 : vector<48x128xf32>
      %200 = vector.broadcast %181 : vector<1x128xf32> to vector<48x128xf32>
      %201 = arith.addf %199, %200 : vector<48x128xf32>
      %c0_83 = arith.constant 0 : index
      %c0_84 = arith.constant 0 : index
      %202 = vector.load %arg24[%c0_83, %c0_84] : memref<48x128xf32, #tpu.memory_space<vmem>>, vector<48x128xf32>
      tpu.vector_store %arg24[%c0_83, %c0_84], %201 {strides = array<i32>} : memref<48x128xf32, #tpu.memory_space<vmem>>, vector<48x128xf32>,
    } else {
    }
    return
  }
  func.func @transform_0(%arg0: i32, %arg1: i32) -> (i32, i32, i32) {
    %c0_i32 = arith.constant 0 : i32
    %c0_i32_0 = arith.constant 0 : i32
    %c0_i32_1 = arith.constant 0 : i32
    return %arg0, %c0_i32, %c0_i32_0 : i32, i32, i32
  }
  func.func @transform_1(%arg0: i32, %arg1: i32) -> (i32, i32) {
    %c0_i32 = arith.constant 0 : i32
    %c0_i32_0 = arith.constant 0 : i32
    %c0_i32_1 = arith.constant 0 : i32
    return %c0_i32, %c0_i32_0 : i32, i32
  }
  func.func @transform_2(%arg0: i32, %arg1: i32) -> (i32, i32, i32) {
    %c0_i32 = arith.constant 0 : i32
    %c0_i32_0 = arith.constant 0 : i32
    %c0_i32_1 = arith.constant 0 : i32
    return %arg1, %c0_i32, %c0_i32_0 : i32, i32, i32
  }
  func.func @transform_3(%arg0: i32, %arg1: i32) -> (i32, i32, i32) {
    %c0_i32 = arith.constant 0 : i32
    %c0_i32_0 = arith.constant 0 : i32
    %c0_i32_1 = arith.constant 0 : i32
    return %arg1, %c0_i32, %c0_i32_0 : i32, i32, i32
  }
  func.func @transform_4(%arg0: i32, %arg1: i32) -> (i32, i32, i32) {
    %c0_i32 = arith.constant 0 : i32
    %c0_i32_0 = arith.constant 0 : i32
    %c0_i32_1 = arith.constant 0 : i32
    return %arg1, %c0_i32, %c0_i32_0 : i32, i32, i32
  }
  func.func @transform_5(%arg0: i32, %arg1: i32) -> (i32, i32, i32) {
    %c0_i32 = arith.constant 0 : i32
    %c0_i32_0 = arith.constant 0 : i32
    %c0_i32_1 = arith.constant 0 : i32
    return %arg1, %c0_i32, %c0_i32_0 : i32, i32, i32
  }
  func.func @transform_6(%arg0: i32, %arg1: i32) -> (i32, i32, i32) {
    %c0_i32 = arith.constant 0 : i32
    %c0_i32_0 = arith.constant 0 : i32
    %c0_i32_1 = arith.constant 0 : i32
    return %arg1, %c0_i32, %c0_i32_0 : i32, i32, i32
  }
  func.func @transform_7(%arg0: i32, %arg1: i32) -> (i32, i32, i32) {
    %c0_i32 = arith.constant 0 : i32
    %c0_i32_0 = arith.constant 0 : i32
    %c0_i32_1 = arith.constant 0 : i32
    return %arg1, %c0_i32, %c0_i32_0 : i32, i32, i32
  }
  func.func @transform_8(%arg0: i32, %arg1: i32) -> (i32, i32, i32) {
    %c0_i32 = arith.constant 0 : i32
    %c0_i32_0 = arith.constant 0 : i32
    %c0_i32_1 = arith.constant 0 : i32
    return %arg1, %c0_i32, %c0_i32_0 : i32, i32, i32
  }
  func.func @transform_9(%arg0: i32, %arg1: i32) -> (i32, i32, i32) {
    %c0_i32 = arith.constant 0 : i32
    %c0_i32_0 = arith.constant 0 : i32
    %c0_i32_1 = arith.constant 0 : i32
    return %arg1, %c0_i32, %c0_i32_0 : i32, i32, i32
  }
  func.func @transform_10(%arg0: i32, %arg1: i32) -> (i32, i32, i32) {
    %c0_i32 = arith.constant 0 : i32
    %c0_i32_0 = arith.constant 0 : i32
    %c0_i32_1 = arith.constant 0 : i32
    return %arg1, %c0_i32, %c0_i32_0 : i32, i32, i32
  }
  func.func @transform_11(%arg0: i32, %arg1: i32) -> (i32, i32, i32) {
    %c0_i32 = arith.constant 0 : i32
    %c0_i32_0 = arith.constant 0 : i32
    %c0_i32_1 = arith.constant 0 : i32
    return %arg1, %c0_i32, %c0_i32_0 : i32, i32, i32
  }
  func.func @transform_12(%arg0: i32, %arg1: i32) -> (i32, i32, i32) {
    %c0_i32 = arith.constant 0 : i32
    %c0_i32_0 = arith.constant 0 : i32
    %c0_i32_1 = arith.constant 0 : i32
    return %arg1, %c0_i32, %c0_i32_0 : i32, i32, i32
  }
  func.func @transform_13(%arg0: i32, %arg1: i32) -> (i32, i32, i32) {
    %c0_i32 = arith.constant 0 : i32
    %c0_i32_0 = arith.constant 0 : i32
    %c0_i32_1 = arith.constant 0 : i32
    return %arg1, %c0_i32, %c0_i32_0 : i32, i32, i32
  }
  func.func @transform_14(%arg0: i32, %arg1: i32) -> (i32, i32) {
    %c0_i32 = arith.constant 0 : i32
    %c0_i32_0 = arith.constant 0 : i32
    %c0_i32_1 = arith.constant 0 : i32
    return %c0_i32, %c0_i32_0 : i32, i32
  }
  func.func @transform_15(%arg0: i32, %arg1: i32) -> (i32, i32) {
    %c0_i32 = arith.constant 0 : i32
    %c0_i32_0 = arith.constant 0 : i32
    %c0_i32_1 = arith.constant 0 : i32
    return %c0_i32, %c0_i32_0 : i32, i32
  }
  func.func @transform_16(%arg0: i32, %arg1: i32) -> (i32, i32) {
    %c0_i32 = arith.constant 0 : i32
    %c0_i32_0 = arith.constant 0 : i32
    %c0_i32_1 = arith.constant 0 : i32
    return %c0_i32, %c0_i32_0 : i32, i32
  }
  func.func @transform_17(%arg0: i32, %arg1: i32) -> (i32, i32) {
    %c0_i32 = arith.constant 0 : i32
    %c0_i32_0 = arith.constant 0 : i32
    %c0_i32_1 = arith.constant 0 : i32
    return %c0_i32, %c0_i32_0 : i32, i32
  }
  func.func @transform_18(%arg0: i32, %arg1: i32) -> (i32, i32) {
    %c0_i32 = arith.constant 0 : i32
    %c0_i32_0 = arith.constant 0 : i32
    %c0_i32_1 = arith.constant 0 : i32
    return %c0_i32, %c0_i32_0 : i32, i32
  }
  func.func @transform_19(%arg0: i32, %arg1: i32) -> (i32, i32) {
    %c0_i32 = arith.constant 0 : i32
    %c0_i32_0 = arith.constant 0 : i32
    %c0_i32_1 = arith.constant 0 : i32
    return %c0_i32, %c0_i32_0 : i32, i32
  }
  func.func @transform_20(%arg0: i32, %arg1: i32) -> (i32, i32) {
    %c0_i32 = arith.constant 0 : i32
    %c0_i32_0 = arith.constant 0 : i32
    %c0_i32_1 = arith.constant 0 : i32
    return %c0_i32, %c0_i32_0 : i32, i32
  }
  func.func @transform_21(%arg0: i32, %arg1: i32) -> (i32, i32) {
    %c0_i32 = arith.constant 0 : i32
    %c0_i32_0 = arith.constant 0 : i32
    %c0_i32_1 = arith.constant 0 : i32
    return %c0_i32, %c0_i32_0 : i32, i32
  }
  func.func @transform_22(%arg0: i32, %arg1: i32) -> (i32, i32) {
    %c0_i32 = arith.constant 0 : i32
    %c0_i32_0 = arith.constant 0 : i32
    return %arg0, %c0_i32 : i32, i32
  }
  func.func @transform_23(%arg0: i32, %arg1: i32) -> (i32, i32) {
    %c0_i32 = arith.constant 0 : i32
    %c0_i32_0 = arith.constant 0 : i32
    return %arg0, %c0_i32 : i32, i32
  }
}

</mosaic_0001>

<bundles_post_ra>
// kernel: vit_forward.1
= control target key start
LH: loop header
LB: loop body
LE: loop exit
PB: predicated region body
PF: predicated region fallthrough
CT: control target
= control target key end

     0   :  { %s8848_s0 = inlined_call_operand.vmem [shape: f32[4,16,128], index: 0, kind: input, shape index: {}]   ;;  %s8849_s1 = inlined_call_operand.vmem [shape: f32[24,128], index: 1, kind: input, shape index: {}]   ;;  %s8850_s2 = inlined_call_operand.hbm [shape: bf16[6,128,384], index: 2, kind: input, shape index: {}]   ;;  %s8851_s3 = inlined_call_operand.vmem [shape: f32[6,1,384], index: 3, kind: input, shape index: {}]   ;;  %s8852_s4 = inlined_call_operand.hbm [shape: bf16[6,128,128], index: 4, kind: input, shape index: {}]   ;;  %s8853_s5 = inlined_call_operand.hbm [shape: f32[6,1,128], index: 5, kind: input, shape index: {}]   ;;  %s8854_s6 = inlined_call_operand.vmem [shape: f32[6,1,128], index: 6, kind: input, shape index: {}]   ;;  %s8855_s7 = inlined_call_operand.hbm [shape: f32[6,1,128], index: 7, kind: input, shape index: {}]   ;;  %s8856_s8 = inlined_call_operand.hbm [shape: f32[6,1,128], index: 8, kind: input, shape index: {}]   ;;  %s8857_s9 = inlined_call_operand.hbm [shape: f32[6,1,128], index: 9, kind: input, shape index: {}]   ;;  %s8858_s10 = inlined_call_operand.hbm [shape: bf16[6,128,256], index: 10, kind: input, shape index: {}]   ;;  %s8859_s11 = inlined_call_operand.hbm [shape: f32[6,1,256], index: 11, kind: input, shape index: {}]   ;;  %s8860_s12 = inlined_call_operand.hbm [shape: bf16[6,256,128], index: 12, kind: input, shape index: {}]   ;;  %s8861_s13 = inlined_call_operand.hbm [shape: f32[6,1,128], index: 13, kind: input, shape index: {}]   ;;  %s8862_s14 = inlined_call_operand.vmem [shape: f32[1,128], index: 14, kind: input, shape index: {}]   ;;  %s8863_s15 = inlined_call_operand.hbm [shape: f32[1,128], index: 15, kind: input, shape index: {}]   ;;  %s8864_s16 = inlined_call_operand.vmem [shape: bf16[128,128], index: 16, kind: input, shape index: {}]   ;;  %s8865_s17 = inlined_call_operand.hbm [shape: f32[1,128], index: 17, kind: input, shape index: {}]   ;;  %s8866_s18 = inlined_call_operand.vmem [shape: bf16[128,128], index: 18, kind: input, shape index: {}]   ;;  %s8867_s19 = inlined_call_operand.hbm [shape: f32[1,128], index: 19, kind: input, shape index: {}]   ;;  %s8868_s20 = inlined_call_operand.vmem [shape: bf16[128,128], index: 20, kind: input, shape index: {}]   ;;  %s8869_s21 = inlined_call_operand.hbm [shape: f32[1,128], index: 21, kind: input, shape index: {}]   ;;  %s8870_s22 = inlined_call_operand.vmem [shape: f32[96,128], index: 22, kind: output, shape index: {0}]   ;;  %s8871_s23 = inlined_call_operand.vmem [shape: f32[96,128], index: 23, kind: output, shape index: {1}]  }
   0x1   :  { %8907 = sst [smem:[#allocation70_spill]] %s8848_s0 }
   0x2   :  { %8908 = sst [smem:[#allocation71_spill]] %s8849_s1 }
   0x3   :  { %8909 = sst [smem:[#allocation72_spill]] %s8850_s2 }
   0x4   :  { %8910 = sst [smem:[#allocation73_spill]] %s8851_s3 }
   0x5   :  { %8911 = sst [smem:[#allocation74_spill]] %s8852_s4 }
   0x6   :  { %8912 = sst [smem:[#allocation75_spill]] %s8853_s5 }
   0x7   :  { %8913 = sst [smem:[#allocation76_spill]] %s8854_s6 }
   0x8   :  { %8914 = sst [smem:[#allocation77_spill]] %s8855_s7 }
   0x9   :  { %8915 = sst [smem:[#allocation78_spill]] %s8856_s8 }
   0xa   :  { %8916 = sst [smem:[#allocation79_spill]] %s8857_s9 }
   0xb   :  { %8917 = sst [smem:[#allocation80_spill]] %s8858_s10 }
   0xc   :  { %8918 = sst [smem:[#allocation81_spill]] %s8859_s11 }
   0xd   :  { %8919 = sst [smem:[#allocation82_spill]] %s8860_s12 }
   0xe   :  { %8920 = sst [smem:[#allocation83_spill]] %s8861_s13 }
   0xf   :  { %8921 = sst [smem:[#allocation84_spill]] %s8862_s14 }
  0x10   :  { %8922 = sst [smem:[#allocation85_spill]] %s8863_s15 }
  0x11   :  { %8923 = sst [smem:[#allocation86_spill]] %s8864_s16 }
  0x12   :  { %8924 = sst [smem:[#allocation87_spill]] %s8865_s17 }
  0x13   :  { %8925 = sst [smem:[#allocation88_spill]] %s8866_s18 }
  0x14   :  { %8926 = sst [smem:[#allocation89_spill]] %s8867_s19 }
  0x15   :  { %8927 = sst [smem:[#allocation90_spill]] %s8868_s20 }
  0x16   :  { %8928 = sst [smem:[#allocation91_spill]] %s8870_s22 }
  0x17   :  { %8929 = sst [smem:[#allocation92_spill]] %s8871_s23 }
  0x18   :  { %29 = vsyncpa [#allocation5], 0 }
  0x19   :  { %31 = vsyncpa [#allocation5 + $0x1], 0 }
  0x1a   :  { %32 = vsyncpa [#allocation7], 0 }
  0x1b   :  { %34 = vsyncpa [#allocation7 + $0x1], 0 }
  0x1c   :  { %35 = vsyncpa [#allocation10], 0 }
  0x1d   :  { %37 = vsyncpa [#allocation10 + $0x1], 0 }
  0x1e   :  { %38 = vsyncpa [#allocation13], 0 }
  0x1f   :  { %40 = vsyncpa [#allocation13 + $0x1], 0 }
  0x20   :  { %41 = vsyncpa [#allocation16], 0 }
  0x21   :  { %43 = vsyncpa [#allocation16 + $0x1], 0 }
  0x22   :  { %44 = vsyncpa [#allocation19], 0 }
  0x23   :  { %46 = vsyncpa [#allocation19 + $0x1], 0 }
  0x24   :  { %47 = vsyncpa [#allocation22], 0 }
  0x25   :  { %48 = vsyncpa [#allocation25], 0  ;;  %s7097_s4 = smov 0   ;;  %s7099_s30 = smov 0  }
  0x26   :  { %s7101_s24 = smov 0   ;;  %s7103_s25 = smov 0  }
  0x27   :  { %s7105_s5 = smov 0   ;;  %s7107_s1 = smov 0  }
  0x28   :  { %s7109_s26 = smov 0   ;;  %s7111_s2 = smov 0  }
  0x29 LB: > { %8930 = sst [smem:[#allocation35_spill]] %s6933_s24  ;;  %s8874_s6 = sadd.s32 4294967295, %s6953_s2   ;;  %s6953_s2 = sphi %s7111_s2, %s54_s2   ;;  %s6949_s26 = sphi %s7109_s26, %s9051_s26   ;;  %s6945_s1 = sphi %s7107_s1, %s9055_s1   ;;  %s6941_s5 = sphi %s7105_s5, %s9049_s5   ;;  %s6937_s25 = sphi %s7103_s25, %s9054_s25   ;;  %s6933_s24 = sphi %s7101_s24, %s9048_s24   ;;  %s6929_s30 = sphi %s7099_s30, %s9053_s30   ;;  %s6925_s4 = sphi %s7097_s4, %s9052_s4  }
  0x2a   : > { %8931 = sst [smem:[#allocation36_spill]] %s6937_s25  ;;  %s63_s27 = sadd.s32 1, %s6945_s1 }
  0x2b   : > { %8932 = sst [smem:[#allocation37_spill]] %s6941_s5  ;;  %p64_p0 = scmp.ge.s32.totalorder %s63_s27, 6 }
  0x2c   : > { %8933 = sst [smem:[#allocation38_spill]] %s6949_s26  ;;  %s66_s7 = sadd.s32 1, %s6949_s26 }
  0x2d   : > { %8934 = sst [smem:[#allocation39_spill]] %s6953_s2  ;;  %s120_s28 = sadd.s32 1, %s6933_s24 }
  0x2e   : > { %p127_p1 = scmp.ne.s32.totalorder %s6933_s24, %s6929_s30  ;;  %s9057_s27 = smov (%p64_p0, %s63_s27), 0 }
  0x2f   : > { %8935 = sst [smem:[#allocation40_spill]] %s9057_s27  ;;  %s9059_s7 = smov (!%p64_p0, %s66_s7), %s6949_s26 }
  0x30   : > { %s117_s29 = ssub.s32 %s6945_s1, %s9057_s27  ;;  %p128_p2 = scmp.eq.s32.totalorder %s6953_s2, 0 }
  0x31   : > { %p68_p3 = scmp.ge.s32.totalorder %s9059_s7, 2  ;;  %p118_p4 = scmp.eq.s32.totalorder %s117_s29, 0 }
  0x32   : > { %p7147_p5 = por %p128_p2, %p127_p1  ;;  %p133_p6 = scmp.ne.s32.totalorder %s6929_s30, %s6925_s4 }
  0x33   : > { %s9061_s7 = smov (%p68_p3, %s9059_s7), 0  ;;  %p7159_p7 = scmp.eq.s32.totalorder %s8874_s6, 0 }
  0x34   : > { %8937 = sst [smem:[#allocation41_spill]] %s9061_s7  ;;  %p5346_p8 = scmp.ge.s32.totalorder %s6953_s2, 1 }
  0x35   : > { %s7155_s0 = scalar_select %p118_p4, %s6933_s24, %s120_s28  }
  0x36   : > { %s8939_s14 = scalar_select %p7159_p7, 1, 0 }
  0x37   : > { %8938 = sst [smem:[#allocation42_spill]] %s7155_s0  ;;  %p650_p9 = scmp.lt.s32.totalorder %s6953_s2, 13 }
  0x38   : > { %8940 = sst [smem:[#allocation43_spill]] %s8939_s14  ;;  %p7167_p10 = por %p7159_p7, %p133_p6 }
  0x39   : > { %s8942_s15 = sld [smem:[#allocation85_spill]]  ;;  %p7174_p11 = pnand %p5346_p8, %p650_p9 }
  0x3a   : > { %s6955_s6 = smov [#allocation20]   ;;  %p5975_p13 = scmp.lt.s32.totalorder %s6953_s2, 12 }
  0x3b   : > { %p5927_p12 = pneg %p7174_p11  ;;  %s670_s26 = sshll.u32 %s6955_s6, 4  ;;  %s671_s26 = int_to_ptr.vmem [resolvable:$true] %s670_s26 }
  0x3c   : > { %s7188_s27 = sand.u32 1, %s6933_s24   ;;  %p7192_p1 = pnand %p5975_p13, %p7147_p5 }
  0x3d   : > { %p7183_p0 = pnand %p5927_p12, %p7159_p7  ;;  %s8946_s17 = sld [smem:[#allocation87_spill]] }
  0x3e   : > { %s6956_s18 = smov [#allocation21]   ;;  %s7202_s23 = sand.u32 1, %s6953_s2  }
  0x3f   : > { %s668_s7 = sshll.u32 %s8942_s15, 4  ;;  %s685_s16 = sshll.u32 %s6956_s18, 4  ;;  %s669_s7 = int_to_ptr.hbm [resolvable:$true] %s668_s7  ;;  %s686_s16 = int_to_ptr.vmem [resolvable:$true] %s685_s16 }
  0x40   : > { %5930 = dma.hbm_to_vmem [thread:$0]  (!%p7183_p0), %s669_s7, 16, %s671_s26, [#allocation19]  }
  0x41   : > { %s5353_s3 = sshll.u32 %s7188_s27, 6  ;;  %s5775_s24 = sshll.u32 %s6945_s1, 6 }
  0x42   : > { %s8947_s20 = sld [smem:[#allocation74_spill]]  ;;  %s769_s18 = scalar_lea.vmem [#allocation6], %s5353_s3 }
  0x43   : > { %s683_s6 = sshll.u32 %s8946_s17, 4  ;;  %s777_s7 = sshll.u32 %s769_s18, 4  ;;  %s684_s6 = int_to_ptr.hbm [resolvable:$true] %s683_s6  ;;  %s778_s7 = int_to_ptr.vmem [resolvable:$true] %s777_s7 }
  0x44   : > { %5933 = dma.hbm_to_vmem [thread:$0]  (!%p7183_p0), %s684_s6, 16, %s686_s16, [#allocation22]  }
  0x45   : > { %s766_s25 = scalar_lea.sflag [#allocation7], %s7202_s23  ;;  %s8886_s5 = smov 64  }
  0x46   : > { %s8887_s14 = smov 4   ;;  %s8948_s22 = sld [smem:[#allocation77_spill]] }
  0x47   : > { %s813_s6 = scalar_lea.vmem [#allocation9], %s7188_s27  ;;  %s8949_s9 = sld [smem:[#allocation79_spill]] }
  0x48   : > { %s774_s17 = scalar_lea.hbm %s8947_s20, %s5775_s24  ;;  %s820_s3 = sshll.u32 %s813_s6, 4  ;;  %s821_s3 = int_to_ptr.vmem [resolvable:$true] %s820_s3 }
  0x49   : > { %s775_s26 = sshll.u32 %s774_s17, 4  ;;  %s8888_s20 = scalar_lea.sflag [#allocation10], %s7202_s23  ;;  %s776_s26 = int_to_ptr.hbm [resolvable:$true] %s775_s26 }
  0x4a   : > { %5946 = dma.hbm_to_vmem [thread:$0]  (!%p7192_p1), %s776_s26, 1024, %s778_s7, %s766_s25, %s8886_s5, %s8886_s5, %s8887_s14  }
  0x4b   : > { %s847_s16 = scalar_lea.vmem [#allocation12], %s7188_s27  ;;  %s5360_s6 = sshll.u32 %s6945_s1, 1 }
  0x4c   : > { %s816_s24 = scalar_lea.hbm %s8948_s22, %s6945_s1  ;;  %s854_s17 = sshll.u32 %s847_s16, 4  ;;  %s855_s17 = int_to_ptr.vmem [resolvable:$true] %s854_s17 }
  0x4d   : > { %s818_s15 = sshll.u32 %s816_s24, 4  ;;  %s850_s26 = scalar_lea.hbm %s8949_s9, %s6945_s1  ;;  %s819_s15 = int_to_ptr.hbm [resolvable:$true] %s818_s15 }
  0x4e   : > { %5952 = dma.hbm_to_vmem [thread:$0]  (!%p7192_p1), %s819_s15, 16, %s821_s3, %s8888_s20  }
  0x4f   : > { %s852_s7 = sshll.u32 %s850_s26, 4  ;;  %s8890_s22 = scalar_lea.sflag [#allocation13], %s7202_s23  ;;  %s853_s7 = int_to_ptr.hbm [resolvable:$true] %s852_s7 }
  0x50   : > { %5958 = dma.hbm_to_vmem [thread:$0]  (!%p7192_p1), %s853_s7, 16, %s855_s17, %s8890_s22  }
  0x51   : > { %s5359_s24 = sshll.u32 %s7188_s27, 1  ;;  %s8950_s11 = sld [smem:[#allocation81_spill]] }
  0x52   : > { %s887_s15 = scalar_lea.vmem [#allocation15], %s5359_s24  ;;  %s8951_s19 = sld [smem:[#allocation89_spill]] }
  0x53   : > { %s895_s18 = sshll.u32 %s887_s15, 4  ;;  %s8889_s7 = scalar_lea.sflag [#allocation16], %s7202_s23  ;;  %s896_s18 = int_to_ptr.vmem [resolvable:$true] %s895_s18 }
  0x54   : > { %s6959_s5 = smov [#allocation23]   ;;  %s713_s3 = sshll.u32 %s8869_s21, 4  ;;  %s714_s3 = int_to_ptr.hbm [resolvable:$true] %s713_s3 }
  0x55   : > { %s700_s17 = sshll.u32 %s6959_s5, 4  ;;  %s6960_s14 = smov [#allocation24]   ;;  %s701_s17 = int_to_ptr.vmem [resolvable:$true] %s700_s17 }
  0x56   : > { %s5887_s15 = smul.u32 192, %s7188_s27  ;;  %s8952_s5 = sld [smem:[#allocation72_spill]] }
  0x57   : > { %s891_s2 = scalar_lea.hbm %s8950_s11, %s5360_s6  ;;  %s6962_s22 = smov 12  }
  0x58   : > { %s893_s26 = sshll.u32 %s891_s2, 4  ;;  %s698_s20 = sshll.u32 %s8951_s19, 4  ;;  %s894_s26 = int_to_ptr.hbm [resolvable:$true] %s893_s26  ;;  %s699_s20 = int_to_ptr.hbm [resolvable:$true] %s698_s20 }
  0x59   : > { %5964 = dma.hbm_to_vmem [thread:$0]  (!%p7192_p1), %s894_s26, 32, %s896_s18, %s8889_s7  }
  0x5a   : > { %5936 = dma.hbm_to_vmem [thread:$0]  (!%p7183_p0), %s699_s20, 16, %s701_s17, [#allocation22]  }
  0x5b   : > { %s715_s2 = sshll.u32 %s6960_s14, 4  ;;  %s5888_s18 = smul.u32 192, %s6945_s1  ;;  %s716_s2 = int_to_ptr.vmem [resolvable:$true] %s715_s2 }
  0x5c   : > { %5939 = dma.hbm_to_vmem [thread:$0]  (!%p7183_p0), %s714_s3, 16, %s716_s2, [#allocation25]  }
  0x5d   : > { %s745_s6 = scalar_lea.hbm %s8952_s5, %s5888_s18  ;;  %s740_s7 = scalar_lea.vmem [#allocation4], %s5887_s15 }
  0x5e   : > { %s746_s24 = sshll.u32 %s745_s6, 4  ;;  %s748_s20 = sshll.u32 %s740_s7, 4  ;;  %s747_s24 = int_to_ptr.hbm [resolvable:$true] %s746_s24  ;;  %s749_s20 = int_to_ptr.vmem [resolvable:$true] %s748_s20 }
  0x5f   : > { %s737_s17 = scalar_lea.sflag [#allocation5], %s7188_s27  ;;  %s6961_s14 = smov 192  }
  0x60   : > { %5943 = dma.hbm_to_vmem [thread:$0]  (!%p7192_p1), %s747_s24, 3072, %s749_s20, %s737_s17, %s6961_s14, %s6961_s14, %s6962_s22  }
  0x61   : > { %s8953_s2 = sld [smem:[#allocation75_spill]]  ;;  %s790_s16 = scalar_lea.vmem [#allocation8], %s7188_s27 }
  0x62   : > { %s797_s15 = sshll.u32 %s790_s16, 4  ;;  %s8954_s8 = sld [smem:[#allocation78_spill]]  ;;  %s798_s15 = int_to_ptr.vmem [resolvable:$true] %s797_s15 }
  0x63   : > { %s830_s22 = scalar_lea.vmem [#allocation11], %s7188_s27  ;;  %s8955_s20 = scalar_lea.sflag [#allocation10], %s7202_s23 }
  0x64   : > { %s837_s24 = sshll.u32 %s830_s22, 4  ;;  %s5356_s17 = sshll.u32 %s7188_s27, 7  ;;  %s838_s24 = int_to_ptr.vmem [resolvable:$true] %s837_s24 }
  0x65   : > { %s5776_s14 = sshll.u32 %s6945_s1, 7  ;;  %s8956_s10 = sld [smem:[#allocation80_spill]] }
  0x66   : > { %s6963_s16 = smov 128   ;;  %s8958_s12 = sld [smem:[#allocation82_spill]] }
  0x67   : > { %s793_s18 = scalar_lea.hbm %s8953_s2, %s6945_s1  ;;  %s8959_s0 = smov 4  }
  0x68   : > { %s795_s26 = sshll.u32 %s793_s18, 4  ;;  %s833_s6 = scalar_lea.hbm %s8954_s8, %s6945_s1  ;;  %s796_s26 = int_to_ptr.hbm [resolvable:$true] %s795_s26 }
  0x69   : > { %5949 = dma.hbm_to_vmem [thread:$0]  (!%p7192_p1), %s796_s26, 16, %s798_s15, %s766_s25  }
  0x6a   : > { %s835_s9 = sshll.u32 %s833_s6, 4  ;;  %s865_s18 = scalar_lea.vmem [#allocation14], %s5356_s17  ;;  %s836_s9 = int_to_ptr.hbm [resolvable:$true] %s835_s9 }
  0x6b   : > { %5955 = dma.hbm_to_vmem [thread:$0]  (!%p7192_p1), %s836_s9, 16, %s838_s24, %s8955_s20  }
  0x6c   : > { %s870_s25 = scalar_lea.hbm %s8956_s10, %s5776_s14  ;;  %s873_s26 = sshll.u32 %s865_s18, 4  ;;  %s874_s26 = int_to_ptr.vmem [resolvable:$true] %s873_s26 }
  0x6d   : > { %s871_s2 = sshll.u32 %s870_s25, 4  ;;  %s6964_s15 = smov 8   ;;  %s872_s2 = int_to_ptr.hbm [resolvable:$true] %s871_s2 }
  0x6e   : > { %s8957_s9 = scalar_lea.sflag [#allocation13], %s7202_s23  ;;  %s911_s6 = scalar_lea.hbm %s8958_s12, %s5776_s14 }
  0x6f   : > { %5961 = dma.hbm_to_vmem [thread:$0]  (!%p7192_p1), %s872_s2, 2048, %s874_s26, %s8957_s9, %s6963_s16, %s6963_s16, %s6964_s15  }
  0x70   : > { %s912_s22 = sshll.u32 %s911_s6, 4  ;;  %s906_s24 = scalar_lea.vmem [#allocation17], %s5356_s17  ;;  %s913_s22 = int_to_ptr.hbm [resolvable:$true] %s912_s22 }
  0x71   : > { %s914_s20 = sshll.u32 %s906_s24, 4  ;;  %s8960_s3 = smov 64   ;;  %s915_s20 = int_to_ptr.vmem [resolvable:$true] %s914_s20 }
  0x72   : > { %s8961_s25 = scalar_lea.sflag [#allocation16], %s7202_s23  ;;  %s8962_s13 = sld [smem:[#allocation83_spill]] }
  0x73   : > { %5967 = dma.hbm_to_vmem [thread:$0]  (!%p7192_p1), %s913_s22, 2048, %s915_s20, %s8961_s25, %s8960_s3, %s8960_s3, %s8959_s0  }
  0x74   : > { %s927_s2 = scalar_lea.vmem [#allocation18], %s7188_s27  ;;  %s925_s14 = scalar_lea.sflag [#allocation19], %s7202_s23 }
  0x75   : > { %s934_s26 = sshll.u32 %s927_s2, 4  ;;  %s935_s26 = int_to_ptr.vmem [resolvable:$true] %s934_s26 }
  0x76   : > { %943 = sbr.rel (%p7174_p11) target bundleno = 3552 (0xde0), region = 108 }
  0x78   : > { %s930_s10 = scalar_lea.hbm %s8962_s13, %s6945_s1 }
  0x79   : > { %s932_s16 = sshll.u32 %s930_s10, 4  ;;  %s933_s16 = int_to_ptr.hbm [resolvable:$true] %s932_s16 }
  0x7a   : > { %5970 = dma.hbm_to_vmem [thread:$0]  (!%p7192_p1), %s933_s16, 16, %s935_s26, %s925_s14  }
  0x7b   : > { %s7315_s17 = sand.u32 1, %s6929_s30  }
  0x7c   : > { %s5889_s15 = smul.u32 192, %s7315_s17  ;;  %s946_s8 = scalar_lea.sflag [#allocation5], %s7315_s17 }
  0x7e   : > { %s7319_s9 = scalar_lea.vmem [#allocation4], %s5889_s15 }
  0x7f   : > { %6888 = dma.done.wait (%p7167_p10), %s946_s8, 3072  }
  0x80   : > { %6890 = vsyncadd (%p7167_p10), %s946_s8, 4294964224  ;;  %s8963_s10 = sld [smem:[#allocation39_spill]]  ;;  %s5365_s27 = sshll.u32 %s7315_s17, 6 }
  0x81   : > { %s7328_s7 = scalar_lea.vmem [#allocation6], %s5365_s27 }
  0x86   : > { %s8964_s23 = sadd.s32 4294967295, %s8963_s10  }
  0x87   : > { %s955_s28 = sand.u32 1, %s8964_s23  }
  0x88   : > { %s956_s4 = scalar_lea.sflag [#allocation7], %s955_s28 }
  0x89   : > { %6892 = dma.done.wait (%p7167_p10), %s956_s4, 1040  }
  0x8a   : > { %6894 = vsyncadd (%p7167_p10), %s956_s4, 4294966256  ;;  %s975_s6 = scalar_lea.sflag [#allocation10], %s955_s28 }
  0x8b   : > { %6896 = dma.done.wait (%p7167_p10), %s975_s6, 32  }
  0x8c   : > { %6898 = vsyncadd (%p7167_p10), %s975_s6, 4294967264  ;;  %s993_s20 = scalar_lea.sflag [#allocation13], %s955_s28 }
  0x8d   : > { %6900 = dma.done.wait (%p7167_p10), %s993_s20, 2064  }
  0x8e   : > { %6902 = vsyncadd (%p7167_p10), %s993_s20, 4294965232  ;;  %s5366_s3 = sshll.u32 %s7315_s17, 7  ;;  %s5367_s25 = sshll.u32 %s7315_s17, 1 }
  0x8f   : > { %s7348_s18 = scalar_lea.vmem [#allocation14], %s5366_s3  ;;  %s1012_s2 = scalar_lea.sflag [#allocation16], %s955_s28 }
  0x90   : > { %s7350_s26 = scalar_lea.vmem [#allocation15], %s5367_s25 }
  0x91   : > { %6904 = dma.done.wait (%p7167_p10), %s1012_s2, 2080  }
  0x92   : > { %6906 = vsyncadd (%p7167_p10), %s1012_s2, 4294965216  ;;  %s7356_s16 = scalar_lea.vmem [#allocation17], %s5366_s3  ;;  %s1032_s14 = scalar_lea.sflag [#allocation19], %s955_s28 }
  0x93   : > { %6908 = dma.done.wait (%p7167_p10), %s1032_s14, 16  }
  0x94   : > { %6910 = vsyncadd (%p7167_p10), %s1032_s14, 4294967280 }
  0x95   : > { %6912 = dma.done.wait (%p7159_p7), [#allocation19], 16  }
  0x96   : > { %6914 = vsyncadd (%p7159_p7), [#allocation19], 4294967280 }
  0x97   : > { %6916 = dma.done.wait (%p7159_p7), [#allocation22], 32  }
  0x98   : > { %6918 = vsyncadd (%p7159_p7), [#allocation22], 4294967264 }
  0x99   : > { %6920 = dma.done.wait (%p7159_p7), [#allocation25], 16  }
  0x9a   : > { %6922 = vsyncadd (%p7159_p7), [#allocation25], 4294967280  ;;  %s8966_s29 = sld [smem:[#allocation37_spill]]  ;;  %v1203_v0 = vlaneseq  ;;  %v6965_v4 = vmov -1e+30  }
  0x9b   : > { %s8967_s10 = sld [smem:[#allocation36_spill]] }
  0x9c   : > { %v1204_v1 = vand.u32 127, %v1203_v0  ;;  %v1208_v2 = vshrl.u32 %v1203_v0, 7  ;;  %s8971_s5 = sld [smem:[#allocation73_spill]] }
  0x9d   : > { %s8973_s13 = sld [smem:[#allocation92_spill]] }
  0x9e   : > { %vm1205_vm0 = vcmp.lt.s32.totalorder %v1204_v1, 17  ;;  %v7386_v3 = vadd.s32 16, %v1208_v2 }
  0x9f   : > { %v7388_v5 = vsel %vm1205_vm0, 0.0, %v6965_v4 }
  0xa0   : > { %s5373_s23 = sshll.u32 %s8966_s29, 1  ;;  %s1190_s28 = smul.u32 6, %s8966_s29  ;;  %8969 = vst [vmem:[#allocation44_spill] sm:$0xff] %v7386_v3  ;;  %vm1213_vm1 = vcmp.eq.s32.totalorder %v7386_v3, 16 }
  0xa1   : > { %p1183_p2 = scmp.lt.s32.totalorder %s8967_s10, 5  ;;  %p1177_p3 = scmp.lt.s32.totalorder %s5373_s23, 3 }
  0xa2   : > { %p1191_p4 = scmp.lt.s32.totalorder %s1190_s28, 11  ;;  %s8970_s29 = sld [smem:[#allocation70_spill]] }
  0xa3   : > { %s7379_s27 = scalar_select %p1183_p2, %s8967_s10, 5 }
  0xa4   : > { %s9063_s23 = smov (!%p1177_p3, %s5373_s23), 3  ;;  %s9065_s28 = smov (!%p1191_p4, %s1190_s28), 11 }
  0xa5   : > { %s5890_s4 = smul.u32 3, %s7379_s27  ;;  %s5778_s2 = sshll.u32 %s9063_s23, 4 }
  0xa6   : > { %s5376_s6 = sshll.u32 %s9065_s28, 3  ;;  %s8972_s23 = sld [smem:[#allocation91_spill]] }
  0xa7   : > { %s7396_s22 = scalar_lea.vmem %s8971_s5, %s5890_s4  ;;  %s7407_s19 = scalar_lea.vmem %s8973_s13, %s5376_s6 }
  0xa8   : > { %s1181_s15 = scalar_lea.vmem %s8970_s29, %s5778_s2  ;;  %p5378_p5 = scmp.ne.s32.totalorder %s8967_s10, 0 }
  0xa9   : > { %s8974_s0 = sld [smem:[#allocation71_spill]] (!%p5378_p5) }
  0xaa   : > { %1220 = sbr.rel (%p5378_p5) target bundleno = 206 (0xce), region = 168 }
  0xac   : > { %s7402_s25 = scalar_lea.vmem %s8972_s23, %s5376_s6 }
  0xaf   : > { %v1221_v6 = vld [vmem:[%s8974_s0] sm:$0xff]  ;;  %v1222_v8 = vld [vmem:[%s8974_s0 + $0x8] sm:$0xff]  ;;  %vm1238_vm2 = vcmask 261120   ;;  %v1226_v11 = vld [vmem:[%s1181_s15 + $0x10] sm:$0xff]  ;;  %v6966_v13 = vmov 1.0  }
  0xb0   : > { %v1224_v7 = vld [vmem:[%s1181_s15] sm:$0xff]  ;;  %v1225_v10 = vld [vmem:[%s1181_s15 + $0x8] sm:$0xff]  ;;  %v1227_v12 = vld [vmem:[%s1181_s15 + $0x18] sm:$0xff]  ;;  %1239 = vst.msk [vmem:[#allocation3] sm:$0xff] %vm1238_vm2, %v6966_v13  ;;  %v1230_v15 = vadd.f32 %v1226_v11, %v1221_v6 }
  0xb1   : > { %v1228_v9 = vadd.f32 %v1224_v7, %v1221_v6  ;;  %v1229_v14 = vadd.f32 %v1225_v10, %v1222_v8  ;;  %v1231_v16 = vadd.f32 %v1227_v12, %v1222_v8  ;;  %1240 = vst.msk [vmem:[#allocation3 + $0x8] sm:$0xff] %vm1238_vm2, %v6966_v13  ;;  %v1223_v17 = vld [vmem:[%s8974_s0 + $0x10] sm:$0xff] }
  0xb2   : > { %1234 = vst [vmem:[#allocation2 + $0x8] sm:$0xff] %v1230_v15 }
  0xb3   : > { %1232 = vst [vmem:[#allocation2 + $0x28] sm:$0xff] %v1228_v9 }
  0xb4   : > { %1233 = vst [vmem:[#allocation2 + $0x18] sm:$0xff] %v1229_v14 }
  0xb5   : > { %1235 = vst [vmem:[#allocation2] sm:$0xff] %v1231_v16 }
  0xb6   : > { %1236 = vst [vmem:[#allocation2 + $0x20] sm:$0xff] %v1223_v17 }
  0xb7   : > { %1237 = vst [vmem:[#allocation2 + $0x10] sm:$0xff] %v1223_v17 }
  0xb8   : > { %1241 = vst.msk [vmem:[#allocation3 + $0x10] sm:$0xff] %vm1238_vm2, %v6966_v13 }
  0xb9   : > { %1242 = vst.msk [vmem:[#allocation3 + $0x18] sm:$0xff] %vm1238_vm2, %v6966_v13 }
  0xba   : > { %1243 = vst.msk [vmem:[#allocation3 + $0x20] sm:$0xff] %vm1238_vm2, %v6966_v13 }
  0xbb   : > { %1244 = vst.msk [vmem:[#allocation3 + $0x28] sm:$0xff] %vm1238_vm2, %v6966_v13 }
  0xbc   : > { %1245 = vst.msk [vmem:[#allocation3 + $0x30] sm:$0xff] %vm1238_vm2, %v6966_v13 }
  0xbd   : > { %1246 = vst.msk [vmem:[#allocation3 + $0x38] sm:$0xff] %vm1238_vm2, %v6966_v13 }
  0xbe   : > { %1247 = vst.msk [vmem:[#allocation3 + $0x40] sm:$0xff] %vm1238_vm2, %v6966_v13 }
  0xbf   : > { %1248 = vst.msk [vmem:[#allocation3 + $0x48] sm:$0xff] %vm1238_vm2, %v6966_v13 }
  0xc0   : > { %1249 = vst.msk [vmem:[#allocation3 + $0x50] sm:$0xff] %vm1238_vm2, %v6966_v13 }
  0xc1   : > { %1250 = vst.msk [vmem:[#allocation3 + $0x58] sm:$0xff] %vm1238_vm2, %v6966_v13 }
  0xc2   : > { %1251 = vst.msk [vmem:[#allocation3 + $0x60] sm:$0xff] %vm1238_vm2, %v6966_v13 }
  0xc3   : > { %1252 = vst.msk [vmem:[#allocation3 + $0x68] sm:$0xff] %vm1238_vm2, %v6966_v13 }
  0xc4   : > { %1253 = vst.msk [vmem:[#allocation3 + $0x70] sm:$0xff] %vm1238_vm2, %v6966_v13 }
  0xc5   : > { %1254 = vst.msk [vmem:[#allocation3 + $0x78] sm:$0xff] %vm1238_vm2, %v6966_v13 }
  0xc6   : > { %1255 = vst.msk [vmem:[#allocation3 + $0x80] sm:$0xff] %vm1238_vm2, %v6966_v13 }
  0xc7   : > { %1256 = vst.msk [vmem:[#allocation3 + $0x88] sm:$0xff] %vm1238_vm2, %v6966_v13 }
  0xc8   : > { %1257 = vst.msk [vmem:[#allocation3 + $0x90] sm:$0xff] %vm1238_vm2, %v6966_v13 }
  0xc9   : > { %1258 = vst.msk [vmem:[#allocation3 + $0x98] sm:$0xff] %vm1238_vm2, %v6966_v13 }
  0xca   : > { %1259 = vst.msk [vmem:[#allocation3 + $0xa0] sm:$0xff] %vm1238_vm2, %v6966_v13 }
  0xcb   : > { %1260 = vst.msk [vmem:[#allocation3 + $0xa8] sm:$0xff] %vm1238_vm2, %v6966_v13 }
  0xcc   : > { %1261 = vst.msk [vmem:[#allocation3 + $0xb0] sm:$0xff] %vm1238_vm2, %v6966_v13 }
  0xcd   : > { %1262 = vst.msk [vmem:[#allocation3 + $0xb8] sm:$0xff] %vm1238_vm2, %v6966_v13 }
  0xce PF: > { %v7443_v18 = vld [vmem:[#allocation2] sm:$0xff]  ;;  %v7447_v20 = vld [vmem:[#allocation2 + $0x28] sm:$0xff]  ;;  %v7452_v21 = vld [vmem:[#allocation2 + $0x10] sm:$0xff]  ;;  %v6967_v24 = vmov 128.0   ;;  %s8982_s15 = sld [smem:[#allocation76_spill]]  ;;  %s8984_s2 = scalar_lea.vmem [#allocation9], %s7315_s17 }
  0xcf   : > { %8975 = vst [vmem:[#allocation45_spill] sm:$0xff] %v7443_v18  ;;  %v7445_v19 = vld [vmem:[#allocation2 + $0x20] sm:$0xff]  ;;  %1279 = vadd.xlane.f32.xlu2 %v7443_v18  ;;  %1271 = vadd.xlane.f32.xlu0 %v7447_v20  ;;  %v7454_v22 = vld [vmem:[#allocation2 + $0x8] sm:$0xff]  ;;  %v7456_v23 = vld [vmem:[#allocation2 + $0x18] sm:$0xff]  ;;  %6158 = vrcp.f32 %v6967_v24  ;;  %s6970_s14 = smov 32   ;;  %s9003_s8 = sld [smem:[#allocation36_spill]] }
  0xd0   : > { %8976 = vst [vmem:[#allocation46_spill] sm:$0xff] %v7445_v19  ;;  %1275 = vadd.xlane.f32.xlu1 %v7445_v19  ;;  %v5465_v55 = vld [vmem:[%s7319_s9 + $0xa8] sm:$0xf]  ;;  %v5801_v56 = vld [vmem:[%s7319_s9 + $0xb0] sm:$0xf0] }
  0xd1   : > { %8977 = vst [vmem:[#allocation47_spill] sm:$0xff] %v7447_v20  ;;  %v5800_v57 = vld [vmem:[%s7319_s9 + $0xac] sm:$0xf]  ;;  %v5466_v58 = vor.u32 %v5801_v56, %v5465_v55  ;;  %v5467_v59 = vld [vmem:[%s7319_s9 + $0xb4] sm:$0xf0] }
  0xd2   : > { %8978 = vst [vmem:[#allocation48_spill] sm:$0xff] %v7452_v21  ;;  %v5473_v60 = vld [vmem:[%s7319_s9 + $0xb0] sm:$0xf]  ;;  %v5802_v61 = vld [vmem:[%s7319_s9 + $0xb8] sm:$0xf0]  ;;  %v5470_v62 = vor.u32 %v5800_v57, %v5467_v59 }
  0xd3   : > { %8979 = vst [vmem:[#allocation49_spill] sm:$0xff] %v7454_v22  ;;  %v5474_v63 = vor.u32 %v5802_v61, %v5473_v60  ;;  %1587 = vmatpush.bf16.msra.mxu0 %v5466_v58  ;;  %v5453_v0 = vld [vmem:[%s7319_s9 + $0x90] sm:$0xf]  ;;  %v5798_v1 = vld [vmem:[%s7319_s9 + $0x98] sm:$0xf0] }
  0xd4   : > { %8980 = vst [vmem:[#allocation50_spill] sm:$0xff] %v7456_v23  ;;  %1611 = vmatpush.bf16.msra.mxu1 %v5470_v62  ;;  %v5797_v2 = vld [vmem:[%s7319_s9 + $0x94] sm:$0xf]  ;;  %v5454_v4 = vor.u32 %v5798_v1, %v5453_v0  ;;  %v5455_v6 = vld [vmem:[%s7319_s9 + $0x9c] sm:$0xf0]  ;;  %s8983_s10 = scalar_lea.vmem %s8982_s15, %s7379_s27  ;;  %s6968_s27 = smov 96  }
  0xd5   : > { %v6159_v25 = vpop.eup %6158  ;;  %1635 = vmatpush.bf16.msra.mxu2 %v5474_v63  ;;  %v5461_v7 = vld [vmem:[%s7319_s9 + $0x98] sm:$0xf]  ;;  %v5799_v8 = vld [vmem:[%s7319_s9 + $0xa0] sm:$0xf0]  ;;  %v5458_v9 = vor.u32 %v5797_v2, %v5455_v6  ;;  %v5794_v13 = vld [vmem:[%s7319_s9 + $0x7c] sm:$0xf] }
  0xd6   : > { %v1284_v26 = vmul.f32 128.0, %v6159_v25  ;;  %vm1288_vm3 = vweird.f32 %v6159_v25  ;;  %v5462_v10 = vor.u32 %v5799_v8, %v5461_v7  ;;  %v5441_v11 = vld [vmem:[%s7319_s9 + $0x78] sm:$0xf]  ;;  %v5795_v12 = vld [vmem:[%s7319_s9 + $0x80] sm:$0xf0]  ;;  %p5507_p6 = scmp.ne.s32.totalorder %s9003_s8, 5 }
  0xd7   : > { %1281 = vadd.xlane.f32.xlu2 %v7452_v21  ;;  %1273 = vadd.xlane.f32.xlu0 %v7456_v23  ;;  %v5442_v14 = vor.u32 %v5795_v12, %v5441_v11  ;;  %v5443_v15 = vld [vmem:[%s7319_s9 + $0x84] sm:$0xf0]  ;;  %v5449_v16 = vld [vmem:[%s7319_s9 + $0x80] sm:$0xf]  ;;  %v5796_v17 = vld [vmem:[%s7319_s9 + $0x88] sm:$0xf0] }
  0xd8   : > { %1277 = vadd.xlane.f32.xlu1 %v7454_v22  ;;  %v1285_v27 = vsub.f32 1.0, %v1284_v26  ;;  %1588 = vmatpush.bf16.msra.mxu0 %v5454_v4  ;;  %v5446_v24 = vor.u32 %v5794_v13, %v5443_v15  ;;  %v5429_v26 = vld [vmem:[%s7319_s9 + $0x60] sm:$0xf]  ;;  %v5413_v56 = vld [vmem:[%s7319_s9 + $0x38] sm:$0xf]  ;;  %s9004_s20 = sld [smem:[#allocation86_spill]] (!%p5507_p6) }
  0xd9   : > { %1612 = vmatpush.bf16.msra.mxu1 %v5458_v9  ;;  %1636 = vmatpush.bf16.msra.mxu2 %v5462_v10  ;;  %v5407_v55 = vld [vmem:[%s7319_s9 + $0x3c] sm:$0xf0]  ;;  %v5787_v57 = vld [vmem:[%s7319_s9 + $0x40] sm:$0xf0]  ;;  %v5393_v60 = vld [vmem:[%s7319_s9 + $0x18] sm:$0xf] }
  0xda   : > { %v1286_v28 = vmul.f32 %v6159_v25, %v1285_v27  ;;  %v5792_v27 = vld [vmem:[%s7319_s9 + $0x68] sm:$0xf0]  ;;  %v5414_v59 = vor.u32 %v5787_v57, %v5413_v56  ;;  %v5783_v61 = vld [vmem:[%s7319_s9 + $0x20] sm:$0xf0]  ;;  %v5782_v62 = vld [vmem:[%s7319_s9 + $0x1c] sm:$0xf] }
  0xdb   : > { %v5394_v63 = vor.u32 %v5783_v61, %v5393_v60  ;;  %v5395_v0 = vld [vmem:[%s7319_s9 + $0x24] sm:$0xf0]  ;;  %v5401_v1 = vld [vmem:[%s7319_s9 + $0x20] sm:$0xf]  ;;  %v5784_v2 = vld [vmem:[%s7319_s9 + $0x28] sm:$0xf0] }
  0xdc   : > { %v1287_v29 = vadd.f32 %v6159_v25, %v1286_v28  ;;  %1589 = vmatpush.bf16.msra.mxu0 %v5442_v14  ;;  %v5791_v28 = vld [vmem:[%s7319_s9 + $0x64] sm:$0xf]  ;;  %v5398_v7 = vor.u32 %v5782_v62, %v5395_v0  ;;  %v5402_v8 = vor.u32 %v5784_v2, %v5401_v1  ;;  %v5381_v10 = vld [vmem:[%s7319_s9] sm:$0xf]  ;;  %v5780_v11 = vld [vmem:[%s7319_s9 + $0x8] sm:$0xf0] }
  0xdd   : > { %1613 = vmatpush.bf16.msra.mxu1 %v5446_v24  ;;  %v5382_v14 = vor.u32 %v5780_v11, %v5381_v10  ;;  %v5779_v15 = vld [vmem:[%s7319_s9 + $0x4] sm:$0xf]  ;;  %v5389_v24 = vld [vmem:[%s7319_s9 + $0x8] sm:$0xf]  ;;  %s9005_s15 = sld [smem:[#allocation88_spill]] (!%p5507_p6)  ;;  %s6974_s5 = smov (!%p5507_p6), 126  }
  0xde   : > { %v7461_v30 = vsel %vm1288_vm3, %v6159_v25, %v1287_v29  ;;  %v5450_v25 = vor.u32 %v5796_v17, %v5449_v16  ;;  %v5430_v29 = vor.u32 %v5792_v27, %v5429_v26  ;;  %v5383_v16 = vld [vmem:[%s7319_s9 + $0xc] sm:$0xf0]  ;;  %s9006_s24 = sld [smem:[#allocation90_spill]] (!%p5507_p6)  ;;  %s6975_s4 = smov (!%p5507_p6), 127  }
  0xdf   : > { %8981 = vst [vmem:[#allocation51_spill] sm:$0xff] %v7461_v30  ;;  %v5386_v17 = vor.u32 %v5779_v15, %v5383_v16  ;;  %s6976_s11 = smov (!%p5507_p6), 125  }
  0xe0   : > { %1637 = vmatpush.bf16.msra.mxu2 %v5450_v25  ;;  %1590 = vmatpush.bf16.msra.mxu0 %v5430_v29  ;;  %v5781_v25 = vld [vmem:[%s7319_s9 + $0x10] sm:$0xf0] }
  0xe1   : > { %v5390_v26 = vor.u32 %v5781_v25, %v5389_v24 }
  0xe4   : > { %s9007_s28 = smov (!%p5507_p6), %s9006_s24 }
 0x142   : > { %v1280_v31 = vpop.xlane.xlu2 %1279  ;;  %v1272_v34 = vpop.xlane.xlu0 %1271 }
 0x143   : > { %v1276_v32 = vpop.xlane.xlu1 %1275  ;;  %v1290_v35 = vmul.f32 %v7461_v30, %v1272_v34  ;;  %v1294_v48 = vmul.f32 %v7461_v30, %v1280_v31  ;;  %v5431_v31 = vld [vmem:[%s7319_s9 + $0x6c] sm:$0xf0] }
 0x144   : > { %v1292_v33 = vmul.f32 %v7461_v30, %v1276_v32  ;;  %v5437_v32 = vld [vmem:[%s7319_s9 + $0x68] sm:$0xf]  ;;  %v5434_v34 = vor.u32 %v5791_v28, %v5431_v31 }
 0x145   : > { %v7469_v37 = vsub.f32 %v7447_v20, %v1290_v35  ;;  %v7495_v53 = vsub.f32 %v7443_v18, %v1294_v48 }
 0x146   : > { %v7466_v36 = vsub.f32 %v7445_v19, %v1292_v33  ;;  %v5793_v33 = vld [vmem:[%s7319_s9 + $0x70] sm:$0xf0]  ;;  %1614 = vmatpush.bf16.msra.mxu1 %v5434_v34 }
 0x147   : > { %v1302_v39 = vmul.f32 %v7469_v37, %v7469_v37  ;;  %v1306_v54 = vmul.f32 %v7495_v53, %v7495_v53  ;;  %v5438_v35 = vor.u32 %v5793_v33, %v5437_v32 }
 0x148   : > { %v1304_v38 = vmul.f32 %v7466_v36, %v7466_v36 }
 0x149   : > { %1308 = vadd.xlane.f32.xlu0 %v1302_v39  ;;  %1638 = vmatpush.bf16.msra.mxu2 %v5438_v35  ;;  %v5789_v39 = vld [vmem:[%s7319_s9 + $0x50] sm:$0xf0] }
 0x14a   : > { %1312 = vadd.xlane.f32.xlu2 %v1304_v38  ;;  %v1282_v40 = vpop.xlane.xlu2 %1281  ;;  %v1274_v44 = vpop.xlane.xlu0 %1273  ;;  %v5417_v38 = vld [vmem:[%s7319_s9 + $0x48] sm:$0xf] }
 0x14b   : > { %v1278_v41 = vpop.xlane.xlu1 %1277  ;;  %v1295_v42 = vmul.f32 %v7461_v30, %v1282_v40  ;;  %v1291_v45 = vmul.f32 %v7461_v30, %v1274_v44  ;;  %v5788_v40 = vld [vmem:[%s7319_s9 + $0x4c] sm:$0xf]  ;;  %v5790_v44 = vld [vmem:[%s7319_s9 + $0x58] sm:$0xf0] }
 0x14c   : > { %v1293_v43 = vmul.f32 %v7461_v30, %v1278_v41  ;;  %v5418_v41 = vor.u32 %v5789_v39, %v5417_v38 }
 0x14d   : > { %v7479_v46 = vsub.f32 %v7452_v21, %v1295_v42  ;;  %v7486_v49 = vsub.f32 %v7456_v23, %v1291_v45  ;;  %v5419_v42 = vld [vmem:[%s7319_s9 + $0x54] sm:$0xf0] }
 0x14e   : > { %v7482_v47 = vsub.f32 %v7454_v22, %v1293_v43  ;;  %v5425_v43 = vld [vmem:[%s7319_s9 + $0x50] sm:$0xf]  ;;  %v5422_v45 = vor.u32 %v5788_v40, %v5419_v42  ;;  %1591 = vmatpush.bf16.msra.mxu0 %v5418_v41 }
 0x14f   : > { %v1307_v50 = vmul.f32 %v7479_v46, %v7479_v46  ;;  %v1303_v52 = vmul.f32 %v7486_v49, %v7486_v49  ;;  %v5426_v48 = vor.u32 %v5790_v44, %v5425_v43 }
 0x150   : > { %v1305_v51 = vmul.f32 %v7482_v47, %v7482_v47  ;;  %1615 = vmatpush.bf16.msra.mxu1 %v5422_v45 }
 0x151   : > { %1310 = vadd.xlane.f32.xlu1 %v1303_v52  ;;  %1639 = vmatpush.bf16.msra.mxu2 %v5426_v48  ;;  %v5785_v52 = vld [vmem:[%s7319_s9 + $0x34] sm:$0xf] }
 0x152   : > { %1318 = vadd.xlane.f32.xlu2 %v1307_v50  ;;  %1314 = vadd.xlane.f32.xlu0 %v1305_v51  ;;  %v5405_v50 = vld [vmem:[%s7319_s9 + $0x30] sm:$0xf]  ;;  %v5786_v51 = vld [vmem:[%s7319_s9 + $0x38] sm:$0xf0]  ;;  %v5410_v58 = vor.u32 %v5785_v52, %v5407_v55 }
 0x154   : > { %1616 = vmatpush.bf16.msra.mxu1 %v5410_v58 }
 0x155   : > { %1640 = vmatpush.bf16.msra.mxu2 %v5414_v59 }
 0x158   : > { %1617 = vmatpush.bf16.msra.mxu1 %v5398_v7 }
 0x159   : > { %1316 = vadd.xlane.f32.xlu1 %v1306_v54  ;;  %v5406_v54 = vor.u32 %v5786_v51, %v5405_v50  ;;  %1641 = vmatpush.bf16.msra.mxu2 %v5402_v8 }
 0x15b   : > { %1592 = vmatpush.bf16.msra.mxu0 %v5406_v54 }
 0x15c   : > { %1618 = vmatpush.bf16.msra.mxu1 %v5386_v17 }
 0x15d   : > { %1642 = vmatpush.bf16.msra.mxu2 %v5390_v26 }
 0x15f   : > { %1593 = vmatpush.bf16.msra.mxu0 %v5394_v63 }
 0x163   : > { %1594 = vmatpush.bf16.msra.mxu0 %v5382_v14 }
 0x1bc   : > { %v1309_v6 = vpop.xlane.xlu0 %1308 }
 0x1bd   : > { %v1313_v4 = vpop.xlane.xlu2 %1312  ;;  %v1320_v9 = vmul.f32 %v1309_v6, %v7461_v30 }
 0x1be   : > { %v1322_v12 = vmul.f32 %v1313_v4, %v7461_v30  ;;  %v6156_v4 = vld [vmem:[%s8983_s10] ss:$0 sm:$0xff] }
 0x1bf   : > { %v1326_v13 = vadd.f32 1e-06, %v1320_v9 }
 0x1c0   : > { %v7549_v27 = vadd.f32 1e-06, %v1322_v12 }
 0x1c1   : > { %6160 = vrsqrt.f32 %v1326_v13  ;;  %vm1338_vm5 = vweird.f32 %v1326_v13 }
 0x1c2   : > { %6162 = vrsqrt.f32 %v7549_v27  ;;  %vm1358_vm12 = vweird.f32 %v7549_v27 }
 0x1c4   : > { %v1311_v28 = vpop.xlane.xlu1 %1310 }
 0x1c5   : > { %v1315_v29 = vpop.xlane.xlu0 %1314  ;;  %v1321_v31 = vmul.f32 %v1311_v28, %v7461_v30  ;;  %v1319_v41 = vpop.xlane.xlu2 %1318 }
 0x1c6   : > { %v1323_v32 = vmul.f32 %v1315_v29, %v7461_v30  ;;  %v1325_v50 = vmul.f32 %v1319_v41, %v7461_v30 }
 0x1c7   : > { %v6161_v33 = vpop.eup %6160  ;;  %v1327_v34 = vadd.f32 1e-06, %v1321_v31 }
 0x1c8   : > { %v1329_v35 = vadd.f32 1e-06, %v1323_v32  ;;  %v1333_v38 = vmul.f32 %v6161_v33, %v1326_v13  ;;  %v7554_v43 = vpop.eup %6162  ;;  %vm1339_vm4 = vweird.f32 %v6161_v33  ;;  %v1331_v59 = vadd.f32 1e-06, %v1325_v50  ;;  %v6157_v13 = vld [vmem:[%s8984_s2] ss:$0 sm:$0xff] }
 0x1c9   : > { %6164 = vrsqrt.f32 %v1327_v34  ;;  %v1353_v52 = vmul.f32 %v7554_v43, %v7549_v27  ;;  %vm1340_vm6 = vmor %vm1338_vm5, %vm1339_vm4  ;;  %vm1348_vm8 = vweird.f32 %v1327_v34  ;;  %vm1359_vm13 = vweird.f32 %v7554_v43 }
 0x1ca   : > { %v1334_v39 = vmul.f32 %v6161_v33, %v1333_v38  ;;  %6166 = vrsqrt.f32 %v1329_v35  ;;  %vm1368_vm10 = vweird.f32 %v1329_v35  ;;  %vm1360_vm15 = vmor %vm1358_vm12, %vm1359_vm13  ;;  %vm1388_vm3 = vweird.f32 %v1331_v59 }
 0x1cb   : > { %v1354_v61 = vmul.f32 %v7554_v43, %v1353_v52 }
 0x1cc   : > { %v1335_v40 = vmul.f32 0.5, %v1334_v39  ;;  %v1317_v42 = vpop.xlane.xlu1 %1316 }
 0x1cd   : > { %v1324_v44 = vmul.f32 %v1317_v42, %v7461_v30  ;;  %v1355_v6 = vmul.f32 0.5, %v1354_v61  ;;  %v7584_v61 = vld [vmem:[%s7396_s22] sm:$0x7]  ;;  %s6969_s22 = smov 64  }
 0x1ce   : > { %v1336_v45 = vsub.f32 1.5, %v1335_v40 }
 0x1cf   : > { %v6165_v48 = vpop.eup %6164  ;;  %v7560_v57 = vadd.f32 1e-06, %v1324_v44  ;;  %v1356_v14 = vsub.f32 1.5, %v1355_v6 }
 0x1d0   : > { %v6167_v51 = vpop.eup %6166  ;;  %v1337_v54 = vmul.f32 %v6161_v33, %v1336_v45  ;;  %v1343_v55 = vmul.f32 %v6165_v48, %v1327_v34  ;;  %vm1349_vm7 = vweird.f32 %v6165_v48 }
 0x1d1   : > { %v1363_v56 = vmul.f32 %v6167_v51, %v1329_v35  ;;  %6168 = vrsqrt.f32 %v7560_v57  ;;  %vm1350_vm9 = vmor %vm1348_vm8, %vm1349_vm7  ;;  %vm1369_vm11 = vweird.f32 %v6167_v51  ;;  %vm1378_vm0 = vweird.f32 %v7560_v57 }
 0x1d2   : > { %v1344_v58 = vmul.f32 %v6165_v48, %v1343_v55  ;;  %v1341_v62 = vsel %vm1340_vm6, %v6161_v33, %v1337_v54  ;;  %6170 = vrsqrt.f32 %v1331_v59  ;;  %vm1370_vm14 = vmor %vm1368_vm10, %vm1369_vm11  ;;  %vm1903_vm7 = vcmask 261120  }
 0x1d3   : > { %v1364_v60 = vmul.f32 %v6167_v51, %v1363_v56  ;;  %v1392_v2 = vmul.f32 %v1341_v62, %v7469_v37  ;;  %v1454_v62 = vperm.slane %v7584_v61, 1  ;;  %vm2304_vm8 = vcmask 195584  }
 0x1d4   : > { %v1345_v63 = vmul.f32 0.5, %v1344_v58 }
 0x1d5   : > { %v1365_v1 = vmul.f32 0.5, %v1364_v60  ;;  %v1401_v12 = vmul.f32 %v6156_v4, %v1392_v2 }
 0x1d6   : > { %v1346_v0 = vsub.f32 1.5, %v1345_v63 }
 0x1d7   : > { %v1366_v9 = vsub.f32 1.5, %v1365_v1  ;;  %v6169_v10 = vpop.eup %6168  ;;  %v1410_v24 = vadd.f32 %v6157_v13, %v1401_v12 }
 0x1d8   : > { %v1347_v7 = vmul.f32 %v6165_v48, %v1346_v0  ;;  %v6171_v37 = vpop.eup %6170  ;;  %v1373_v17 = vmul.f32 %v6169_v10, %v7560_v57  ;;  %vm1379_vm2 = vweird.f32 %v6169_v10 }
 0x1d9   : > { %v1367_v16 = vmul.f32 %v6167_v51, %v1366_v9  ;;  %v1383_v26 = vmul.f32 %v6171_v37, %v1331_v59  ;;  %vm1389_vm4 = vweird.f32 %v6171_v37  ;;  %vm1380_vm5 = vmor %vm1378_vm0, %vm1379_vm2 }
 0x1da   : > { %v1351_v8 = vsel %vm1350_vm9, %v6165_v48, %v1347_v7  ;;  %v1374_v31 = vmul.f32 %v6169_v10, %v1373_v17  ;;  %vm1390_vm6 = vmor %vm1388_vm3, %vm1389_vm4  ;;  %vm2640_vm9 = vcmask 1043456  }
 0x1db   : > { %v1393_v11 = vmul.f32 %v1351_v8, %v7486_v49  ;;  %v1357_v49 = vmul.f32 %v7554_v43, %v1356_v14  ;;  %v1371_v29 = vsel %vm1370_vm14, %v6167_v51, %v1367_v16  ;;  %v1384_v27 = vmul.f32 %v6171_v37, %v1383_v26 }
 0x1dc   : > { %v1395_v33 = vmul.f32 %v1371_v29, %v7482_v47  ;;  %v1375_v34 = vmul.f32 0.5, %v1374_v31  ;;  %v1453_v14 = vperm.slane %v7584_v61, 0 }
 0x1dd   : > { %v1402_v15 = vmul.f32 %v6156_v4, %v1393_v11  ;;  %v1361_v32 = vsel %vm1360_vm15, %v7554_v43, %v1357_v49  ;;  %v1385_v38 = vmul.f32 0.5, %v1384_v27 }
 0x1de   : > { %v1394_v35 = vmul.f32 %v1361_v32, %v7466_v36  ;;  %v1404_v39 = vmul.f32 %v6156_v4, %v1395_v33  ;;  %v1376_v40 = vsub.f32 1.5, %v1375_v34 }
 0x1df   : > { %v1411_v25 = vadd.f32 %v6157_v13, %v1402_v15  ;;  %v1386_v42 = vsub.f32 1.5, %v1385_v38 }
 0x1e0   : > { %v1403_v41 = vmul.f32 %v6156_v4, %v1394_v35  ;;  %v1413_v44 = vadd.f32 %v6157_v13, %v1404_v39  ;;  %v1377_v45 = vmul.f32 %v6169_v10, %v1376_v40 }
 0x1e1   : > { %v1416_v28 = vpack.c.bf16 %v1411_v25, %v1410_v24  ;;  %v1387_v48 = vmul.f32 %v6171_v37, %v1386_v42 }
 0x1e2   : > { %v1412_v43 = vadd.f32 %v6157_v13, %v1403_v41  ;;  %v1381_v50 = vsel %vm1380_vm5, %v6169_v10, %v1377_v45 }
 0x1e3   : > { %1595 = vmatmul.bf16.vlgmr.msra.gmra.mxu0 %v1416_v28  ;;  %1619 = vmatmul.bf16.vlgmr.msra.gmra.mxu1 %v1416_v28  ;;  %v1391_v36 = vsel %vm1390_vm6, %v6171_v37, %v1387_v48  ;;  %v1396_v51 = vmul.f32 %v1381_v50, %v7495_v53 }
 0x1e4   : > { %1643 = vmatmul.bf16.vlgmr.msra.gmra.mxu2 %v1416_v28  ;;  %v1417_v47 = vpack.c.bf16 %v1413_v44, %v1412_v43  ;;  %v1397_v52 = vmul.f32 %v1391_v36, %v7479_v46 }
 0x1e5   : > { %v1405_v54 = vmul.f32 %v6156_v4, %v1396_v51 }
 0x1e6   : > { %v1406_v55 = vmul.f32 %v6156_v4, %v1397_v52 }
 0x1e7   : > { %v1414_v56 = vadd.f32 %v6157_v13, %v1405_v54 }
 0x1e8   : > { %v1415_v57 = vadd.f32 %v6157_v13, %v1406_v55 }
 0x1ea   : > { %v1418_v58 = vpack.c.bf16 %v1415_v57, %v1414_v56 }
 0x1f3   : > { %1600 = vmatmul.bf16.gmra.mxu0 %v1417_v47  ;;  %1624 = vmatmul.bf16.gmra.mxu1 %v1417_v47 }
 0x1f4   : > { %1648 = vmatmul.bf16.gmra.mxu2 %v1417_v47 }
 0x203   : > { %1605 = vmatmul.bf16.gmra.mxu0 %v1418_v58  ;;  %1629 = vmatmul.bf16.gmra.mxu1 %v1418_v58 }
 0x204   : > { %1653 = vmatmul.bf16.gmra.mxu2 %v1418_v58 }
 0x260   : > { %v1596_v59 = vpop.f32.mrf.mxu0  ;;  %v1620_v60 = vpop.f32.mrf.mxu1 }
 0x261   : > { %v7587_v1 = vadd.f32 %v1620_v60, %v1454_v62  ;;  %v1597_v24 = vadd.f32 %v1596_v59, %v1453_v14 }
 0x263   : > { %v1803_v11 = vpack.c.bf16 %v7587_v1, %v7587_v1  ;;  %v1719_v27 = vpack.c.bf16 %v1597_v24, %v1597_v24 }
 0x265   : > { %v1898_v17 = vunpack.c.l.b16 %v1803_v11  ;;  %v1890_v35 = vunpack.c.l.b16 %v1719_v27 }
 0x267   : > { %v1644_v54 = vpop.f32.mrf.mxu2 }
 0x268   : > { %v1598_v63 = vpop.f32.mrf.mxu0  ;;  %v1622_v0 = vpop.f32.mrf.mxu1 }
 0x269   : > { %v7589_v53 = vadd.f32 %v1622_v0, %v1454_v62  ;;  %v1599_v16 = vadd.f32 %v1598_v63, %v1453_v14 }
 0x26b   : > { %v7593_v46 = vpack.i.bf16 %v7589_v53, %v7587_v1  ;;  %v1804_v9 = vpack.c.bf16 %v7589_v53, %v7589_v53  ;;  %v1720_v49 = vpack.c.bf16 %v1599_v16, %v1599_v16  ;;  %v6081_v60 = vpack.i.bf16 %v1599_v16, %v1597_v24 }
 0x26d   : > { %6072 = vrot.lane.b32.xlu1 %v7593_v46, %s6968_s27  ;;  %v1899_v15 = vunpack.c.l.b16 %v1804_v9  ;;  %v1891_v34 = vunpack.c.l.b16 %v1720_v49 }
 0x26f   : > { %v1901_v25 = vpack.c.b16 %v1899_v15, %v1898_v17  ;;  %v1893_v39 = vpack.c.b16 %v1891_v34, %v1890_v35 }
 0x270   : > { %v1601_v2 = vpop.f32.mrf.mxu0  ;;  %v1625_v4 = vpop.f32.mrf.mxu1 }
 0x271   : > { %v7597_v6 = vadd.f32 %v1625_v4, %v1454_v62  ;;  %v1911_v32 = vsel %vm1903_vm7, %v1901_v25, 0  ;;  %v1602_v42 = vadd.f32 %v1601_v2, %v1453_v14  ;;  %v1646_v4 = vpop.f32.mrf.mxu2 }
 0x273   : > { %v1805_v7 = vpack.c.bf16 %v7597_v6, %v7597_v6  ;;  %v1721_v56 = vpack.c.bf16 %v1602_v42, %v1602_v42 }
 0x275   : > { %v1900_v8 = vunpack.c.l.b16 %v1805_v7 }
 0x277   : > { %v1902_v10 = vpack.c.b16 %v1900_v8, %v1900_v8 }
 0x278   : > { %v1603_v12 = vpop.f32.mrf.mxu0  ;;  %v1627_v13 = vpop.f32.mrf.mxu1 }
 0x279   : > { %v1914_v37 = vsel %vm1903_vm7, %v1902_v10, 0  ;;  %v7607_v29 = vadd.f32 %v1627_v13, %v1454_v62  ;;  %v1604_v44 = vadd.f32 %v1603_v12, %v1453_v14  ;;  %v1649_v10 = vpop.f32.mrf.mxu2  ;;  %v1455_v13 = vperm.slane %v7584_v61, 2 }
 0x27a   : > { %1922 = vmatpush.bf16.xpose.msra.mxu3 %v1914_v37 }
 0x27b   : > { %v1806_v57 = vpack.c.bf16 %v7607_v29, %v7607_v29  ;;  %v1722_v9 = vpack.c.bf16 %v1604_v44, %v1604_v44  ;;  %v7647_v37 = vadd.f32 %v1644_v54, %v1455_v13  ;;  %v7649_v15 = vadd.f32 %v1649_v10, %v1455_v13 }
 0x27c   : > { %v7665_v49 = vadd.f32 %v1646_v4, %v1455_v13 }
 0x27d   : > { %v1945_v63 = vunpack.c.l.b16 %v1806_v57  ;;  %v1937_v12 = vunpack.c.l.b16 %v1722_v9 }
 0x280   : > { %v1606_v26 = vpop.f32.mrf.mxu0  ;;  %v1630_v28 = vpop.f32.mrf.mxu1 }
 0x281   : > { %v7609_v31 = vadd.f32 %v1630_v28, %v1454_v62  ;;  %v1607_v38 = vadd.f32 %v1606_v26, %v1453_v14  ;;  %v1651_v16 = vpop.f32.mrf.mxu2 }
 0x282   : > { %1923 = vmatpush.bf16.xpose.msra.mxu3 %v1911_v32  ;;  %v7657_v61 = vadd.f32 %v1651_v16, %v1455_v13 }
 0x283   : > { %v6076_v33 = vpack.i.bf16 %v7609_v31, %v7607_v29  ;;  %v6086_v47 = vpack.i.bf16 %v1607_v38, %v1604_v44  ;;  %v1807_v52 = vpack.c.bf16 %v7609_v31, %v7609_v31  ;;  %v1723_v8 = vpack.c.bf16 %v1607_v38, %v1607_v38 }
 0x285   : > { %6077 = vrot.lane.b32.xlu2 %v6076_v33, %s6968_s27  ;;  %v1946_v59 = vunpack.c.l.b16 %v1807_v52  ;;  %v1938_v11 = vunpack.c.l.b16 %v1723_v8  ;;  %v2594_v8 = vpack.c.bf16 %v7665_v49, %v7665_v49 }
 0x287   : > { %v1948_v0 = vpack.c.b16 %v1946_v59, %v1945_v63 }
 0x288   : > { %v1608_v40 = vpop.f32.mrf.mxu0  ;;  %v1632_v41 = vpop.f32.mrf.mxu1 }
 0x289   : > { %v1609_v45 = vadd.f32 %v1608_v40, %v1453_v14  ;;  %v7615_v43 = vadd.f32 %v1632_v41, %v1454_v62  ;;  %5475 = vmatmul.msk.bf16.vlgmr.msra.gmra.mxu3 %vm1903_vm7, %v1893_v39  ;;  %v1892_v62 = vunpack.c.l.b16 %v1721_v56  ;;  %v1957_v7 = vsel %vm1903_vm7, %v1948_v0, 0  ;;  %v1654_v25 = vpop.f32.mrf.mxu2 }
 0x28a   : > { %v1940_v14 = vpack.c.b16 %v1938_v11, %v1937_v12  ;;  %v7667_v26 = vadd.f32 %v1654_v25, %v1455_v13  ;;  %v2593_v56 = vpack.c.bf16 %v7647_v37, %v7647_v37 }
 0x28b   : > { %v6066_v48 = vpack.i.bf16 %v7615_v43, %v7597_v6  ;;  %v7620_v50 = vpack.i.bf16 %v1609_v45, %v1602_v42  ;;  %v1808_v36 = vpack.c.bf16 %v7615_v43, %v7615_v43  ;;  %v1894_v2 = vpack.c.b16 %v1892_v62, %v1892_v62 }
 0x28c   : > { %v1724_v17 = vpack.c.bf16 %v1609_v45, %v1609_v45 }
 0x28d   : > { %6067 = vrot.lane.b32.xlu0 %v6066_v48, %s6968_s27  ;;  %6087 = vrot.lane.b32.xlu2 %v6086_v47, %s6968_s27  ;;  %v1947_v51 = vunpack.c.l.b16 %v1808_v36 }
 0x28e   : > { %6092 = vrot.lane.b32.xlu1 %v7620_v50, %s6968_s27  ;;  %v1939_v24 = vunpack.c.l.b16 %v1724_v17 }
 0x28f   : > { %v1949_v55 = vpack.c.b16 %v1947_v51, %v1947_v51 }
 0x291   : > { %v1960_v58 = vsel %vm1903_vm7, %v1949_v55, 0  ;;  %v1656_v28 = vpop.f32.mrf.mxu2  ;;  %v2595_v55 = vpack.c.bf16 %v7649_v15, %v7649_v15 }
 0x292   : > { %1968 = vmatpush.bf16.xpose.msrb.mxu3 %v1960_v58  ;;  %v7675_v32 = vadd.f32 %v1656_v28, %v1455_v13  ;;  %v7713_v13 = vunpack.c.l.b16 %v2593_v56 }
 0x293   : > { %v7711_v12 = vunpack.c.l.b16 %v2595_v55 }
 0x295   : > { %6082 = vrot.lane.b32.xlu0 %v6081_v60, %s6968_s27  ;;  %6102 = vrot.lane.b32.xlu2 %v7593_v46, %s6969_s22 }
 0x296   : > { %6107 = vrot.lane.b32.xlu1 %v6076_v33, %s6969_s22 }
 0x299   : > { %5476 = vmatmul.msk.bf16.gmra.mxu3 %vm1903_vm7, %v1894_v2 }
 0x29a   : > { %1969 = vmatpush.bf16.xpose.msrb.mxu3 %v1957_v7 }
 0x29d   : > { %6097 = vrot.lane.b32.xlu0 %v6066_v48, %s6969_s22  ;;  %6112 = vrot.lane.b32.xlu2 %v6081_v60, %s6969_s22 }
 0x29e   : > { %6117 = vrot.lane.b32.xlu1 %v6086_v47, %s6969_s22 }
 0x2a5   : > { %6122 = vrot.lane.b32.xlu0 %v6066_v48, %s6970_s14  ;;  %6132 = vrot.lane.b32.xlu2 %v6076_v33, %s6970_s14 }
 0x2a6   : > { %6137 = vrot.lane.b32.xlu1 %v6081_v60, %s6970_s14 }
 0x2a9   : > { %5477 = vmatmul.msk.bf16.vlgmr.msrb.gmra.mxu3 %vm1903_vm7, %v1940_v14 }
 0x2ad   : > { %6127 = vrot.lane.b32.xlu0 %v7593_v46, %s6970_s14  ;;  %1833 = vrot.lane.b32.xlu2 %v7647_v37, %s6968_s27  ;;  %v1941_v46 = vpack.c.b16 %v1939_v24, %v1939_v24 }
 0x2ae   : > { %1837 = vrot.lane.b32.xlu1 %v7649_v15, %s6968_s27 }
 0x2b5   : > { %6142 = vrot.lane.b32.xlu0 %v6086_v47, %s6970_s14  ;;  %6147 = vrot.lane.b32.xlu2 %v7620_v50, %s6969_s22 }
 0x2b6   : > { %1839 = vrot.lane.b32.xlu1 %v7657_v61, %s6968_s27 }
 0x2b9   : > { %5478 = vmatmul.msk.bf16.gmra.mxu3 %vm1903_vm7, %v1941_v46 }
 0x2bd   : > { %1835 = vrot.lane.b32.xlu0 %v7665_v49, %s6968_s27  ;;  %1841 = vrot.lane.b32.xlu2 %v7667_v26, %s6968_s27 }
 0x2be   : > { %1853 = vrot.lane.b32.xlu1 %v7665_v49, %s6969_s22 }
 0x2c5   : > { %1843 = vrot.lane.b32.xlu0 %v7675_v32, %s6968_s27  ;;  %1855 = vrot.lane.b32.xlu2 %v7649_v15, %s6969_s22 }
 0x2c6   : > { %6152 = vrot.lane.b32.xlu1 %v7620_v50, %s6970_s14 }
 0x2cd   : > { %1861 = vrot.lane.b32.xlu0 %v7675_v32, %s6969_s22  ;;  %1851 = vrot.lane.b32.xlu2 %v7647_v37, %s6969_s22 }
 0x2ce   : > { %1879 = vrot.lane.b32.xlu1 %v7675_v32, %s6970_s14 }
 0x2d5   : > { %1857 = vrot.lane.b32.xlu2 %v7657_v61, %s6969_s22 }
 0x2dd   : > { %1859 = vrot.lane.b32.xlu2 %v7667_v26, %s6969_s22 }
 0x2df   : > { %v6078_v27 = vpop.permute.xlu2 %6077  ;;  %v6073_v38 = vpop.permute.xlu1 %6072 }
 0x2e0   : > { %v6075_v39 = vunpack.i.h.bf16 %v6073_v38  ;;  %v6074_v40 = vunpack.i.l.bf16 %v6073_v38  ;;  %v6080_v44 = vunpack.i.h.bf16 %v6078_v27  ;;  %v6079_v45 = vunpack.i.l.bf16 %v6078_v27 }
 0x2e2   : > { %v1810_v36 = vpack.c.bf16 %v6075_v39, %v6075_v39  ;;  %v1809_v51 = vpack.c.bf16 %v6074_v40, %v6074_v40  ;;  %v1813_v57 = vpack.c.bf16 %v6080_v44, %v6080_v44  ;;  %v1812_v58 = vpack.c.bf16 %v6079_v45, %v6079_v45 }
 0x2e3   : > { %v2596_v45 = vpack.c.bf16 %v7657_v61, %v7657_v61 }
 0x2e4   : > { %v1992_v62 = vunpack.c.l.b16 %v1810_v36  ;;  %v1991_v63 = vunpack.c.l.b16 %v1809_v51  ;;  %v2038_v14 = vunpack.c.l.b16 %v1813_v57  ;;  %v2037_v16 = vunpack.c.l.b16 %v1812_v58 }
 0x2e5   : > { %1873 = vrot.lane.b32.xlu2 %v7649_v15, %s6970_s14 }
 0x2e7   : > { %v6088_v33 = vpop.permute.xlu2 %6087 }
 0x2e8   : > { %v6090_v0 = vunpack.i.h.bf16 %v6088_v33  ;;  %v6089_v2 = vunpack.i.l.bf16 %v6088_v33  ;;  %v1994_v33 = vpack.c.b16 %v1992_v62, %v1991_v63 }
 0x2ea   : > { %v1729_v46 = vpack.c.bf16 %v6090_v0, %v6090_v0  ;;  %v1728_v38 = vpack.c.bf16 %v6089_v2, %v6089_v2  ;;  %v2003_v58 = vsel %vm1903_vm7, %v1994_v33, 0 }
 0x2ec   : > { %v2030_v55 = vunpack.c.l.b16 %v1729_v46 }
 0x2ed   : > { %1869 = vrot.lane.b32.xlu2 %v7647_v37, %s6970_s14 }
 0x2ef   : > { %v6103_v34 = vpop.permute.xlu2 %6102 }
 0x2f0   : > { %v6105_v9 = vunpack.i.h.bf16 %v6103_v34  ;;  %v6104_v17 = vunpack.i.l.bf16 %v6103_v34  ;;  %v2632_v34 = vpack.c.b16 %v7711_v12, %v7711_v12 }
 0x2f2   : > { %v1816_v44 = vpack.c.bf16 %v6105_v9, %v6105_v9 }
 0x2f4   : > { %v2084_v63 = vunpack.c.l.b16 %v1816_v44 }
 0x2f7   : > { %v7697_v35 = vpop.permute.xlu2 %6112 }
 0x2ff   : > { %v6068_v41 = vpop.permute.xlu0 %6067  ;;  %v7699_v42 = vpop.permute.xlu2 %6132 }
 0x300   : > { %v6070_v48 = vunpack.i.h.bf16 %v6068_v41  ;;  %v6069_v47 = vunpack.i.l.bf16 %v6068_v41  ;;  %v7701_v50 = vpop.permute.xlu1 %6092  ;;  %v7718_v41 = vunpack.c.l.b16 %v2594_v8 }
 0x301   : > { %v6094_v28 = vunpack.i.l.bf16 %v7701_v50  ;;  %v6095_v36 = vunpack.i.h.bf16 %v7701_v50 }
 0x302   : > { %v1814_v52 = vpack.c.bf16 %v6070_v48, %v6070_v48  ;;  %v1811_v54 = vpack.c.bf16 %v6069_v47, %v6069_v47  ;;  %v2597_v48 = vpack.c.bf16 %v7667_v26, %v7667_v26  ;;  %v1815_v47 = vpack.c.bf16 %v6104_v17, %v6104_v17 }
 0x303   : > { %v1727_v56 = vpack.c.bf16 %v6094_v28, %v6094_v28  ;;  %v1730_v9 = vpack.c.bf16 %v6095_v36, %v6095_v36 }
 0x304   : > { %v2039_v59 = vunpack.c.l.b16 %v1814_v52  ;;  %v1993_v60 = vunpack.c.l.b16 %v1811_v54  ;;  %v2040_v52 = vpack.c.b16 %v2038_v14, %v2037_v16  ;;  %v2598_v54 = vpack.c.bf16 %v7675_v32, %v7675_v32 }
 0x305   : > { %v2083_v8 = vunpack.c.l.b16 %v1815_v47  ;;  %v1985_v17 = vunpack.c.l.b16 %v1727_v56  ;;  %v2031_v36 = vunpack.c.l.b16 %v1730_v9  ;;  %v2674_v12 = vunpack.c.l.b16 %v2597_v48 }
 0x306   : > { %v1995_v4 = vpack.c.b16 %v1993_v60, %v1993_v60  ;;  %v2041_v7 = vpack.c.b16 %v2039_v59, %v2039_v59  ;;  %v2029_v59 = vunpack.c.l.b16 %v1728_v38  ;;  %v7740_v46 = vunpack.c.l.b16 %v2598_v54 }
 0x307   : > { %v6083_v10 = vpop.permute.xlu0 %6082  ;;  %v7709_v11 = vpop.permute.xlu2 %1833  ;;  %v6114_v54 = vunpack.i.l.bf16 %v7697_v35 }
 0x308   : > { %v6108_v24 = vpop.permute.xlu1 %6107  ;;  %v2006_v25 = vsel %vm1903_vm7, %v1995_v4, 0  ;;  %v2052_v27 = vsel %vm1903_vm7, %v2041_v7, 0  ;;  %v6085_v39 = vunpack.i.h.bf16 %v6083_v10  ;;  %v6084_v40 = vunpack.i.l.bf16 %v6083_v10 }
 0x309   : > { %2014 = vmatpush.bf16.xpose.msrb.mxu0 %v2006_v25  ;;  %5867 = vmatpush.bf16.xpose.msrb.mxu2 %v2006_v25  ;;  %v6110_v0 = vunpack.i.h.bf16 %v6108_v24  ;;  %v6109_v2 = vunpack.i.l.bf16 %v6108_v24  ;;  %v2049_v25 = vsel %vm1903_vm7, %v2040_v52, 0 }
 0x30a   : > { %2060 = vmatpush.bf16.xpose.msrb.mxu1 %v2052_v27  ;;  %5869 = vmatpush.bf16.xpose.msra.mxu3 %v2052_v27  ;;  %v1726_v60 = vpack.c.bf16 %v6085_v39, %v6085_v39  ;;  %v1725_v62 = vpack.c.bf16 %v6084_v40, %v6084_v40  ;;  %v2032_v39 = vpack.c.b16 %v2030_v55, %v2029_v59  ;;  %v6115_v40 = vunpack.i.h.bf16 %v7697_v35 }
 0x30b   : > { %v1819_v44 = vpack.c.bf16 %v6110_v0, %v6110_v0  ;;  %v1818_v47 = vpack.c.bf16 %v6109_v2, %v6109_v2  ;;  %v2033_v35 = vpack.c.b16 %v2031_v36, %v2031_v36  ;;  %v2642_v36 = vsel %vm2640_vm9, %v2632_v34, 0 }
 0x30c   : > { %v1925_v51 = vpop.f32.mrf.mxu3  ;;  %v1984_v28 = vunpack.c.l.b16 %v1726_v60  ;;  %v1983_v27 = vunpack.c.l.b16 %v1725_v62  ;;  %v6134_v60 = vunpack.i.l.bf16 %v7699_v42  ;;  %v7746_v0 = vpack.c.bf16 %v6115_v40, %v6115_v40 }
 0x30d   : > { %v2256_v57 = vmul.f32 0.17677669, %v1925_v51  ;;  %v2130_v2 = vunpack.c.l.b16 %v1819_v44 }
 0x30e   : > { %v1986_v55 = vpack.c.b16 %v1984_v28, %v1983_v27  ;;  %v1824_v40 = vpack.c.bf16 %v6134_v60, %v6134_v60  ;;  %v2076_v34 = vunpack.c.l.b16 %v7746_v0 }
 0x30f   : > { %v7731_v4 = vadd.f32 %v2256_v57, %v7388_v5  ;;  %v6098_v50 = vpop.permute.xlu0 %6097  ;;  %v7733_v7 = vpop.permute.xlu2 %6147  ;;  %v2086_v57 = vpack.c.b16 %v2084_v63, %v2083_v8 }
 0x310   : > { %v6100_v10 = vunpack.i.h.bf16 %v6098_v50  ;;  %v6099_v14 = vunpack.i.l.bf16 %v6098_v50  ;;  %v7735_v16 = vpop.permute.xlu1 %6117  ;;  %v1987_v50 = vpack.c.b16 %v1985_v17, %v1985_v17  ;;  %v7758_v17 = vpack.c.bf16 %v6114_v54, %v6114_v54 }
 0x311   : > { %2015 = vmatpush.bf16.xpose.msrb.mxu0 %v2003_v58  ;;  %5868 = vmatpush.bf16.xpose.msrb.mxu2 %v2003_v58  ;;  %v2305_v24 = vsel %vm2304_vm8, %v7731_v4, -inf  ;;  %v6135_v58 = vunpack.i.h.bf16 %v7699_v42 }
 0x312   : > { %v1820_v33 = vpack.c.bf16 %v6100_v10, %v6100_v10  ;;  %v1817_v38 = vpack.c.bf16 %v6099_v14, %v6099_v14  ;;  %2061 = vmatpush.bf16.xpose.msrb.mxu1 %v2049_v25  ;;  %5870 = vmatpush.bf16.xpose.msra.mxu3 %v2049_v25  ;;  %v2129_v14 = vunpack.c.l.b16 %v1818_v47 }
 0x313   : > { %2306 = vmax.xlane.f32.xlu0 %v2305_v24  ;;  %v7760_v28 = vpack.c.bf16 %v6135_v58, %v6135_v58 }
 0x314   : > { %v2131_v51 = vunpack.c.l.b16 %v1820_v33  ;;  %v2085_v52 = vunpack.c.l.b16 %v1817_v38  ;;  %v1927_v56 = vpop.f32.mrf.mxu3 }
 0x315   : > { %v2257_v62 = vmul.f32 0.17677669, %v1927_v56  ;;  %v2673_v56 = vunpack.c.l.b16 %v2596_v45  ;;  %v2221_v45 = vunpack.c.l.b16 %v1824_v40 }
 0x316   : > { %v2133_v59 = vpack.c.b16 %v2131_v51, %v2131_v51  ;;  %v2087_v10 = vpack.c.b16 %v2085_v52, %v2085_v52  ;;  %v6120_v51 = vunpack.i.h.bf16 %v7735_v16  ;;  %v2132_v52 = vpack.c.b16 %v2130_v2, %v2129_v14 }
 0x317   : > { %v7749_v9 = vadd.f32 %v2257_v62, %v7388_v5  ;;  %v6123_v25 = vpop.permute.xlu0 %6122  ;;  %v7751_v63 = vpop.permute.xlu2 %1841  ;;  %v2677_v62 = vpack.c.b16 %v7740_v46, %v7740_v46 }
 0x318   : > { %v6125_v8 = vunpack.i.h.bf16 %v6123_v25  ;;  %v6124_v24 = vunpack.i.l.bf16 %v6123_v25  ;;  %v7753_v33 = vpop.permute.xlu1 %6137  ;;  %5479 = vmatmul.msk.bf16.vlgmr.msrb.gmra.mxu0 %vm1903_vm7, %v1986_v55  ;;  %5480 = vmatmul.msk.bf16.vlgmr.msrb.gmra.mxu2 %vm1903_vm7, %v1987_v50  ;;  %v2098_v42 = vsel %vm1903_vm7, %v2087_v10, 0  ;;  %v2144_v27 = vsel %vm1903_vm7, %v2133_v59, 0 }
 0x319   : > { %5481 = vmatmul.msk.bf16.vlgmr.msrb.gmra.mxu1 %vm1903_vm7, %v2032_v39  ;;  %2106 = vmatpush.bf16.xpose.msra.mxu2 %v2098_v42  ;;  %v2308_v38 = vsel %vm2304_vm8, %v7749_v9, -inf  ;;  %v6119_v39 = vunpack.i.l.bf16 %v7735_v16  ;;  %v2075_v16 = vunpack.c.l.b16 %v7758_v17  ;;  %v2095_v55 = vsel %vm1903_vm7, %v2086_v57, 0 }
 0x31a   : > { %v1826_v44 = vpack.c.bf16 %v6125_v8, %v6125_v8  ;;  %v1823_v47 = vpack.c.bf16 %v6124_v24, %v6124_v24  ;;  %5482 = vmatmul.msk.bf16.vlgmr.msra.gmra.mxu3 %vm1903_vm7, %v2033_v35  ;;  %2309 = vmax.xlane.f32.xlu2 %v2308_v38  ;;  %v2222_v59 = vunpack.c.l.b16 %v7760_v28  ;;  %v1735_v14 = vpack.c.bf16 %v6120_v51, %v6120_v51 }
 0x31b   : > { %2152 = vmatpush.bf16.xpose.msrb.mxu3 %v2144_v27  ;;  %v1734_v25 = vpack.c.bf16 %v6119_v39, %v6119_v39  ;;  %v2141_v48 = vsel %vm1903_vm7, %v2132_v52, 0  ;;  %v6140_v28 = vunpack.i.h.bf16 %v7753_v33 }
 0x31c   : > { %v2223_v54 = vunpack.c.l.b16 %v1826_v44  ;;  %v2177_v58 = vunpack.c.l.b16 %v1823_v47  ;;  %v1930_v60 = vpop.f32.mrf.mxu3  ;;  %v6139_v44 = vunpack.i.l.bf16 %v7753_v33  ;;  %v2122_v52 = vunpack.c.l.b16 %v1735_v14 }
 0x31d   : > { %v2258_v50 = vmul.f32 0.17677669, %v1930_v60  ;;  %v2686_v60 = vsel %vm2640_vm9, %v2677_v62, 0  ;;  %v2631_v33 = vpack.c.b16 %v7718_v41, %v7713_v13 }
 0x31e   : > { %v2225_v10 = vpack.c.b16 %v2223_v54, %v2223_v54  ;;  %v2179_v2 = vpack.c.b16 %v2177_v58, %v2177_v58  ;;  %v2121_v54 = vunpack.c.l.b16 %v1734_v25 }
 0x31f   : > { %v7786_v46 = vadd.f32 %v2258_v50, %v7388_v5  ;;  %v6128_v35 = vpop.permute.xlu0 %6127  ;;  %v7788_v8 = vpop.permute.xlu2 %1855 }
 0x320   : > { %v6130_v0 = vunpack.i.h.bf16 %v6128_v35  ;;  %v6129_v24 = vunpack.i.l.bf16 %v6128_v35  ;;  %v2607_v57 = vpack.c.bf16 %v7788_v8, %v7788_v8  ;;  %v7793_v42 = vpop.permute.xlu1 %1837  ;;  %v2190_v17 = vsel %vm1903_vm7, %v2179_v2, 0 }
 0x321   : > { %v2601_v27 = vpack.c.bf16 %v7793_v42, %v7793_v42  ;;  %2107 = vmatpush.bf16.xpose.msra.mxu2 %v2095_v55  ;;  %2198 = vmatpush.bf16.xpose.msra.mxu0 %v2190_v17  ;;  %v2236_v38 = vsel %vm1903_vm7, %v2225_v10, 0  ;;  %v2311_v40 = vsel %vm2304_vm8, %v7786_v46, -inf  ;;  %v1738_v35 = vpack.c.bf16 %v6140_v28, %v6140_v28 }
 0x322   : > { %v1822_v47 = vpack.c.bf16 %v6130_v0, %v6130_v0  ;;  %v1821_v51 = vpack.c.bf16 %v6129_v24, %v6129_v24  ;;  %v2807_v39 = vunpack.c.l.b16 %v2607_v57  ;;  %2244 = vmatpush.bf16.xpose.msra.mxu1 %v2236_v38  ;;  %2312 = vmax.xlane.f32.xlu1 %v2311_v40  ;;  %v2676_v0 = vpack.c.b16 %v2674_v12, %v2673_v56 }
 0x323   : > { %v2719_v58 = vunpack.c.l.b16 %v2601_v27  ;;  %2153 = vmatpush.bf16.xpose.msrb.mxu3 %v2141_v48  ;;  %v2224_v24 = vpack.c.b16 %v2222_v59, %v2221_v45  ;;  %v2078_v57 = vpack.c.b16 %v2076_v34, %v2075_v16  ;;  %v2124_v48 = vpack.c.b16 %v2122_v52, %v2121_v54 }
 0x324   : > { %v2176_v50 = vunpack.c.l.b16 %v1822_v47  ;;  %v2175_v55 = vunpack.c.l.b16 %v1821_v51  ;;  %v2809_v10 = vpack.c.b16 %v2807_v39, %v2807_v39  ;;  %v1932_v2 = vpop.f32.mrf.mxu3  ;;  %v6149_v56 = vunpack.i.l.bf16 %v7733_v7 }
 0x325   : > { %v2721_v14 = vpack.c.b16 %v2719_v58, %v2719_v58  ;;  %v2168_v12 = vunpack.c.l.b16 %v1738_v35  ;;  %v2233_v34 = vsel %vm1903_vm7, %v2224_v24, 0  ;;  %v2599_v54 = vpack.c.bf16 %v7709_v11, %v7709_v11 }
 0x326   : > { %v2178_v25 = vpack.c.b16 %v2176_v50, %v2175_v55  ;;  %v2818_v41 = vsel %vm2640_vm9, %v2809_v10, 0  ;;  %v1733_v58 = vpack.c.bf16 %v6149_v56, %v6149_v56 }
 0x327   : > { %v6143_v17 = vpop.permute.xlu0 %6142  ;;  %v7806_v62 = vpop.permute.xlu2 %1851  ;;  %v2730_v28 = vsel %vm2640_vm9, %v2721_v14, 0 }
 0x328   : > { %v6145_v27 = vunpack.i.h.bf16 %v6143_v17  ;;  %v6144_v38 = vunpack.i.l.bf16 %v6143_v17  ;;  %v7808_v40 = vpop.permute.xlu1 %1839  ;;  %5483 = vmatmul.msk.bf16.vlgmr.msra.gmra.mxu2 %vm1903_vm7, %v2078_v57  ;;  %v2187_v13 = vsel %vm1903_vm7, %v2178_v25, 0  ;;  %v2605_v55 = vpack.c.bf16 %v7806_v62, %v7806_v62 }
 0x329   : > { %2650 = vmatpush.bf16.msrb.mxu2 %v2642_v36  ;;  %v1737_v36 = vpack.c.bf16 %v6139_v44, %v6139_v44  ;;  %2199 = vmatpush.bf16.xpose.msra.mxu0 %v2187_v13  ;;  %v6150_v44 = vunpack.i.h.bf16 %v7733_v7  ;;  %v2077_v14 = vunpack.c.l.b16 %v1733_v58  ;;  %v2603_v58 = vpack.c.bf16 %v7751_v63, %v7751_v63 }
 0x32a   : > { %v1741_v59 = vpack.c.bf16 %v6145_v27, %v6145_v27  ;;  %v1740_v45 = vpack.c.bf16 %v6144_v38, %v6144_v38  ;;  %5485 = vmatmul.msk.bf16.vlgmr.msrb.gmra.mxu3 %vm1903_vm7, %v2124_v48  ;;  %2245 = vmatpush.bf16.xpose.msra.mxu1 %v2233_v34  ;;  %v2805_v48 = vunpack.c.l.b16 %v2605_v55 }
 0x32b   : > { %2694 = vmatpush.bf16.msra.mxu3 %v2686_v60  ;;  %v2167_v16 = vunpack.c.l.b16 %v1737_v36  ;;  %v1736_v7 = vpack.c.bf16 %v6150_v44, %v6150_v44  ;;  %v2717_v36 = vunpack.c.l.b16 %v2599_v54 }
 0x32c   : > { %v2214_v47 = vunpack.c.l.b16 %v1741_v59  ;;  %v2213_v51 = vunpack.c.l.b16 %v1740_v45  ;;  %v1971_v39 = vpop.f32.mrf.mxu3 }
 0x32d   : > { %2651 = vmatpush.bf16.msrb.mxu2 %v2631_v33  ;;  %v2259_v52 = vmul.f32 0.17677669, %v1971_v39  ;;  %v2170_v60 = vpack.c.b16 %v2168_v12, %v2167_v16  ;;  %v2123_v27 = vunpack.c.l.b16 %v1736_v7  ;;  %v2079_v12 = vpack.c.b16 %v2077_v14, %v2077_v14 }
 0x32e   : > { %v2216_v50 = vpack.c.b16 %v2214_v47, %v2213_v51  ;;  %v2602_v47 = vpack.c.bf16 %v7808_v40, %v7808_v40 }
 0x32f   : > { %2695 = vmatpush.bf16.msra.mxu3 %v2676_v0  ;;  %v7823_v10 = vadd.f32 %v2259_v52, %v7388_v5  ;;  %v7825_v2 = vpop.permute.xlu0 %1835  ;;  %v7827_v33 = vpop.permute.xlu2 %1857  ;;  %v2125_v45 = vpack.c.b16 %v2123_v27, %v2123_v27 }
 0x330   : > { %v2600_v35 = vpack.c.bf16 %v7825_v2, %v7825_v2  ;;  %v7831_v0 = vpop.permute.xlu1 %1853  ;;  %5487 = vmatmul.msk.bf16.vlgmr.msra.gmra.mxu0 %vm1903_vm7, %v2170_v60 }
 0x331   : > { %2826 = vmatpush.bf16.msra.mxu2 %v2818_v41  ;;  %2738 = vmatpush.bf16.msrb.mxu0 %v2730_v28  ;;  %v2606_v24 = vpack.c.bf16 %v7831_v0, %v7831_v0  ;;  %v2314_v57 = vsel %vm2304_vm8, %v7823_v10, -inf }
 0x332   : > { %5489 = vmatmul.msk.bf16.vlgmr.msra.gmra.mxu1 %vm1903_vm7, %v2216_v50  ;;  %v2718_v25 = vunpack.c.l.b16 %v2600_v35  ;;  %2315 = vmax.xlane.f32.xlu1 %v2314_v57  ;;  %v2761_v35 = vunpack.c.l.b16 %v2602_v47 }
 0x333   : > { %v2806_v17 = vunpack.c.l.b16 %v2606_v24 }
 0x334   : > { %v2720_v38 = vpack.c.b16 %v2718_v25, %v2717_v36  ;;  %v1973_v13 = vpop.f32.mrf.mxu3  ;;  %v2762_v25 = vunpack.c.l.b16 %v2603_v58 }
 0x335   : > { %v2808_v41 = vpack.c.b16 %v2806_v17, %v2805_v48  ;;  %v2260_v56 = vmul.f32 0.17677669, %v1973_v13 }
 0x336   : > { %2739 = vmatpush.bf16.msrb.mxu0 %v2720_v38 }
 0x337   : > { %v7840_v34 = vadd.f32 %v2260_v56, %v7388_v5  ;;  %2827 = vmatpush.bf16.msra.mxu2 %v2808_v41  ;;  %v7842_v16 = vpop.permute.xlu0 %1843  ;;  %v7844_v59 = vpop.permute.xlu2 %1859 }
 0x338   : > { %v2604_v28 = vpack.c.bf16 %v7842_v16, %v7842_v16  ;;  %v6153_v44 = vpop.permute.xlu1 %6152  ;;  %5484 = vmatmul.msk.bf16.gmra.mxu2 %vm1903_vm7, %v2079_v12 }
 0x339   : > { %v6155_v51 = vunpack.i.h.bf16 %v6153_v44  ;;  %v6154_v39 = vunpack.i.l.bf16 %v6153_v44  ;;  %v2317_v52 = vsel %vm2304_vm8, %v7840_v34, -inf }
 0x33a   : > { %v2763_v54 = vunpack.c.l.b16 %v2604_v28  ;;  %5486 = vmatmul.msk.bf16.gmra.mxu3 %vm1903_vm7, %v2125_v45  ;;  %2318 = vmax.xlane.f32.xlu0 %v2317_v52  ;;  %v2764_v45 = vpack.c.b16 %v2762_v25, %v2761_v35  ;;  %v2609_v28 = vpack.c.bf16 %v7844_v59, %v7844_v59  ;;  %v2608_v52 = vpack.c.bf16 %v7827_v33, %v7827_v33 }
 0x33b   : > { %v1742_v60 = vpack.c.bf16 %v6155_v51, %v6155_v51  ;;  %v1739_v50 = vpack.c.bf16 %v6154_v39, %v6154_v39 }
 0x33c   : > { %v2765_v55 = vpack.c.b16 %v2763_v54, %v2763_v54  ;;  %v1976_v7 = vpop.f32.mrf.mxu3 }
 0x33d   : > { %v2215_v24 = vunpack.c.l.b16 %v1742_v60  ;;  %v2169_v57 = vunpack.c.l.b16 %v1739_v50  ;;  %v2261_v36 = vmul.f32 0.17677669, %v1976_v7 }
 0x33e   : > { %v2774_v14 = vsel %vm2640_vm9, %v2765_v55, 0  ;;  %v2850_v55 = vunpack.c.l.b16 %v2609_v28 }
 0x33f   : > { %v2217_v48 = vpack.c.b16 %v2215_v24, %v2215_v24  ;;  %v2171_v17 = vpack.c.b16 %v2169_v57, %v2169_v57  ;;  %v7858_v27 = vadd.f32 %v2261_v36, %v7388_v5  ;;  %v7860_v38 = vpop.permute.xlu0 %1861  ;;  %2782 = vmatpush.bf16.msrb.mxu1 %v2774_v14  ;;  %v7862_v13 = vpop.permute.xlu2 %1873  ;;  %v2849_v57 = vunpack.c.l.b16 %v2608_v52 }
 0x340   : > { %v2610_v41 = vpack.c.bf16 %v7860_v38, %v7860_v38  ;;  %v2613_v56 = vpack.c.bf16 %v7862_v13, %v7862_v13  ;;  %v7868_v12 = vpop.permute.xlu1 %1879 }
 0x341   : > { %8985 = vst [vmem:[#allocation52_spill] sm:$0xff] %v7868_v12  ;;  %v2616_v44 = vpack.c.bf16 %v7868_v12, %v7868_v12  ;;  %5488 = vmatmul.msk.bf16.gmra.mxu0 %vm1903_vm7, %v2171_v17  ;;  %v2320_v47 = vsel %vm2304_vm8, %v7858_v27, -inf  ;;  %v2852_v14 = vpack.c.b16 %v2850_v55, %v2849_v57 }
 0x342   : > { %5490 = vmatmul.msk.bf16.gmra.mxu1 %vm1903_vm7, %v2217_v48  ;;  %v2851_v51 = vunpack.c.l.b16 %v2610_v41  ;;  %v2895_v39 = vunpack.c.l.b16 %v2613_v56  ;;  %2321 = vmax.xlane.f32.xlu0 %v2320_v47 }
 0x343   : > { %v2939_v54 = vunpack.c.l.b16 %v2616_v44  ;;  %2783 = vmatpush.bf16.msrb.mxu1 %v2764_v45 }
 0x344   : > { %v2853_v58 = vpack.c.b16 %v2851_v51, %v2851_v51  ;;  %v2897_v60 = vpack.c.b16 %v2895_v39, %v2895_v39  ;;  %v1978_v50 = vpop.f32.mrf.mxu3 }
 0x345   : > { %v2941_v7 = vpack.c.b16 %v2939_v54, %v2939_v54 }
 0x346   : > { %v2862_v35 = vsel %vm2640_vm9, %v2853_v58, 0  ;;  %v2906_v24 = vsel %vm2640_vm9, %v2897_v60, 0 }
 0x347   : > { %2870 = vmatpush.bf16.msrb.mxu3 %v2862_v35  ;;  %2914 = vmatpush.bf16.msra.mxu0 %v2906_v24  ;;  %v2950_v36 = vsel %vm2640_vm9, %v2941_v7, 0  ;;  %v7900_v50 = vpop.permute.xlu2 %1869 }
 0x348   : > { %2958 = vmatpush.bf16.msra.mxu1 %v2950_v36 }
 0x34b   : > { %2871 = vmatpush.bf16.msrb.mxu3 %v2852_v14 }
 0x386   : > { %v2307_v7 = vpop.xlane.xlu0 %2306 }
 0x387   : > { %v2377_v24 = vsub.f32 %v7731_v4, %v2307_v7 }
 0x395   : > { %v2017_v25 = vpop.f32.mrf.mxu0  ;;  %v2313_v36 = vpop.xlane.xlu1 %2312 }
 0x396   : > { %v2262_v48 = vmul.f32 0.17677669, %v2017_v25  ;;  %v2063_v45 = vpop.f32.mrf.mxu1  ;;  %v2401_v25 = vmul.f32 1.442695, %v2377_v24 }
 0x398   : > { %v7884_v17 = vadd.f32 %v2262_v48, %v7388_v5  ;;  %6172 = vpow2.f32 %v2401_v25 }
 0x39a   : > { %v2323_v41 = vsel %vm2304_vm8, %v7884_v17, -inf }
 0x39b   : > { %2324 = vmax.xlane.f32.xlu2 %v2323_v41  ;;  %v2022_v56 = vpop.f32.mrf.mxu2 }
 0x39c   : > { %v2264_v28 = vmul.f32 0.17677669, %v2022_v56  ;;  %v2310_v56 = vpop.xlane.xlu2 %2309 }
 0x39d   : > { %v7888_v44 = vpop.f32.mrf.mxu3  ;;  %v2019_v47 = vpop.f32.mrf.mxu0 }
 0x39e   : > { %v7891_v51 = vadd.f32 %v2264_v28, %v7388_v5  ;;  %v2263_v39 = vmul.f32 0.17677669, %v2019_v47  ;;  %v2065_v35 = vpop.f32.mrf.mxu1  ;;  %v7920_v21 = vpop.eup %6172 }
 0x39f   : > { %v2266_v22 = vmul.f32 0.17677669, %v2065_v35 }
 0x3a0   : > { %v7894_v52 = vadd.f32 %v2263_v39, %v7388_v5  ;;  %v2329_v54 = vsel %vm2304_vm8, %v7891_v51, -inf }
 0x3a2   : > { %v2326_v58 = vsel %vm2304_vm8, %v7894_v52, -inf }
 0x3a3   : > { %2330 = vmax.xlane.f32.xlu2 %v2329_v54  ;;  %v2024_v60 = vpop.f32.mrf.mxu2  ;;  %2327 = vmax.xlane.f32.xlu1 %v2326_v58  ;;  %v2379_v54 = vsub.f32 %v7786_v46, %v2313_v36  ;;  %v2265_v58 = vmul.f32 0.17677669, %v2063_v45 }
 0x3a5   : > { %v2070_v55 = vpop.f32.mrf.mxu3  ;;  %v2405_v24 = vmul.f32 1.442695, %v2379_v54  ;;  %v2449_v54 = vsel %vm2304_vm8, %v7920_v21, 0.0 }
 0x3a6   : > { %v2378_v55 = vsub.f32 %v7749_v9, %v2310_v56 }
 0x3a7   : > { %6174 = vpow2.f32 %v2405_v24 }
 0x3a8   : > { %v2403_v46 = vmul.f32 1.442695, %v2378_v55  ;;  %v2316_v55 = vpop.xlane.xlu1 %2315 }
 0x3aa   : > { %6176 = vpow2.f32 %v2403_v46 }
 0x3ab   : > { %v2109_v57 = vpop.f32.mrf.mxu2 }
 0x3ac   : > { %v2268_v14 = vmul.f32 0.17677669, %v2109_v57 }
 0x3ad   : > { %v7903_v48 = vpop.f32.mrf.mxu3  ;;  %v2201_v41 = vpop.f32.mrf.mxu0 }
 0x3ae   : > { %v7906_v28 = vadd.f32 %v2268_v14, %v7388_v5  ;;  %v2274_v47 = vmul.f32 0.17677669, %v2201_v41  ;;  %v7918_v14 = vadd.f32 %v2265_v58, %v7388_v5 }
 0x3af   : > { %v2247_v39 = vpop.f32.mrf.mxu1 }
 0x3b0   : > { %v7910_v60 = vadd.f32 %v2274_v47, %v7388_v5  ;;  %v2341_v4 = vsel %vm2304_vm8, %v7906_v28, -inf  ;;  %v2332_v25 = vsel %vm2304_vm8, %v7918_v14, -inf  ;;  %v2277_v18 = vmul.f32 0.17677669, %v2247_v39  ;;  %v2319_v39 = vpop.xlane.xlu0 %2318 }
 0x3b1   : > { %2342 = vmax.xlane.f32.xlu0 %v2341_v4 }
 0x3b2   : > { %v2359_v7 = vsel %vm2304_vm8, %v7910_v60, -inf }
 0x3b3   : > { %2360 = vmax.xlane.f32.xlu2 %v2359_v7  ;;  %v2111_v57 = vpop.f32.mrf.mxu2  ;;  %v7931_v7 = vpop.eup %6174 }
 0x3b4   : > { %v2269_v56 = vmul.f32 0.17677669, %v2111_v57  ;;  %v7938_v57 = vpop.eup %6176 }
 0x3b5   : > { %v2157_v45 = vpop.f32.mrf.mxu3  ;;  %v2203_v36 = vpop.f32.mrf.mxu0 }
 0x3b6   : > { %v2275_v41 = vmul.f32 0.17677669, %v2203_v36  ;;  %v7936_v36 = vadd.f32 %v2269_v56, %v7388_v5  ;;  %v2452_v56 = vsel %vm2304_vm8, %v7938_v57, 0.0 }
 0x3b7   : > { %v2249_v47 = vpop.f32.mrf.mxu1 }
 0x3b8   : > { %v7923_v9 = vadd.f32 %v2275_v41, %v7388_v5  ;;  %v2344_v30 = vsel %vm2304_vm8, %v7936_v36, -inf }
 0x3b9   : > { %2333 = vmax.xlane.f32.xlu0 %v2332_v25  ;;  %v2380_v25 = vsub.f32 %v7823_v10, %v2316_v55  ;;  %v7949_v10 = vadd.f32 %v2277_v18, %v7388_v5 }
 0x3ba   : > { %v2362_v58 = vsel %vm2304_vm8, %v7923_v9, -inf }
 0x3bb   : > { %2450 = vadd.xlane.f32.xlu2 %v2449_v54  ;;  %v2114_v4 = vpop.f32.mrf.mxu2  ;;  %2363 = vmax.xlane.f32.xlu1 %v2362_v58  ;;  %v2455_v54 = vsel %vm2304_vm8, %v7931_v7, 0.0  ;;  %v2267_v58 = vmul.f32 0.17677669, %v7888_v44  ;;  %v2407_v19 = vmul.f32 1.442695, %v2380_v25  ;;  %v7955_v44 = vadd.f32 %v2266_v22, %v7388_v5 }
 0x3bc   : > { %v2368_v25 = vsel %vm2304_vm8, %v7949_v10, -inf }
 0x3bd   : > { %v7933_v24 = vpop.f32.mrf.mxu3  ;;  %6178 = vpow2.f32 %v2407_v19 }
 0x3be   : > { %v2206_v46 = vpop.f32.mrf.mxu0 }
 0x3bf   : > { %v2252_v41 = vpop.f32.mrf.mxu1  ;;  %v2276_v18 = vmul.f32 0.17677669, %v2206_v46  ;;  %v2270_v46 = vmul.f32 0.17677669, %v2114_v4 }
 0x3c1   : > { %2456 = vadd.xlane.f32.xlu0 %v2455_v54  ;;  %v7952_v54 = vadd.f32 %v2267_v58, %v7388_v5 }
 0x3c3   : > { %2345 = vmax.xlane.f32.xlu2 %v2344_v30  ;;  %v2116_v23 = vpop.f32.mrf.mxu2  ;;  %2453 = vadd.xlane.f32.xlu1 %v2452_v56  ;;  %v2278_v30 = vmul.f32 0.17677669, %v2249_v47  ;;  %v2335_v56 = vsel %vm2304_vm8, %v7955_v44, -inf  ;;  %v2338_v58 = vsel %vm2304_vm8, %v7952_v54, -inf  ;;  %v7964_v22 = vpop.eup %6178 }
 0x3c4   : > { %v2381_v23 = vsub.f32 %v7840_v34, %v2319_v39  ;;  %v2272_v34 = vmul.f32 0.17677669, %v2157_v45  ;;  %v2458_v47 = vsel %vm2304_vm8, %v7964_v22, 0.0  ;;  %v7982_v45 = vadd.f32 %v2270_v46, %v7388_v5 }
 0x3c5   : > { %v2162_v55 = vpop.f32.mrf.mxu3  ;;  %v7967_v19 = vadd.f32 %v2278_v30, %v7388_v5 }
 0x3c6   : > { %v2208_v35 = vpop.f32.mrf.mxu0  ;;  %v7970_v55 = vadd.f32 %v2276_v18, %v7388_v5  ;;  %v2279_v18 = vmul.f32 0.17677669, %v2252_v41 }
 0x3c7   : > { %v2254_v20 = vpop.f32.mrf.mxu1  ;;  %v2371_v39 = vsel %vm2304_vm8, %v7967_v19, -inf }
 0x3c8   : > { %v2409_v20 = vmul.f32 1.442695, %v2381_v23  ;;  %v2365_v35 = vsel %vm2304_vm8, %v7970_v55, -inf  ;;  %v2322_v23 = vpop.xlane.xlu0 %2321 }
 0x3c9   : > { %2369 = vmax.xlane.f32.xlu0 %v2368_v25  ;;  %v7979_v25 = vadd.f32 %v2272_v34, %v7388_v5  ;;  %v2347_v34 = vsel %vm2304_vm8, %v7982_v45, -inf }
 0x3ca   : > { %6180 = vpow2.f32 %v2409_v20 }
 0x3cb   : > { %2336 = vmax.xlane.f32.xlu2 %v2335_v56  ;;  %2339 = vmax.xlane.f32.xlu1 %v2338_v58  ;;  %v2353_v4 = vsel %vm2304_vm8, %v7979_v25, -inf  ;;  %v2382_v56 = vsub.f32 %v7858_v27, %v2322_v23  ;;  %v2271_v58 = vmul.f32 0.17677669, %v7903_v48  ;;  %v2273_v27 = vmul.f32 0.17677669, %v7933_v24 }
 0x3cd   : > { %v2411_v41 = vmul.f32 1.442695, %v2382_v56  ;;  %v7998_v46 = vadd.f32 %v2271_v58, %v7388_v5 }
 0x3cf   : > { %6182 = vpow2.f32 %v2411_v41 }
 0x3d0   : > { %v7984_v30 = vpop.eup %6180 }
 0x3d1   : > { %2459 = vadd.xlane.f32.xlu0 %v2458_v47  ;;  %v2461_v20 = vsel %vm2304_vm8, %v7984_v30, 0.0  ;;  %v7995_v47 = vadd.f32 %v2279_v18, %v7388_v5 }
 0x3d3   : > { %2372 = vmax.xlane.f32.xlu2 %v2371_v39  ;;  %2366 = vmax.xlane.f32.xlu1 %v2365_v35  ;;  %v2374_v48 = vsel %vm2304_vm8, %v7995_v47, -inf  ;;  %v2350_v39 = vsel %vm2304_vm8, %v7998_v46, -inf  ;;  %v8006_v35 = vadd.f32 %v2273_v27, %v7388_v5 }
 0x3d5   : > { %v8008_v23 = vpop.eup %6182  ;;  %v2356_v18 = vsel %vm2304_vm8, %v8006_v35, -inf }
 0x3d6   : > { %v2464_v24 = vsel %vm2304_vm8, %v8008_v23, 0.0 }
 0x3d9   : > { %2354 = vmax.xlane.f32.xlu0 %v2353_v4 }
 0x3db   : > { %2462 = vadd.xlane.f32.xlu2 %v2461_v20  ;;  %2348 = vmax.xlane.f32.xlu1 %v2347_v34 }
 0x3e1   : > { %2375 = vmax.xlane.f32.xlu0 %v2374_v48 }
 0x3e3   : > { %2351 = vmax.xlane.f32.xlu1 %v2350_v39 }
 0x3e9   : > { %2357 = vmax.xlane.f32.xlu0 %v2356_v18 }
 0x3eb   : > { %2465 = vadd.xlane.f32.xlu1 %v2464_v24 }
 0x40e   : > { %v2325_v4 = vpop.xlane.xlu2 %2324 }
 0x40f   : > { %v2383_v56 = vsub.f32 %v7884_v17, %v2325_v4 }
 0x411   : > { %v2413_v58 = vmul.f32 1.442695, %v2383_v56 }
 0x413   : > { %6184 = vpow2.f32 %v2413_v58 }
 0x416   : > { %v2331_v20 = vpop.xlane.xlu2 %2330  ;;  %v2328_v34 = vpop.xlane.xlu1 %2327 }
 0x417   : > { %v2385_v5 = vsub.f32 %v7891_v51, %v2331_v20  ;;  %v2384_v41 = vsub.f32 %v7894_v52, %v2328_v34 }
 0x419   : > { %v8017_v27 = vpop.eup %6184  ;;  %v2417_v48 = vmul.f32 1.442695, %v2385_v5  ;;  %v2415_v39 = vmul.f32 1.442695, %v2384_v41 }
 0x41a   : > { %v2467_v18 = vsel %vm2304_vm8, %v8017_v27, 0.0 }
 0x41b   : > { %6186 = vpow2.f32 %v2417_v48  ;;  %2468 = vadd.xlane.f32.xlu2 %v2467_v18 }
 0x41c   : > { %6188 = vpow2.f32 %v2415_v39 }
 0x421   : > { %v8021_v24 = vpop.eup %6186 }
 0x422   : > { %v8023_v17 = vpop.eup %6188  ;;  %v2473_v4 = vsel %vm2304_vm8, %v8021_v24, 0.0 }
 0x423   : > { %2474 = vadd.xlane.f32.xlu2 %v2473_v4  ;;  %v2470_v51 = vsel %vm2304_vm8, %v8023_v17, 0.0 }
 0x424   : > { %2471 = vadd.xlane.f32.xlu1 %v2470_v51  ;;  %v2343_v52 = vpop.xlane.xlu0 %2342 }
 0x425   : > { %v2389_v58 = vsub.f32 %v7906_v28, %v2343_v52 }
 0x426   : > { %v2361_v56 = vpop.xlane.xlu2 %2360 }
 0x427   : > { %v2395_v20 = vsub.f32 %v7910_v60, %v2361_v56  ;;  %v2425_v5 = vmul.f32 1.442695, %v2389_v58 }
 0x429   : > { %v2437_v34 = vmul.f32 1.442695, %v2395_v20 }
 0x42b   : > { %6190 = vpow2.f32 %v2437_v34 }
 0x42c   : > { %v2334_v41 = vpop.xlane.xlu0 %2333  ;;  %6192 = vpow2.f32 %v2425_v5 }
 0x42d   : > { %v2386_v48 = vsub.f32 %v7918_v14, %v2334_v41 }
 0x42e   : > { %v2451_v39 = vpop.xlane.xlu2 %2450  ;;  %v2364_v18 = vpop.xlane.xlu1 %2363 }
 0x42f   : > { %v2419_v4 = vmul.f32 1.442695, %v2386_v48  ;;  %6194 = vrcp.f32 %v2451_v39  ;;  %v2396_v51 = vsub.f32 %v7923_v9, %v2364_v18 }
 0x431   : > { %v8032_v3 = vpop.eup %6190  ;;  %6196 = vpow2.f32 %v2419_v4  ;;  %v2439_v56 = vmul.f32 1.442695, %v2396_v51 }
 0x432   : > { %v2503_v28 = vsel %vm2304_vm8, %v8032_v3, 0.0  ;;  %v8037_v52 = vpop.eup %6192 }
 0x433   : > { %2504 = vadd.xlane.f32.xlu1 %v2503_v28  ;;  %v2485_v39 = vsel %vm2304_vm8, %v8037_v52, 0.0 }
 0x434   : > { %v2457_v60 = vpop.xlane.xlu0 %2456 }
 0x435   : > { %v6195_v58 = vpop.eup %6194 }
 0x436   : > { %v2346_v14 = vpop.xlane.xlu2 %2345  ;;  %v2454_v20 = vpop.xlane.xlu1 %2453  ;;  %v2545_v48 = vmul.f32 %v6195_v58, %v7920_v21 }
 0x437   : > { %v8039_v34 = vpop.eup %6196  ;;  %v2390_v5 = vsub.f32 %v7936_v36, %v2346_v14  ;;  %6198 = vrcp.f32 %v2454_v20 }
 0x438   : > { %v2476_v41 = vsel %vm2304_vm8, %v8039_v34, 0.0  ;;  %6200 = vpow2.f32 %v2439_v56  ;;  %v2569_v28 = vpack.c.bf16 %v2545_v48, %v2545_v48 }
 0x439   : > { %v2427_v9 = vmul.f32 1.442695, %v2390_v5  ;;  %2477 = vadd.xlane.f32.xlu0 %v2476_v41 }
 0x43b   : > { %6202 = vpow2.f32 %v2427_v9  ;;  %2486 = vadd.xlane.f32.xlu1 %v2485_v39 }
 0x43c   : > { %v2370_v18 = vpop.xlane.xlu0 %2369  ;;  %6204 = vrcp.f32 %v2457_v60 }
 0x43d   : > { %v6199_v4 = vpop.eup %6198  ;;  %v2398_v51 = vsub.f32 %v7949_v10, %v2370_v18  ;;  %v2620_v10 = vunpack.c.l.b16 %v2569_v28 }
 0x43e   : > { %v2546_v36 = vmul.f32 %v6199_v4, %v7938_v57  ;;  %v2337_v14 = vpop.xlane.xlu2 %2336  ;;  %v2340_v20 = vpop.xlane.xlu1 %2339 }
 0x43f   : > { %v8049_v12 = vpop.eup %6200  ;;  %v2443_v56 = vmul.f32 1.442695, %v2398_v51  ;;  %v2387_v21 = vsub.f32 %v7955_v44, %v2337_v14  ;;  %v2388_v58 = vsub.f32 %v7952_v54, %v2340_v20 }
 0x440   : > { %v2570_v5 = vpack.c.bf16 %v2546_v36, %v2546_v36  ;;  %v2506_v18 = vsel %vm2304_vm8, %v8049_v12, 0.0 }
 0x441   : > { %v8053_v41 = vpop.eup %6202  ;;  %6206 = vpow2.f32 %v2443_v56  ;;  %v2421_v9 = vmul.f32 1.442695, %v2387_v21  ;;  %v2423_v39 = vmul.f32 1.442695, %v2388_v58 }
 0x442   : > { %v2621_v48 = vunpack.c.l.b16 %v2570_v5  ;;  %v2488_v57 = vsel %vm2304_vm8, %v8053_v41, 0.0  ;;  %v6205_v60 = vpop.eup %6204 }
 0x443   : > { %6208 = vpow2.f32 %v2421_v9  ;;  %2489 = vadd.xlane.f32.xlu2 %v2488_v57  ;;  %2507 = vadd.xlane.f32.xlu1 %v2506_v18  ;;  %v2547_v36 = vmul.f32 %v6205_v60, %v7931_v7 }
 0x444   : > { %v2623_v44 = vpack.c.b16 %v2621_v48, %v2620_v10  ;;  %6210 = vpow2.f32 %v2423_v39  ;;  %v2460_v54 = vpop.xlane.xlu0 %2459 }
 0x445   : > { %6212 = vrcp.f32 %v2460_v54  ;;  %v8075_v9 = vpack.c.bf16 %v2547_v36, %v2547_v36 }
 0x446   : > { %v2373_v4 = vpop.xlane.xlu2 %2372  ;;  %5491 = vmatmul.msk.bf16.vlgmr.msrb.gmra.mxu2 %vm2304_vm8, %v2623_v44  ;;  %v8060_v51 = vpop.xlane.xlu1 %2366 }
 0x447   : > { %v8062_v28 = vpop.eup %6206  ;;  %v2622_v18 = vunpack.c.l.b16 %v8075_v9 }
 0x448   : > { %v2512_v21 = vsel %vm2304_vm8, %v8062_v28, 0.0 }
 0x449   : > { %v8065_v14 = vpop.eup %6208  ;;  %v2624_v54 = vpack.c.b16 %v2622_v18, %v2622_v18 }
 0x44a   : > { %v8067_v20 = vpop.eup %6210  ;;  %v2479_v56 = vsel %vm2304_vm8, %v8065_v14, 0.0 }
 0x44b   : > { %2480 = vadd.xlane.f32.xlu2 %v2479_v56  ;;  %2513 = vadd.xlane.f32.xlu1 %v2512_v21  ;;  %v2482_v58 = vsel %vm2304_vm8, %v8067_v20, 0.0  ;;  %v6213_v48 = vpop.eup %6212 }
 0x44c   : > { %2483 = vadd.xlane.f32.xlu0 %v2482_v58  ;;  %v2355_v5 = vpop.xlane.xlu0 %2354  ;;  %v2548_v44 = vmul.f32 %v6213_v48, %v7964_v22 }
 0x44d   : > { %v2393_v7 = vsub.f32 %v7979_v25, %v2355_v5 }
 0x44e   : > { %v2463_v39 = vpop.xlane.xlu2 %2462  ;;  %v2349_v10 = vpop.xlane.xlu1 %2348  ;;  %v2572_v56 = vpack.c.bf16 %v2548_v44, %v2548_v44 }
 0x44f   : > { %v2433_v57 = vmul.f32 1.442695, %v2393_v7  ;;  %6214 = vrcp.f32 %v2463_v39  ;;  %v2399_v39 = vsub.f32 %v7967_v19, %v2373_v4 }
 0x450   : > { %v2665_v22 = vunpack.c.l.b16 %v2572_v56 }
 0x451   : > { %6216 = vpow2.f32 %v2433_v57 }
 0x455   : > { %v6215_v60 = vpop.eup %6214 }
 0x456   : > { %v2549_v21 = vmul.f32 %v6215_v60, %v7984_v30  ;;  %5492 = vmatmul.msk.bf16.gmra.mxu2 %vm2304_vm8, %v2624_v54  ;;  %v2352_v36 = vpop.xlane.xlu1 %2351  ;;  %v2445_v30 = vmul.f32 1.442695, %v2399_v39 }
 0x457   : > { %v8082_v58 = vpop.eup %6216  ;;  %v2392_v25 = vsub.f32 %v7998_v46, %v2352_v36 }
 0x458   : > { %v2573_v5 = vpack.c.bf16 %v2549_v21, %v2549_v21  ;;  %v2497_v7 = vsel %vm2304_vm8, %v8082_v58, 0.0 }
 0x459   : > { %v2431_v57 = vmul.f32 1.442695, %v2392_v25  ;;  %2498 = vadd.xlane.f32.xlu1 %v2497_v7 }
 0x45a   : > { %v2666_v48 = vunpack.c.l.b16 %v2573_v5  ;;  %v2376_v5 = vpop.xlane.xlu0 %2375 }
 0x45b   : > { %6218 = vpow2.f32 %v2431_v57 }
 0x45c   : > { %v2668_v18 = vpack.c.b16 %v2666_v48, %v2665_v22  ;;  %v2391_v22 = vsub.f32 %v7982_v45, %v2349_v10 }
 0x45e   : > { %5493 = vmatmul.msk.bf16.vlgmr.msra.gmra.mxu3 %vm2304_vm8, %v2668_v18  ;;  %v2466_v44 = vpop.xlane.xlu1 %2465  ;;  %v2429_v18 = vmul.f32 1.442695, %v2391_v22 }
 0x45f   : > { %6220 = vrcp.f32 %v2466_v44  ;;  %v2400_v44 = vsub.f32 %v7995_v47, %v2376_v5 }
 0x460   : > { %6222 = vpow2.f32 %v2445_v30 }
 0x461   : > { %v8089_v54 = vpop.eup %6218 }
 0x462   : > { %v2494_v46 = vsel %vm2304_vm8, %v8089_v54, 0.0  ;;  %v2358_v7 = vpop.xlane.xlu0 %2357 }
 0x463   : > { %1877 = vrot.lane.b32.xlu2 %v7667_v26, %s6970_s14  ;;  %2495 = vadd.xlane.f32.xlu0 %v2494_v46 }
 0x465   : > { %v6221_v19 = vpop.eup %6220 }
 0x466   : > { %v2550_v4 = vmul.f32 %v6221_v19, %v8008_v23  ;;  %v8096_v60 = vpop.eup %6222  ;;  %v2394_v23 = vsub.f32 %v8006_v35, %v2358_v7  ;;  %v2447_v35 = vmul.f32 1.442695, %v2400_v44  ;;  %v2397_v19 = vsub.f32 %v7970_v55, %v8060_v51 }
 0x467   : > { %v2515_v21 = vsel %vm2304_vm8, %v8096_v60, 0.0 }
 0x468   : > { %v8098_v56 = vpack.c.bf16 %v2550_v4, %v2550_v4  ;;  %v2435_v39 = vmul.f32 1.442695, %v2394_v23  ;;  %v2441_v45 = vmul.f32 1.442695, %v2397_v19 }
 0x46a   : > { %v2667_v36 = vunpack.c.l.b16 %v8098_v56  ;;  %6224 = vpow2.f32 %v2435_v39 }
 0x46b   : > { %2516 = vadd.xlane.f32.xlu0 %v2515_v21  ;;  %6226 = vpow2.f32 %v2429_v18 }
 0x46c   : > { %v2669_v25 = vpack.c.b16 %v2667_v36, %v2667_v36 }
 0x46e   : > { %5494 = vmatmul.msk.bf16.gmra.mxu3 %vm2304_vm8, %v2669_v25 }
 0x470   : > { %v8109_v57 = vpop.eup %6224 }
 0x471   : > { %v2500_v48 = vsel %vm2304_vm8, %v8109_v57, 0.0  ;;  %v8115_v46 = vpop.eup %6226 }
 0x472   : > { %1871 = vrot.lane.b32.xlu1 %v7665_v49, %s6970_s14  ;;  %v2491_v36 = vsel %vm2304_vm8, %v8115_v46, 0.0 }
 0x47f   : > { %1875 = vrot.lane.b32.xlu0 %v7657_v61, %s6970_s14 }
 0x48c   : > { %2501 = vadd.xlane.f32.xlu2 %v2500_v48 }
 0x48e   : > { %v2469_v30 = vpop.xlane.xlu2 %2468 }
 0x48f   : > { %6228 = vrcp.f32 %v2469_v30 }
 0x495   : > { %v6229_v21 = vpop.eup %6228 }
 0x496   : > { %v2551_v10 = vmul.f32 %v6229_v21, %v8017_v27  ;;  %v2475_v25 = vpop.xlane.xlu2 %2474 }
 0x497   : > { %v2472_v4 = vpop.xlane.xlu1 %2471 }
 0x498   : > { %6230 = vrcp.f32 %v2472_v4  ;;  %v2575_v5 = vpack.c.bf16 %v2551_v10, %v2551_v10 }
 0x499   : > { %6232 = vpow2.f32 %v2447_v35 }
 0x49a   : > { %6234 = vpow2.f32 %v2441_v45  ;;  %v2709_v51 = vunpack.c.l.b16 %v2575_v5 }
 0x49b   : > { %6236 = vrcp.f32 %v2475_v25 }
 0x49c   : > { %2492 = vadd.xlane.f32.xlu1 %v2491_v36 }
 0x49e   : > { %v6231_v47 = vpop.eup %6230 }
 0x49f   : > { %v2552_v7 = vmul.f32 %v6231_v47, %v8023_v17  ;;  %v8123_v23 = vpop.eup %6232 }
 0x4a0   : > { %v2518_v22 = vsel %vm2304_vm8, %v8123_v23, 0.0  ;;  %v8127_v27 = vpop.eup %6234 }
 0x4a1   : > { %v2576_v55 = vpack.c.bf16 %v2552_v7, %v2552_v7  ;;  %v6237_v18 = vpop.eup %6236  ;;  %v2509_v17 = vsel %vm2304_vm8, %v8127_v27, 0.0 }
 0x4a2   : > { %v2553_v44 = vmul.f32 %v6237_v18, %v8021_v24 }
 0x4a3   : > { %v2710_v39 = vunpack.c.l.b16 %v2576_v55 }
 0x4a4   : > { %2519 = vadd.xlane.f32.xlu1 %v2518_v22  ;;  %v8133_v35 = vpack.c.bf16 %v2553_v44, %v2553_v44 }
 0x4a5   : > { %v2712_v48 = vpack.c.b16 %v2710_v39, %v2709_v51 }
 0x4a6   : > { %v2505_v30 = vpop.xlane.xlu1 %2504  ;;  %v2711_v4 = vunpack.c.l.b16 %v8133_v35 }
 0x4a7   : > { %5495 = vmatmul.msk.bf16.vlgmr.msrb.gmra.mxu0 %vm2304_vm8, %v2712_v48 }
 0x4a8   : > { %v2713_v21 = vpack.c.b16 %v2711_v4, %v2711_v4 }
 0x4a9   : > { %2510 = vadd.xlane.f32.xlu0 %v2509_v17 }
 0x4ac   : > { %v2478_v45 = vpop.xlane.xlu0 %2477 }
 0x4ae   : > { %v2487_v19 = vpop.xlane.xlu1 %2486 }
 0x4af   : > { %6238 = vrcp.f32 %v2487_v19 }
 0x4b5   : > { %v6239_v36 = vpop.eup %6238 }
 0x4b6   : > { %v2490_v10 = vpop.xlane.xlu2 %2489  ;;  %v2557_v25 = vmul.f32 %v6239_v36, %v8037_v52  ;;  %v2508_v47 = vpop.xlane.xlu1 %2507 }
 0x4b7   : > { %6240 = vrcp.f32 %v2490_v10  ;;  %5496 = vmatmul.msk.bf16.gmra.mxu0 %vm2304_vm8, %v2713_v21 }
 0x4b8   : > { %6242 = vrcp.f32 %v2478_v45  ;;  %v2581_v7 = vpack.c.bf16 %v2557_v25, %v2557_v25 }
 0x4ba   : > { %v2797_v48 = vunpack.c.l.b16 %v2581_v7 }
 0x4bd   : > { %v6241_v5 = vpop.eup %6240 }
 0x4be   : > { %v2558_v24 = vmul.f32 %v6241_v5, %v8053_v41  ;;  %v2481_v55 = vpop.xlane.xlu2 %2480  ;;  %v6243_v51 = vpop.eup %6242 }
 0x4bf   : > { %6244 = vrcp.f32 %v2481_v55  ;;  %v2554_v22 = vmul.f32 %v6243_v51, %v8039_v34  ;;  %v2484_v44 = vpop.xlane.xlu0 %2483  ;;  %v2514_v52 = vpop.xlane.xlu1 %2513 }
 0x4c0   : > { %v2582_v39 = vpack.c.bf16 %v2558_v24, %v2558_v24  ;;  %6246 = vrcp.f32 %v2484_v44 }
 0x4c1   : > { %v2578_v4 = vpack.c.bf16 %v2554_v22, %v2554_v22 }
 0x4c2   : > { %v2798_v18 = vunpack.c.l.b16 %v2582_v39 }
 0x4c3   : > { %v2753_v10 = vunpack.c.l.b16 %v2578_v4 }
 0x4c4   : > { %v2800_v17 = vpack.c.b16 %v2798_v18, %v2797_v48 }
 0x4c5   : > { %v6245_v19 = vpop.eup %6244 }
 0x4c6   : > { %v2555_v21 = vmul.f32 %v6245_v19, %v8065_v14  ;;  %5499 = vmatmul.msk.bf16.vlgmr.msra.gmra.mxu2 %vm2304_vm8, %v2800_v17  ;;  %v6247_v5 = vpop.eup %6246 }
 0x4c7   : > { %v2556_v7 = vmul.f32 %v6247_v5, %v8067_v20  ;;  %v2611_v5 = vpack.c.bf16 %v7900_v50, %v7900_v50 }
 0x4c8   : > { %v2579_v45 = vpack.c.bf16 %v2555_v21, %v2555_v21 }
 0x4c9   : > { %v8142_v41 = vpop.f32.mrf.mxu2  ;;  %v8148_v14 = vpack.c.bf16 %v2556_v7, %v2556_v7 }
 0x4ca   : > { %8986 = vst [vmem:[#allocation53_spill] sm:$0xff] %v8142_v41  ;;  %v2754_v36 = vunpack.c.l.b16 %v2579_v45 }
 0x4cb   : > { %v2755_v39 = vunpack.c.l.b16 %v8148_v14 }
 0x4cc   : > { %v2756_v25 = vpack.c.b16 %v2754_v36, %v2753_v10  ;;  %v2499_v34 = vpop.xlane.xlu1 %2498 }
 0x4cd   : > { %6248 = vrcp.f32 %v2499_v34  ;;  %v2757_v17 = vpack.c.b16 %v2755_v39, %v2755_v39 }
 0x4ce   : > { %5497 = vmatmul.msk.bf16.vlgmr.msrb.gmra.mxu1 %vm2304_vm8, %v2756_v25  ;;  %6250 = vrcp.f32 %v2508_v47 }
 0x4d1   : > { %v8146_v24 = vpop.f32.mrf.mxu2 }
 0x4d3   : > { %v6249_v51 = vpop.eup %6248 }
 0x4d4   : > { %v2561_v48 = vmul.f32 %v6249_v51, %v8082_v58  ;;  %v6251_v18 = vpop.eup %6250  ;;  %v2893_v51 = vunpack.c.l.b16 %v2611_v5 }
 0x4d5   : > { %v2564_v47 = vmul.f32 %v6251_v18, %v8049_v12 }
 0x4d6   : > { %v2496_v55 = vpop.xlane.xlu0 %2495  ;;  %v2585_v20 = vpack.c.bf16 %v2561_v48, %v2561_v48 }
 0x4d7   : > { %6252 = vrcp.f32 %v2496_v55  ;;  %v2588_v34 = vpack.c.bf16 %v2564_v47, %v2564_v47 }
 0x4d8   : > { %6254 = vrcp.f32 %v2505_v30  ;;  %v2842_v25 = vunpack.c.l.b16 %v2585_v20 }
 0x4d9   : > { %v8151_v22 = vpop.f32.mrf.mxu2 }
 0x4da   : > { %8987 = vst [vmem:[#allocation54_spill] sm:$0xff] %v8151_v22 }
 0x4dd   : > { %v6253_v44 = vpop.eup %6252 }
 0x4de   : > { %v2560_v19 = vmul.f32 %v6253_v44, %v8089_v54  ;;  %5498 = vmatmul.msk.bf16.gmra.mxu1 %vm2304_vm8, %v2757_v17  ;;  %v6255_v4 = vpop.eup %6254  ;;  %v2517_v45 = vpop.xlane.xlu0 %2516 }
 0x4df   : > { %v2563_v30 = vmul.f32 %v6255_v4, %v8032_v3  ;;  %6256 = vrcp.f32 %v2517_v45  ;;  %v2886_v3 = vunpack.c.l.b16 %v2588_v34  ;;  %v8169_v4 = vpop.permute.xlu2 %1877 }
 0x4e0   : > { %v2584_v21 = vpack.c.bf16 %v2560_v19, %v2560_v19  ;;  %6258 = vrcp.f32 %v2514_v52 }
 0x4e1   : > { %v2660_v10 = vpop.f32.mrf.mxu2  ;;  %v8157_v36 = vpop.f32.mrf.mxu3  ;;  %v2587_v55 = vpack.c.bf16 %v2563_v30, %v2563_v30 }
 0x4e2   : > { %8988 = vst [vmem:[#allocation55_spill] sm:$0xff] %v8157_v36  ;;  %v2841_v58 = vunpack.c.l.b16 %v2584_v21  ;;  %v2615_v21 = vpack.c.bf16 %v8169_v4, %v8169_v4 }
 0x4e3   : > { %v2885_v44 = vunpack.c.l.b16 %v2587_v55 }
 0x4e4   : > { %v2844_v7 = vpack.c.b16 %v2842_v25, %v2841_v58  ;;  %v8162_v54 = vpop.permute.xlu1 %1871  ;;  %v2938_v5 = vunpack.c.l.b16 %v2615_v21 }
 0x4e5   : > { %v2612_v12 = vpack.c.bf16 %v8162_v54, %v8162_v54  ;;  %v6257_v17 = vpop.eup %6256  ;;  %v2888_v19 = vpack.c.b16 %v2886_v3, %v2885_v44 }
 0x4e6   : > { %5501 = vmatmul.msk.bf16.vlgmr.msrb.gmra.mxu3 %vm2304_vm8, %v2844_v7  ;;  %v6259_v20 = vpop.eup %6258  ;;  %v2567_v47 = vmul.f32 %v6257_v17, %v8096_v60 }
 0x4e7   : > { %v2894_v39 = vunpack.c.l.b16 %v2612_v12  ;;  %v2566_v52 = vmul.f32 %v6259_v20, %v8062_v28 }
 0x4e8   : > { %v2591_v45 = vpack.c.bf16 %v2567_v47, %v2567_v47 }
 0x4e9   : > { %v2896_v48 = vpack.c.b16 %v2894_v39, %v2893_v51  ;;  %v8167_v18 = vpop.f32.mrf.mxu3  ;;  %v2590_v58 = vpack.c.bf16 %v2566_v52, %v2566_v52 }
 0x4ea   : > { %8989 = vst [vmem:[#allocation56_spill] sm:$0xff] %v8167_v18  ;;  %v2930_v7 = vunpack.c.l.b16 %v2591_v45 }
 0x4eb   : > { %2915 = vmatpush.bf16.msra.mxu0 %v2896_v48  ;;  %v2929_v12 = vunpack.c.l.b16 %v2590_v58 }
 0x4ed   : > { %v2932_v55 = vpack.c.b16 %v2930_v7, %v2929_v12 }
 0x4ee   : > { %5503 = vmatmul.msk.bf16.vlgmr.msra.gmra.mxu0 %vm2304_vm8, %v2888_v19 }
 0x4f1   : > { %v8176_v10 = vpop.permute.xlu0 %1875  ;;  %v8178_v30 = vpop.f32.mrf.mxu3 }
 0x4f2   : > { %8990 = vst [vmem:[#allocation57_spill] sm:$0xff] %v8178_v30  ;;  %v2614_v25 = vpack.c.bf16 %v8176_v10, %v8176_v10 }
 0x4f4   : > { %v2937_v34 = vunpack.c.l.b16 %v2614_v25 }
 0x4f6   : > { %v2940_v60 = vpack.c.b16 %v2938_v5, %v2937_v34 }
 0x4f8   : > { %2959 = vmatpush.bf16.msra.mxu1 %v2940_v60 }
 0x4f9   : > { %v2704_v28 = vpop.f32.mrf.mxu3 }
 0x4fb   : > { %5505 = vmatmul.msk.bf16.vlgmr.msra.gmra.mxu1 %vm2304_vm8, %v2932_v55 }
 0x4ff   : > { %v2502_v51 = vpop.xlane.xlu2 %2501 }
 0x500   : > { %6260 = vrcp.f32 %v2502_v51 }
 0x506   : > { %v6261_v39 = vpop.eup %6260 }
 0x507   : > { %v2562_v3 = vmul.f32 %v6261_v39, %v8109_v57 }
 0x509   : > { %v8184_v48 = vpack.c.bf16 %v2562_v3, %v2562_v3 }
 0x50b   : > { %v2843_v17 = vunpack.c.l.b16 %v8184_v48 }
 0x50d   : > { %v2845_v44 = vpack.c.b16 %v2843_v17, %v2843_v17 }
 0x50f   : > { %v2493_v20 = vpop.xlane.xlu1 %2492  ;;  %5502 = vmatmul.msk.bf16.gmra.mxu3 %vm2304_vm8, %v2845_v44 }
 0x510   : > { %6262 = vrcp.f32 %v2493_v20 }
 0x516   : > { %v6263_v19 = vpop.eup %6262 }
 0x517   : > { %v2520_v47 = vpop.xlane.xlu1 %2519  ;;  %v2559_v52 = vmul.f32 %v6263_v19, %v8115_v46 }
 0x518   : > { %6264 = vrcp.f32 %v2520_v47 }
 0x519   : > { %v8189_v21 = vpack.c.bf16 %v2559_v52, %v2559_v52 }
 0x51b   : > { %v2799_v45 = vunpack.c.l.b16 %v8189_v21 }
 0x51c   : > { %v2511_v25 = vpop.xlane.xlu0 %2510 }
 0x51d   : > { %6266 = vrcp.f32 %v2511_v25  ;;  %v2801_v57 = vpack.c.b16 %v2799_v45, %v2799_v45 }
 0x51e   : > { %v6265_v58 = vpop.eup %6264 }
 0x51f   : > { %5500 = vmatmul.msk.bf16.gmra.mxu2 %vm2304_vm8, %v2801_v57  ;;  %v2568_v5 = vmul.f32 %v6265_v58, %v8123_v23 }
 0x521   : > { %v8194_v34 = vpack.c.bf16 %v2568_v5, %v2568_v5 }
 0x523   : > { %v6267_v7 = vpop.eup %6266  ;;  %v2931_v60 = vunpack.c.l.b16 %v8194_v34 }
 0x524   : > { %v8197_v12 = vpop.f32.mrf.mxu0  ;;  %v2565_v46 = vmul.f32 %v6267_v7, %v8127_v27 }
 0x525   : > { %v2933_v55 = vpack.c.b16 %v2931_v60, %v2931_v60 }
 0x526   : > { %v8200_v28 = vpack.c.bf16 %v2565_v46, %v2565_v46 }
 0x527   : > { %5506 = vmatmul.msk.bf16.gmra.mxu1 %vm2304_vm8, %v2933_v55 }
 0x528   : > { %v2887_v51 = vunpack.c.l.b16 %v8200_v28 }
 0x52a   : > { %v2889_v39 = vpack.c.b16 %v2887_v51, %v2887_v51 }
 0x52c   : > { %v8204_v3 = vpop.f32.mrf.mxu0  ;;  %5504 = vmatmul.msk.bf16.gmra.mxu0 %vm2304_vm8, %v2889_v39 }
 0x534   : > { %v8207_v23 = vpop.f32.mrf.mxu0 }
 0x535   : > { %8991 = vst [vmem:[#allocation58_spill] sm:$0xff] %v8207_v23 }
 0x53c   : > { %v2748_v17 = vpop.f32.mrf.mxu0 }
 0x549   : > { %v8209_v44 = vpop.f32.mrf.mxu2 }
 0x54b   : > { %v8211_v20 = vpop.f32.mrf.mxu1 }
 0x54c   : > { %8992 = vst [vmem:[#allocation59_spill] sm:$0xff] %v8211_v20 }
 0x551   : > { %v8213_v27 = vpop.f32.mrf.mxu2 }
 0x553   : > { %v8215_v19 = vpop.f32.mrf.mxu1 }
 0x554   : > { %8993 = vst [vmem:[#allocation60_spill] sm:$0xff] %v8215_v19 }
 0x55b   : > { %v8217_v47 = vpop.f32.mrf.mxu1 }
 0x55c   : > { %8994 = vst [vmem:[#allocation61_spill] sm:$0xff] %v8217_v47 }
 0x563   : > { %v2792_v52 = vpop.f32.mrf.mxu1 }
 0x569   : > { %v8219_v45 = vpop.f32.mrf.mxu3 }
 0x56a   : > { %8995 = vst [vmem:[#allocation62_spill] sm:$0xff] %v8219_v45 }
 0x56b   : > { %v8221_v25 = vpop.f32.mrf.mxu0 }
 0x571   : > { %v8223_v57 = vpop.f32.mrf.mxu3 }
 0x572   : > { %8996 = vst [vmem:[#allocation63_spill] sm:$0xff] %v8223_v57 }
 0x573   : > { %v8225_v58 = vpop.f32.mrf.mxu0 }
 0x578   : > { %v8227_v5 = vpop.f32.mrf.mxu1 }
 0x579   : > { %8997 = vst [vmem:[#allocation64_spill] sm:$0xff] %v8227_v5 }
 0x580   : > { %v8229_v7 = vpop.f32.mrf.mxu1 }
 0x581   : > { %8998 = vst [vmem:[#allocation65_spill] sm:$0xff] %v8229_v7 }
 0x592   : > { %v8231_v60 = vpop.f32.mrf.mxu3 }
 0x593   : > { %8999 = vst [vmem:[#allocation66_spill] sm:$0xff] %v8231_v60 }
 0x59a   : > { %v2880_v46 = vpop.f32.mrf.mxu3 }
 0x5a2   : > { %v8233_v55 = vpop.f32.mrf.mxu2 }
 0x5a3   : > { %9000 = vst [vmem:[#allocation67_spill] sm:$0xff] %v8233_v55 }
 0x5a4   : > { %v8235_v51 = vpop.f32.mrf.mxu1 }
 0x5a5   : > { %9001 = vst [vmem:[#allocation68_spill] sm:$0xff] %v8235_v51 }
 0x5a9   : > { %v8237_v39 = vpop.f32.mrf.mxu0 }
 0x5aa   : > { %9002 = vst [vmem:[#allocation69_spill] sm:$0xff] %v8237_v39  ;;  %v2836_v17 = vpop.f32.mrf.mxu2 }
 0x5ac   : > { %v2968_v52 = vpop.f32.mrf.mxu1 }
 0x5ad   : > { %2973 = sbr.rel (%p5507_p6) target bundleno = 2251 (0x8cb), region = 172 }
 0x5b1   : > { %v2924_v30 = vpop.f32.mrf.mxu0 }
 0x5b2   : > { %v5810_v18 = vld [vmem:[%s9004_s20 + $0x38] sm:$0xff]  ;;  %v5809_v46 = vld [vmem:[%s9004_s20 + $0x30] sm:$0xff]  ;;  %v5808_v30 = vld [vmem:[%s9004_s20 + $0x28] sm:$0xff]  ;;  %v2974_v36 = vpack.c.bf16 %v7589_v53, %v7587_v1 }
 0x5b3   : > { %3045 = vmatpush.bf16.msra.mxu0 %v5810_v18  ;;  %5871 = vmatpush.bf16.msra.mxu3 %v5810_v18  ;;  %v5807_v17 = vld [vmem:[%s9004_s20 + $0x20] sm:$0xff]  ;;  %v5806_v18 = vld [vmem:[%s9004_s20 + $0x18] sm:$0xff]  ;;  %v5813_v1 = vld [vmem:[%s9005_s15 + $0x10] sm:$0xff] }
 0x5b4   : > { %v5818_v52 = vld [vmem:[%s9005_s15 + $0x38] sm:$0xff]  ;;  %v5812_v53 = vld [vmem:[%s9005_s15 + $0x8] sm:$0xff] }
 0x5b5   : > { %3146 = vmatpush.bf16.msra.mxu1 %v5818_v52  ;;  %v5803_v52 = vld [vmem:[%s9004_s20] sm:$0xff] }
 0x5b7   : > { %3046 = vmatpush.bf16.msra.mxu0 %v5809_v46  ;;  %5872 = vmatpush.bf16.msra.mxu3 %v5809_v46  ;;  %v5805_v46 = vld [vmem:[%s9004_s20 + $0x10] sm:$0xff] }
 0x5bb   : > { %3047 = vmatpush.bf16.msra.mxu0 %v5808_v30  ;;  %5873 = vmatpush.bf16.msra.mxu3 %v5808_v30  ;;  %v5817_v30 = vld [vmem:[%s9005_s15 + $0x30] sm:$0xff] }
 0x5bc   : > { %3147 = vmatpush.bf16.msra.mxu1 %v5817_v30  ;;  %v2975_v30 = vpack.c.bf16 %v7607_v29, %v7597_v6  ;;  %v5811_v6 = vld [vmem:[%s9005_s15] sm:$0xff] }
 0x5bf   : > { %3048 = vmatpush.bf16.msra.mxu0 %v5807_v17  ;;  %5874 = vmatpush.bf16.msra.mxu3 %v5807_v17  ;;  %v5804_v17 = vld [vmem:[%s9004_s20 + $0x8] sm:$0xff] }
 0x5c3   : > { %3049 = vmatpush.bf16.msra.mxu0 %v5806_v18  ;;  %5875 = vmatpush.bf16.msra.mxu3 %v5806_v18  ;;  %v5816_v18 = vld [vmem:[%s9005_s15 + $0x28] sm:$0xff] }
 0x5c4   : > { %3148 = vmatpush.bf16.msra.mxu1 %v5816_v18  ;;  %v5814_v18 = vld [vmem:[%s9005_s15 + $0x18] sm:$0xff] }
 0x5c7   : > { %3050 = vmatpush.bf16.msra.mxu0 %v5805_v46  ;;  %5876 = vmatpush.bf16.msra.mxu3 %v5805_v46  ;;  %v5815_v46 = vld [vmem:[%s9005_s15 + $0x20] sm:$0xff] }
 0x5c8   : > { %3149 = vmatpush.bf16.msra.mxu1 %v5815_v46 }
 0x5cb   : > { %3051 = vmatpush.bf16.msra.mxu0 %v5804_v17  ;;  %5877 = vmatpush.bf16.msra.mxu3 %v5804_v17  ;;  %v2976_v17 = vpack.c.bf16 %v7615_v43, %v7609_v31  ;;  %v6291_v31 = vld [vmem:[#allocation21] ss:$0 sm:$0xff] }
 0x5cc   : > { %3150 = vmatpush.bf16.msra.mxu1 %v5814_v18 }
 0x5cf   : > { %3052 = vmatpush.bf16.msra.mxu0 %v5803_v52  ;;  %5878 = vmatpush.bf16.msra.mxu3 %v5803_v52 }
 0x5d0   : > { %3151 = vmatpush.bf16.msra.mxu1 %v5813_v1 }
 0x5d2   : > { %3053 = vmatmul.bf16.vlgmr.msra.gmra.mxu0 %v2974_v36  ;;  %3058 = vmatmul.bf16.vlgmr.msra.gmra.mxu3 %v2975_v30 }
 0x5d4   : > { %3152 = vmatpush.bf16.msra.mxu1 %v5812_v53  ;;  %v5826_v53 = vld [vmem:[%s9006_s24 + $0x38] sm:$0xff] }
 0x5d5   : > { %3247 = vmatpush.bf16.msra.mxu2 %v5826_v53 }
 0x5d8   : > { %3153 = vmatpush.bf16.msra.mxu1 %v5811_v6  ;;  %v5825_v6 = vld [vmem:[%s9007_s28 + $0x30] sm:$0xff] }
 0x5d9   : > { %3248 = vmatpush.bf16.msra.mxu2 %v5825_v6 }
 0x5e2   : > { %3063 = vmatmul.bf16.gmra.mxu3 %v2976_v17 }
 0x64f   : > { %v3054_v29 = vpop.f32.mrf.mxu0 }
 0x650   : > { %v3055_v36 = vadd.f32 %v6291_v31, %v3054_v29  ;;  %v5824_v29 = vld [vmem:[%s9007_s28 + $0x28] sm:$0xff] }
 0x651   : > { %3249 = vmatpush.bf16.msra.mxu2 %v5824_v29  ;;  %v5820_v29 = vld [vmem:[%s9007_s28 + $0x8] sm:$0xff] }
 0x652   : > { %v3069_v30 = vmax.f32 %v3055_v36, 0.0 }
 0x655   : > { %v3059_v43 = vpop.f32.mrf.mxu3 }
 0x656   : > { %v3060_v22 = vadd.f32 %v6291_v31, %v3059_v43 }
 0x657   : > { %v3056_v52 = vpop.f32.mrf.mxu0 }
 0x658   : > { %v3057_v46 = vadd.f32 %v6291_v31, %v3056_v52  ;;  %v3071_v52 = vmax.f32 %v3060_v22, 0.0  ;;  %v5822_v22 = vld [vmem:[%s9007_s28 + $0x18] sm:$0xff] }
 0x65a   : > { %v3070_v17 = vmax.f32 %v3057_v46, 0.0 }
 0x65c   : > { %v3075_v18 = vpack.c.bf16 %v3070_v17, %v3069_v30  ;;  %v5823_v30 = vld [vmem:[%s9007_s28 + $0x20] sm:$0xff] }
 0x65d   : > { %v3061_v1 = vpop.f32.mrf.mxu3  ;;  %3250 = vmatpush.bf16.msra.mxu2 %v5823_v30 }
 0x65e   : > { %3154 = vmatmul.bf16.vlgmr.msra.gmra.mxu1 %v3075_v18  ;;  %v3062_v57 = vadd.f32 %v6291_v31, %v3061_v1 }
 0x660   : > { %v3072_v46 = vmax.f32 %v3062_v57, 0.0  ;;  %v5821_v57 = vld [vmem:[%s9007_s28 + $0x10] sm:$0xff] }
 0x661   : > { %3251 = vmatpush.bf16.msra.mxu2 %v5822_v22 }
 0x662   : > { %v3076_v17 = vpack.c.bf16 %v3072_v46, %v3071_v52 }
 0x665   : > { %v3064_v36 = vpop.f32.mrf.mxu3  ;;  %3252 = vmatpush.bf16.msra.mxu2 %v5821_v57 }
 0x666   : > { %v3065_v53 = vadd.f32 %v6291_v31, %v3064_v36  ;;  %v6292_v36 = vld [vmem:[#allocation23] ss:$0 sm:$0xff] }
 0x668   : > { %v3073_v1 = vmax.f32 %v3065_v53, 0.0 }
 0x669   : > { %3253 = vmatpush.bf16.msra.mxu2 %v5820_v29 }
 0x66d   : > { %v3066_v18 = vpop.f32.mrf.mxu3 }
 0x66e   : > { %3159 = vmatmul.bf16.gmra.mxu1 %v3076_v17  ;;  %v3067_v43 = vadd.f32 %v6291_v31, %v3066_v18  ;;  %v5819_v31 = vld [vmem:[%s9007_s28] sm:$0xff] }
 0x66f   : > { %3254 = vmatpush.bf16.msra.mxu2 %v5819_v31 }
 0x670   : > { %v3074_v6 = vmax.f32 %v3067_v43, 0.0 }
 0x672   : > { %v3077_v60 = vpack.c.bf16 %v3074_v6, %v3073_v1 }
 0x67e   : > { %3164 = vmatmul.bf16.gmra.mxu1 %v3077_v60 }
 0x6db   : > { %v3155_v60 = vpop.f32.mrf.mxu1 }
 0x6dc   : > { %v3156_v52 = vadd.f32 %v6292_v36, %v3155_v60 }
 0x6de   : > { %v3170_v17 = vmax.f32 %v3156_v52, 0.0  ;;  %v8320_v52 = vld [vmem:[#allocation24] ss:$0 sm:$0xff] }
 0x6e3   : > { %v3157_v46 = vpop.f32.mrf.mxu1 }
 0x6e4   : > { %v3158_v30 = vadd.f32 %v6292_v36, %v3157_v46 }
 0x6e6   : > { %v3171_v18 = vmax.f32 %v3158_v30, 0.0 }
 0x6e8   : > { %v3176_v53 = vpack.c.bf16 %v3171_v18, %v3170_v17  ;;  %v6971_v18 = vmov 0  }
 0x6e9   : > { %6268 = vset.pattern.permute.xlu2 %v6971_v18  ;;  %6280 = vset.pattern.permute.xlu1 %v6971_v18 }
 0x6ea   : > { %3255 = vmatmul.bf16.vlgmr.msra.gmra.mxu2 %v3176_v53  ;;  %6279 = vset.pattern.permute.xlu0 %v6971_v18 }
 0x6eb   : > { %v3160_v43 = vpop.f32.mrf.mxu1 }
 0x6ec   : > { %v3161_v1 = vadd.f32 %v6292_v36, %v3160_v43  ;;  %v8903_v43 = vmov 1.0|1.0  }
 0x6ed   : > { %6270 = vperm.xlu2 %6268, %v8903_v43  }
 0x6ee   : > { %v3172_v57 = vmax.f32 %v3161_v1, 0.0 }
 0x6f3   : > { %v3162_v6 = vpop.f32.mrf.mxu1 }
 0x6f4   : > { %v3163_v22 = vadd.f32 %v6292_v36, %v3162_v6 }
 0x6f5   : > { %6275 = vperm.xlu2 %6268, %v8903_v43  }
 0x6f6   : > { %v3173_v29 = vmax.f32 %v3163_v22, 0.0  ;;  %v6973_v22 = vmov 0.6931472  }
 0x6f8   : > { %v3177_v7 = vpack.c.bf16 %v3173_v29, %v3172_v57 }
 0x6fa   : > { %3260 = vmatmul.bf16.gmra.mxu2 %v3177_v7 }
 0x6fb   : > { %v3165_v51 = vpop.f32.mrf.mxu1 }
 0x6fc   : > { %v3166_v5 = vadd.f32 %v6292_v36, %v3165_v51 }
 0x6fe   : > { %v3174_v39 = vmax.f32 %v3166_v5, 0.0 }
 0x703   : > { %v3167_v31 = vpop.f32.mrf.mxu1 }
 0x704   : > { %v3168_v45 = vadd.f32 %v6292_v36, %v3167_v31 }
 0x706   : > { %v3175_v60 = vmax.f32 %v3168_v45, 0.0 }
 0x708   : > { %v3178_v55 = vpack.c.bf16 %v3175_v60, %v3174_v39 }
 0x70a   : > { %3265 = vmatmul.bf16.gmra.mxu2 %v3178_v55 }
 0x76d   : > { %v3256_v46 = vpop.f32.mrf.mxu2 }
 0x76e   : > { %v3257_v30 = vadd.f32 %v8320_v52, %v3256_v46 }
 0x770   : > { %v3271_v17 = vsub.f32 0.0, %v3257_v30 }
 0x772   : > { %v3277_v53 = vmul.f32 1.442695, %v3271_v17 }
 0x774   : > { %6294 = vpow2.f32 %v3277_v53 }
 0x775   : > { %v3258_v5 = vpop.f32.mrf.mxu2 }
 0x776   : > { %v3259_v45 = vadd.f32 %v8320_v52, %v3258_v5 }
 0x778   : > { %v3272_v7 = vsub.f32 0.0, %v3259_v45 }
 0x77a   : > { %v6295_v55 = vpop.eup %6294  ;;  %v3279_v51 = vmul.f32 1.442695, %v3272_v7 }
 0x77b   : > { %v3289_v39 = vadd.f32 1.0, %v6295_v55 }
 0x77c   : > { %6296 = vpow2.f32 %v3279_v51 }
 0x77d   : > { %6298 = vrcp.f32 %v3289_v39  ;;  %v3261_v36 = vpop.f32.mrf.mxu2  ;;  %v3306_v45 = vand.u32 2147483648, %v3289_v39  ;;  %v3304_v55 = vand.u32 2147483647, %v3289_v39  ;;  %vm3300_vm11 = vweird.f32 %v3289_v39 }
 0x77e   : > { %v3262_v1 = vadd.f32 %v8320_v52, %v3261_v36  ;;  %6300 = vrcp.f32 %v6973_v22 }
 0x77f   : > { %vm3305_vm13 = vcmp.eq.f32.partialorder %v3304_v55, 8.507059e+37 }
 0x780   : > { %v3273_v6 = vsub.f32 0.0, %v3262_v1 }
 0x782   : > { %v6297_v57 = vpop.eup %6296  ;;  %v3281_v29 = vmul.f32 1.442695, %v3273_v6 }
 0x783   : > { %v6299_v31 = vpop.eup %6298  ;;  %v3290_v60 = vadd.f32 1.0, %v6297_v57 }
 0x784   : > { %v3296_v46 = vmul.f32 %v6299_v31, %v3289_v39  ;;  %6302 = vpow2.f32 %v3281_v29  ;;  %v8327_v17 = vpop.eup %6300  ;;  %vm3301_vm10 = vweird.f32 %v6299_v31  ;;  %v3307_v29 = vor.u32 1.1754944e-38, %v3306_v45 }
 0x785   : > { %6304 = vrcp.f32 %v3290_v60  ;;  %v3263_v30 = vpop.f32.mrf.mxu2  ;;  %v3416_v51 = vmul.f32 0.6931472, %v8327_v17  ;;  %vm3302_vm12 = vmor %vm3300_vm11, %vm3301_vm10  ;;  %v3321_v39 = vand.u32 2147483648, %v3290_v60  ;;  %v3319_v55 = vand.u32 2147483647, %v3290_v60 }
 0x786   : > { %v3297_v18 = vsub.f32 1.0, %v3296_v46  ;;  %v3264_v53 = vadd.f32 %v8320_v52, %v3263_v30  ;;  %vm3315_vm15 = vweird.f32 %v3290_v60  ;;  %vm3420_vm3 = vweird.f32 %v8327_v17 }
 0x787   : > { %vm3320_vm2 = vcmp.eq.f32.partialorder %v3319_v55, 8.507059e+37 }
 0x788   : > { %v3298_v5 = vmul.f32 %v6299_v31, %v3297_v18  ;;  %v3274_v7 = vsub.f32 0.0, %v3264_v53  ;;  %v3417_v53 = vsub.f32 1.0, %v3416_v51 }
 0x78a   : > { %v6303_v36 = vpop.eup %6302  ;;  %v3299_v1 = vadd.f32 %v6299_v31, %v3298_v5  ;;  %v3283_v6 = vmul.f32 1.442695, %v3274_v7 }
 0x78b   : > { %v6305_v22 = vpop.eup %6304  ;;  %v8331_v57 = vadd.f32 1.0, %v6303_v36 }
 0x78c   : > { %v3311_v46 = vmul.f32 %v6305_v22, %v3290_v60  ;;  %6306 = vpow2.f32 %v3283_v6  ;;  %v3303_v30 = vsel %vm3302_vm12, %v6299_v31, %v3299_v1  ;;  %vm3316_vm14 = vweird.f32 %v6305_v22 }
 0x78d   : > { %6308 = vrcp.f32 %v8331_v57  ;;  %v3266_v18 = vpop.f32.mrf.mxu2  ;;  %v8335_v5 = vsel %vm3305_vm13, %v3307_v29, %v3303_v30  ;;  %v3418_v1 = vmul.f32 %v8327_v17, %v3417_v53  ;;  %vm3317_vm0 = vmor %vm3315_vm15, %vm3316_vm14  ;;  %vm3330_vm5 = vweird.f32 %v8331_v57 }
 0x78e   : > { %v3312_v43 = vsub.f32 1.0, %v3311_v46  ;;  %v3267_v19 = vadd.f32 %v8320_v52, %v3266_v18  ;;  %v3397_v7 = vadd.f32 1e-10, %v8335_v5  ;;  %3385 = vst [vmem:[%s7407_s19] sm:$0xff] %v8335_v5  ;;  %v8905_v31 = vsub.f32 1.0, %v8335_v5 }
 0x78f   : > { %v3419_v60 = vadd.f32 %v8327_v17, %v3418_v1 }
 0x790   : > { %v3313_v36 = vmul.f32 %v6305_v22, %v3312_v43  ;;  %v3275_v45 = vsub.f32 0.0, %v3267_v19  ;;  %6310 = vlog2.f32 %v3397_v7  ;;  %v3440_v29 = vadd.f32 1e-10, %v8905_v31 }
 0x791   : > { %v3322_v43 = vor.u32 1.1754944e-38, %v3321_v39  ;;  %v3334_v39 = vand.u32 2147483647, %v8331_v57  ;;  %v3336_v31 = vand.u32 2147483648, %v8331_v57 }
 0x792   : > { %v6307_v51 = vpop.eup %6306  ;;  %v3314_v6 = vadd.f32 %v6305_v22, %v3313_v36  ;;  %v3285_v46 = vmul.f32 1.442695, %v3275_v45 }
 0x793   : > { %v6309_v30 = vpop.eup %6308  ;;  %v8344_v18 = vadd.f32 1.0, %v6307_v51  ;;  %vm3335_vm10 = vcmp.eq.f32.partialorder %v3334_v39, 8.507059e+37 }
 0x794   : > { %v3326_v19 = vmul.f32 %v6309_v30, %v8331_v57  ;;  %6312 = vpow2.f32 %v3285_v46  ;;  %v3318_v47 = vsel %vm3317_vm0, %v6305_v22, %v3314_v6  ;;  %vm3331_vm4 = vweird.f32 %v6309_v30 }
 0x795   : > { %6314 = vrcp.f32 %v8344_v18  ;;  %v3268_v53 = vpop.f32.mrf.mxu2  ;;  %v8350_v45 = vsel %vm3320_vm2, %v3322_v43, %v3318_v47  ;;  %vm3332_vm6 = vmor %vm3330_vm5, %vm3331_vm4  ;;  %v3351_v39 = vand.u32 2147483648, %v8344_v18  ;;  %vm3345_vm12 = vweird.f32 %v8344_v18 }
 0x796   : > { %v3327_v7 = vsub.f32 1.0, %v3326_v19  ;;  %v3269_v36 = vadd.f32 %v8320_v52, %v3268_v53  ;;  %6316 = vlog2.f32 %v3440_v29  ;;  %v6311_v51 = vpop.eup %6310  ;;  %v3398_v22 = vadd.f32 1e-10, %v8350_v45  ;;  %3386 = vst [vmem:[%s7407_s19 + $0x8] sm:$0xff] %v8350_v45 }
 0x797   : > { %v8906_v6 = vsub.f32 1.0, %v8350_v45  ;;  %v3404_v29 = vmul.f32 0.6931472, %v6311_v51  ;;  %v3337_v19 = vor.u32 1.1754944e-38, %v3336_v31  ;;  %v9011_v23 = vsub.f32 1.0, %v8350_v45 }
 0x798   : > { %v3328_v55 = vmul.f32 %v6309_v30, %v3327_v7  ;;  %v3276_v1 = vsub.f32 0.0, %v3269_v36  ;;  %6318 = vlog2.f32 %v3398_v22  ;;  %v8365_v7 = vsel %vm3420_vm3, %v8327_v17, %v3419_v60 }
 0x799   : > { %v3441_v36 = vadd.f32 1e-10, %v8906_v6  ;;  %v3391_v60 = vsub.f32 0.0, %v8335_v5 }
 0x79a   : > { %v6313_v52 = vpop.eup %6312  ;;  %v3329_v47 = vadd.f32 %v6309_v30, %v3328_v55  ;;  %v3287_v46 = vmul.f32 1.442695, %v3276_v1  ;;  %v3422_v1 = vmul.f32 %v8365_v7, %v3404_v29 }
 0x79b   : > { %v6315_v43 = vpop.eup %6314  ;;  %v8360_v53 = vadd.f32 1.0, %v6313_v52 }
 0x79c   : > { %v6317_v22 = vpop.eup %6316  ;;  %v3333_v55 = vsel %vm3332_vm6, %v6309_v30, %v3329_v47  ;;  %v3341_v57 = vmul.f32 %v6315_v43, %v8344_v18  ;;  %6320 = vpow2.f32 %v3287_v46  ;;  %vm3346_vm11 = vweird.f32 %v6315_v43 }
 0x79d   : > { %v3338_v51 = vsel %vm3335_vm10, %v3337_v19, %v3333_v55  ;;  %6322 = vrcp.f32 %v8360_v53  ;;  %v3447_v52 = vmul.f32 0.6931472, %v6317_v22  ;;  %v3349_v30 = vand.u32 2147483647, %v8344_v18  ;;  %vm8383_vm13 = vmor %vm3345_vm12, %vm3346_vm11 }
 0x79e   : > { %3387 = vst [vmem:[%s7407_s19 + $0x10] sm:$0xff] %v3338_v51  ;;  %v3342_v31 = vsub.f32 1.0, %v3341_v57  ;;  %v6319_v20 = vpop.eup %6318  ;;  %6324 = vlog2.f32 %v3441_v36  ;;  %v3428_v19 = vmul.f32 %v3422_v1, %v3391_v60  ;;  %v9008_v55 = vsub.f32 1.0, %v8335_v5 }
 0x79f   : > { %v3458_v6 = vmul.f32 %v3447_v52, %v8365_v7  ;;  %v3406_v29 = vmul.f32 0.6931472, %v6319_v20  ;;  %vm3350_vm14 = vcmp.eq.f32.partialorder %v3349_v30, 8.507059e+37  ;;  %v3364_v1 = vand.u32 2147483647, %v8360_v53 }
 0x7a0   : > { %v3343_v17 = vmul.f32 %v6315_v43, %v3342_v31  ;;  %v3366_v60 = vand.u32 2147483648, %v8360_v53  ;;  %v3392_v30 = vsub.f32 0.0, %v8350_v45  ;;  %vm3360_vm0 = vweird.f32 %v8360_v53 }
 0x7a1   : > { %v3464_v57 = vmul.f32 %v3458_v6, %v9008_v55  ;;  %v3423_v20 = vmul.f32 %v8365_v7, %v3406_v29  ;;  %vm3365_vm3 = vcmp.eq.f32.partialorder %v3364_v1, 8.507059e+37 }
 0x7a2   : > { %v6321_v47 = vpop.eup %6320  ;;  %v3344_v46 = vadd.f32 %v6315_v43, %v3343_v17  ;;  %v3352_v17 = vor.u32 1.1754944e-38, %v3351_v39 }
 0x7a3   : > { %v6323_v22 = vpop.eup %6322  ;;  %v8379_v51 = vadd.f32 1.0, %v6321_v47  ;;  %v3470_v31 = vsub.f32 %v3428_v19, %v3464_v57 }
 0x7a4   : > { %v3356_v36 = vmul.f32 %v6323_v22, %v8360_v53  ;;  %v6325_v52 = vpop.eup %6324  ;;  %v3348_v6 = vsel %vm8383_vm13, %v6315_v43, %v3344_v46  ;;  %vm3361_vm15 = vweird.f32 %v6323_v22 }
 0x7a5   : > { %6326 = vrcp.f32 %v8379_v51  ;;  %3500 = vrot.lane.b32.xlu2 %v3470_v31, %s6974_s5  ;;  %3482 = vrot.lane.b32.xlu0 %v3470_v31, %s6975_s4  ;;  %v3449_v18 = vmul.f32 0.6931472, %v6325_v52  ;;  %v3353_v39 = vsel %vm3350_vm14, %v3352_v17, %v3348_v6  ;;  %vm3362_vm2 = vmor %vm3360_vm0, %vm3361_vm15  ;;  %v3367_v52 = vor.u32 1.1754944e-38, %v3366_v60 }
 0x7a6   : > { %v3357_v5 = vsub.f32 1.0, %v3356_v36  ;;  %3388 = vst [vmem:[%s7407_s19 + $0x18] sm:$0xff] %v3353_v39  ;;  %v3400_v55 = vadd.f32 1e-10, %v3353_v39  ;;  %v3437_v57 = vsub.f32 1.0, %v3353_v39  ;;  %v3429_v36 = vmul.f32 %v3423_v20, %v3392_v30 }
 0x7a7   : > { %v3459_v19 = vmul.f32 %v3449_v18, %v8365_v7  ;;  %v3379_v30 = vand.u32 2147483647, %v8379_v51  ;;  %v3381_v60 = vand.u32 2147483648, %v8379_v51  ;;  %vm3375_vm5 = vweird.f32 %v8379_v51 }
 0x7a8   : > { %v3358_v47 = vmul.f32 %v6323_v22, %v3357_v5  ;;  %6328 = vlog2.f32 %v3400_v55  ;;  %v3443_v17 = vadd.f32 1e-10, %v3437_v57 }
 0x7a9   : > { %v3465_v43 = vmul.f32 %v3459_v19, %v9011_v23  ;;  %vm3380_vm10 = vcmp.eq.f32.partialorder %v3379_v30, 8.507059e+37 }
 0x7aa   : > { %v3359_v29 = vadd.f32 %v6323_v22, %v3358_v47  ;;  %6330 = vlog2.f32 %v3443_v17 }
 0x7ab   : > { %v6327_v46 = vpop.eup %6326  ;;  %v3471_v18 = vsub.f32 %v3429_v36, %v3465_v43  ;;  %v3382_v36 = vor.u32 1.1754944e-38, %v3381_v60 }
 0x7ac   : > { %v3371_v5 = vmul.f32 %v6327_v46, %v8379_v51  ;;  %v3363_v6 = vsel %vm3362_vm2, %v6323_v22, %v3359_v29  ;;  %vm3376_vm4 = vweird.f32 %v6327_v46 }
 0x7ad   : > { %v3368_v41 = vsel %vm3365_vm3, %v3367_v52, %v3363_v6  ;;  %3573 = vperm.xlu1 %6280, %v3471_v18   ;;  %3518 = vrot.lane.b32.xlu2 %v3470_v31, %s6976_s11  ;;  %vm3377_vm6 = vmor %vm3375_vm5, %vm3376_vm4 }
 0x7ae   : > { %v3372_v53 = vsub.f32 1.0, %v3371_v5  ;;  %3389 = vst [vmem:[%s7407_s19 + $0x20] sm:$0xff] %v3368_v41  ;;  %v3401_v45 = vadd.f32 1e-10, %v3368_v41  ;;  %v3438_v20 = vsub.f32 1.0, %v3368_v41  ;;  %3568 = vperm.xlu0 %6279, %v3470_v31   ;;  %v6329_v1 = vpop.eup %6328  ;;  %v3394_v5 = vsub.f32 0.0, %v3353_v39 }
 0x7af   : > { %v3410_v19 = vmul.f32 0.6931472, %v6329_v1 }
 0x7b0   : > { %v3373_v47 = vmul.f32 %v6327_v46, %v3372_v53  ;;  %6332 = vlog2.f32 %v3401_v45  ;;  %v3444_v22 = vadd.f32 1e-10, %v3438_v20  ;;  %v6331_v29 = vpop.eup %6330 }
 0x7b1   : > { %v3425_v43 = vmul.f32 %v8365_v7, %v3410_v19  ;;  %v3453_v52 = vmul.f32 0.6931472, %v6331_v29 }
 0x7b2   : > { %v3374_v55 = vadd.f32 %v6327_v46, %v3373_v47  ;;  %6334 = vlog2.f32 %v3444_v22  ;;  %v3395_v47 = vsub.f32 0.0, %v3368_v41 }
 0x7b3   : > { %v3461_v6 = vmul.f32 %v3453_v52, %v8365_v7  ;;  %v3431_v45 = vmul.f32 %v3425_v43, %v3394_v5 }
 0x7b4   : > { %v3378_v23 = vsel %vm3377_vm6, %v6327_v46, %v3374_v55 }
 0x7b5   : > { %v3383_v31 = vsel %vm3380_vm10, %v3382_v36, %v3378_v23  ;;  %3502 = vrot.lane.b32.xlu2 %v3471_v18, %s6974_s5  ;;  %v3467_v1 = vmul.f32 %v3461_v6, %v3437_v57  ;;  %v6271_v57 = vpop.permute.xlu2 %6270  ;;  %v9012_v36 = vmov 1.0|1.0  }
 0x7b6   : > { %v6333_v17 = vpop.eup %6332  ;;  %3390 = vst [vmem:[%s7407_s19 + $0x28] sm:$0xff] %v3383_v31  ;;  %3484 = vrot.lane.b32.xlu0 %v3471_v18, %s6975_s4  ;;  %v6273_v29 = vunpack.i.h.bf16 %v6271_v57  ;;  %v6272_v41 = vunpack.i.l.bf16 %v6271_v57 }
 0x7b7   : > { %v3412_v51 = vmul.f32 0.6931472, %v6333_v17  ;;  %v3473_v60 = vsub.f32 %v3431_v45, %v3467_v1 }
 0x7b8   : > { %v6335_v53 = vpop.eup %6334  ;;  %3691 = vst.msk [vmem:[#allocation3 + $0x28] sm:$0xff] %vm1903_vm7, %v6273_v29 }
 0x7b9   : > { %v3426_v46 = vmul.f32 %v8365_v7, %v3412_v51  ;;  %v3455_v30 = vmul.f32 0.6931472, %v6335_v53  ;;  %3488 = vrot.lane.b32.xlu1 %v3473_v60, %s6975_s4  ;;  %3688 = vst.msk [vmem:[#allocation3 + $0x10] sm:$0xff] %vm1903_vm7, %v6272_v41 }
 0x7bb   : > { %v3462_v22 = vmul.f32 %v3455_v30, %v8365_v7  ;;  %v3432_v19 = vmul.f32 %v3426_v46, %v3395_v47 }
 0x7bd   : > { %v3468_v55 = vmul.f32 %v3462_v22, %v3438_v20  ;;  %v6276_v7 = vpop.permute.xlu2 %6275 }
 0x7be   : > { %3520 = vrot.lane.b32.xlu0 %v3471_v18, %s6976_s11  ;;  %v6278_v18 = vunpack.i.h.bf16 %v6276_v7  ;;  %v6277_v20 = vunpack.i.l.bf16 %v6276_v7 }
 0x7bf   : > { %v3474_v39 = vsub.f32 %v3432_v19, %v3468_v55 }
 0x7c0   : > { %3697 = vst.msk [vmem:[#allocation3 + $0x58] sm:$0xff] %vm1903_vm7, %v6278_v18 }
 0x7c1   : > { %3526 = vrot.lane.b32.xlu2 %v3474_v39, %s6976_s11  ;;  %3524 = vrot.lane.b32.xlu1 %v3473_v60, %s6976_s11  ;;  %3694 = vst.msk [vmem:[#allocation3 + $0x40] sm:$0xff] %vm1903_vm7, %v6277_v20 }
 0x7c6   : > { %3506 = vrot.lane.b32.xlu0 %v3473_v60, %s6974_s5 }
 0x7c9   : > { %3588 = vperm.xlu2 %6268, %v3474_v39   ;;  %3583 = vperm.xlu1 %6280, %v3473_v60  }
 0x7d1   : > { %3490 = vrot.lane.b32.xlu1 %v3474_v39, %s6975_s4 }
 0x7d9   : > { %3508 = vrot.lane.b32.xlu1 %v3474_v39, %s6974_s5 }
 0x7e1   : > { %6282 = vperm.xlu1 %6280, %v9012_v36  }
 0x7ff   : > { %v3501_v23 = vpop.permute.xlu2 %3500 }
 0x800   : > { %3628 = vperm.xlu2 %6268, %v3501_v23  }
 0x807   : > { %v3519_v43 = vpop.permute.xlu2 %3518 }
 0x808   : > { %3658 = vperm.xlu1 %6280, %v3519_v43  }
 0x80f   : > { %v3503_v52 = vpop.permute.xlu2 %3502 }
 0x817   : > { %v3483_v31 = vpop.permute.xlu0 %3482 }
 0x818   : > { %3598 = vperm.xlu0 %6279, %v3483_v31  }
 0x81b   : > { %v3527_v17 = vpop.permute.xlu2 %3526 }
 0x81f   : > { %v3574_v5 = vpop.permute.xlu1 %3573 }
 0x820   : > { %3687 = vst.msk [vmem:[#allocation3 + $0x8] sm:$0xff] %vm1903_vm7, %v3574_v5  ;;  %v3569_v6 = vpop.permute.xlu0 %3568  ;;  %3633 = vperm.xlu0 %6279, %v3503_v52  }
 0x821   : > { %3686 = vst.msk [vmem:[#allocation3] sm:$0xff] %vm1903_vm7, %v3569_v6 }
 0x823   : > { %v3589_v51 = vpop.permute.xlu2 %3588 }
 0x824   : > { %3690 = vst.msk [vmem:[#allocation3 + $0x20] sm:$0xff] %vm1903_vm7, %v3589_v51 }
 0x828   : > { %v3485_v53 = vpop.permute.xlu0 %3484 }
 0x829   : > { %3603 = vperm.xlu1 %6280, %v3485_v53  }
 0x82b   : > { %v3489_v45 = vpop.permute.xlu1 %3488 }
 0x82c   : > { %3613 = vperm.xlu0 %6279, %v3489_v45  }
 0x830   : > { %v3521_v1 = vpop.permute.xlu0 %3520 }
 0x831   : > { %3663 = vperm.xlu2 %6268, %v3521_v1  }
 0x833   : > { %v3525_v46 = vpop.permute.xlu1 %3524 }
 0x838   : > { %v3507_v30 = vpop.permute.xlu0 %3506 }
 0x839   : > { %3643 = vperm.xlu2 %6268, %v3507_v30  }
 0x83b   : > { %v3584_v60 = vpop.permute.xlu1 %3583 }
 0x83c   : > { %3689 = vst.msk [vmem:[#allocation3 + $0x18] sm:$0xff] %vm1903_vm7, %v3584_v60 }
 0x841   : > { %3678 = vperm.xlu2 %6268, %v3527_v17  }
 0x843   : > { %v3491_v47 = vpop.permute.xlu1 %3490 }
 0x844   : > { %3618 = vperm.xlu1 %6280, %v3491_v47  }
 0x84b   : > { %v3509_v22 = vpop.permute.xlu1 %3508 }
 0x84c   : > { %3648 = vperm.xlu0 %6279, %v3509_v22   ;;  %3673 = vperm.xlu1 %6280, %v3525_v46  }
 0x853   : > { %v6283_v19 = vpop.permute.xlu1 %6282 }
 0x854   : > { %v6285_v55 = vunpack.i.h.bf16 %v6283_v19  ;;  %v6284_v39 = vunpack.i.l.bf16 %v6283_v19  ;;  %6287 = vperm.xlu0 %6279, %v9012_v36  }
 0x856   : > { %3703 = vst.msk [vmem:[#allocation3 + $0x88] sm:$0xff] %vm1903_vm7, %v6285_v55 }
 0x857   : > { %3700 = vst.msk [vmem:[#allocation3 + $0x70] sm:$0xff] %vm1903_vm7, %v6284_v39 }
 0x85a   : > { %v3629_v57 = vpop.permute.xlu2 %3628 }
 0x85b   : > { %3698 = vst.msk [vmem:[#allocation3 + $0x60] sm:$0xff] %vm1903_vm7, %v3629_v57 }
 0x87a   : > { %v3659_v29 = vpop.permute.xlu1 %3658 }
 0x87b   : > { %3704 = vst.msk [vmem:[#allocation3 + $0x90] sm:$0xff] %vm1903_vm7, %v3659_v29 }
 0x88a   : > { %v3599_v41 = vpop.permute.xlu0 %3598 }
 0x88b   : > { %v3664_v7 = vpop.permute.xlu2 %3663  ;;  %3692 = vst.msk [vmem:[#allocation3 + $0x30] sm:$0xff] %vm1903_vm7, %v3599_v41 }
 0x88c   : > { %3705 = vst.msk [vmem:[#allocation3 + $0x98] sm:$0xff] %vm1903_vm7, %v3664_v7 }
 0x892   : > { %v3634_v18 = vpop.permute.xlu0 %3633 }
 0x893   : > { %v3644_v20 = vpop.permute.xlu2 %3643  ;;  %3699 = vst.msk [vmem:[#allocation3 + $0x68] sm:$0xff] %vm1903_vm7, %v3634_v18 }
 0x894   : > { %3701 = vst.msk [vmem:[#allocation3 + $0x78] sm:$0xff] %vm1903_vm7, %v3644_v20 }
 0x89b   : > { %v3604_v36 = vpop.permute.xlu1 %3603  ;;  %v3679_v23 = vpop.permute.xlu2 %3678 }
 0x89c   : > { %3693 = vst.msk [vmem:[#allocation3 + $0x38] sm:$0xff] %vm1903_vm7, %v3604_v36 }
 0x89d   : > { %3708 = vst.msk [vmem:[#allocation3 + $0xb0] sm:$0xff] %vm1903_vm7, %v3679_v23 }
 0x89e   : > { %v3614_v43 = vpop.permute.xlu0 %3613 }
 0x89f   : > { %3695 = vst.msk [vmem:[#allocation3 + $0x48] sm:$0xff] %vm1903_vm7, %v3614_v43 }
 0x8b6   : > { %v3619_v52 = vpop.permute.xlu1 %3618 }
 0x8b7   : > { %3696 = vst.msk [vmem:[#allocation3 + $0x50] sm:$0xff] %vm1903_vm7, %v3619_v52 }
 0x8be   : > { %v3674_v31 = vpop.permute.xlu1 %3673  ;;  %v3649_v17 = vpop.permute.xlu0 %3648 }
 0x8bf   : > { %3707 = vst.msk [vmem:[#allocation3 + $0xa8] sm:$0xff] %vm1903_vm7, %v3674_v31 }
 0x8c0   : > { %3702 = vst.msk [vmem:[#allocation3 + $0x80] sm:$0xff] %vm1903_vm7, %v3649_v17 }
 0x8c6   : > { %v6288_v5 = vpop.permute.xlu0 %6287 }
 0x8c7   : > { %v6290_v6 = vunpack.i.h.bf16 %v6288_v5  ;;  %v6289_v51 = vunpack.i.l.bf16 %v6288_v5 }
 0x8c9   : > { %3709 = vst.msk [vmem:[#allocation3 + $0xb8] sm:$0xff] %vm1903_vm7, %v6290_v6 }
 0x8ca   : > { %3706 = vst.msk [vmem:[#allocation3 + $0xa0] sm:$0xff] %vm1903_vm7, %v6289_v51 }
 0x8cb PF: > { %v6336_v53 = vpack.i.bf16 %v8204_v3, %v8197_v12  ;;  %v3712_v45 = vld [vmem:[#allocation3 + $0x10] sm:$0xff]  ;;  %v3718_v1 = vld [vmem:[#allocation3 + $0x40] sm:$0xff]  ;;  %v3721_v46 = vld [vmem:[#allocation3 + $0x58] sm:$0xff]  ;;  %v6346_v30 = vpack.i.bf16 %v8225_v58, %v8221_v25  ;;  %v6341_v57 = vpack.i.bf16 %v8213_v27, %v8209_v44  ;;  %s9028_s19 = scalar_lea.vmem [#allocation8], %s7315_s17 }
 0x8cc   : > { %v3736_v60 = vmul.f32 %v3712_v45, %v7649_v15  ;;  %v3742_v47 = vmul.f32 %v3718_v1, %v7793_v42  ;;  %v3745_v22 = vmul.f32 %v3721_v46, %v7842_v16  ;;  %v3710_v19 = vld [vmem:[#allocation3] sm:$0xff]  ;;  %v3711_v55 = vld [vmem:[#allocation3 + $0x8] sm:$0xff]  ;;  %v3716_v39 = vld [vmem:[#allocation3 + $0x30] sm:$0xff] }
 0x8cd   : > { %6337 = vrot.lane.b32.xlu0 %v6336_v53, %s6970_s14  ;;  %v3734_v12 = vmul.f32 %v3710_v19, %v7647_v37  ;;  %v3735_v3 = vmul.f32 %v3711_v55, %v7665_v49  ;;  %v3717_v29 = vld [vmem:[#allocation3 + $0x38] sm:$0xff]  ;;  %v3740_v25 = vmul.f32 %v3716_v39, %v7709_v11  ;;  %v3719_v15 = vld [vmem:[#allocation3 + $0x48] sm:$0xff]  ;;  %6347 = vrot.lane.b32.xlu1 %v6346_v30, %s6968_s27  ;;  %v3720_v7 = vld [vmem:[#allocation3 + $0x50] sm:$0xff] }
 0x8ce   : > { %v3760_v42 = vpack.c.bf16 %v3736_v60, %v3736_v60  ;;  %v3766_v16 = vpack.c.bf16 %v3742_v47, %v3742_v47  ;;  %v3769_v58 = vpack.c.bf16 %v3745_v22, %v3745_v22  ;;  %v3741_v41 = vmul.f32 %v3717_v29, %v7825_v2  ;;  %v3715_v43 = vld [vmem:[#allocation3 + $0x28] sm:$0xff]  ;;  %v3713_v5 = vld [vmem:[#allocation3 + $0x18] sm:$0xff]  ;;  %v3714_v6 = vld [vmem:[#allocation3 + $0x20] sm:$0xff] }
 0x8cf   : > { %v3758_v18 = vpack.c.bf16 %v3734_v12, %v3734_v12  ;;  %v3759_v44 = vpack.c.bf16 %v3735_v3, %v3735_v3  ;;  %v3764_v27 = vpack.c.bf16 %v3740_v25, %v3740_v25  ;;  %v3743_v20 = vmul.f32 %v3719_v15, %v7808_v40  ;;  %v3727_v60 = vld [vmem:[#allocation3 + $0x88] sm:$0xff]  ;;  %v3724_v47 = vld [vmem:[#allocation3 + $0x70] sm:$0xff]  ;;  %v3722_v15 = vld [vmem:[#allocation3 + $0x60] sm:$0xff] }
 0x8d0   : > { %v3787_v37 = vunpack.c.l.b16 %v3760_v42  ;;  %v3843_v36 = vunpack.c.l.b16 %v3766_v16  ;;  %v3871_v49 = vunpack.c.l.b16 %v3769_v58  ;;  %v3765_v23 = vpack.c.bf16 %v3741_v41, %v3741_v41  ;;  %v3723_v58 = vld [vmem:[#allocation3 + $0x68] sm:$0xff] }
 0x8d1   : > { %v3785_v11 = vunpack.c.l.b16 %v3758_v18  ;;  %v3786_v52 = vunpack.c.l.b16 %v3759_v44  ;;  %v3841_v31 = vunpack.c.l.b16 %v3764_v27  ;;  %v3744_v17 = vmul.f32 %v3720_v7, %v7751_v63  ;;  %v3730_v39 = vld [vmem:[#allocation3 + $0xa0] sm:$0xff] }
 0x8d2   : > { %v3789_v51 = vpack.c.b16 %v3787_v37, %v3787_v37  ;;  %v3845_v2 = vpack.c.b16 %v3843_v36, %v3843_v36  ;;  %v3873_v53 = vpack.c.b16 %v3871_v49, %v3871_v49  ;;  %v3842_v45 = vunpack.c.l.b16 %v3765_v23  ;;  %v3728_v36 = vld [vmem:[#allocation3 + $0x90] sm:$0xff] }
 0x8d3   : > { %v3788_v1 = vpack.c.b16 %v3786_v52, %v3785_v11  ;;  %v3767_v46 = vpack.c.bf16 %v3743_v20, %v3743_v20  ;;  %v3768_v30 = vpack.c.bf16 %v3744_v17, %v3744_v17  ;;  %v3739_v40 = vmul.f32 %v3715_v43, %v7675_v32  ;;  %v3729_v52 = vld [vmem:[#allocation3 + $0x98] sm:$0xff] }
 0x8d4   : > { %v3795_v22 = vsel %vm2640_vm9, %v3789_v51, 0  ;;  %v3851_v19 = vsel %vm2640_vm9, %v3845_v2, 0  ;;  %v3879_v55 = vsel %vm2640_vm9, %v3873_v53, 0  ;;  %v3844_v63 = vpack.c.b16 %v3842_v45, %v3841_v31 }
 0x8d5   : > { %3803 = vmatpush.bf16.msra.mxu1 %v3795_v22  ;;  %3859 = vmatpush.bf16.msra.mxu2 %v3851_v19  ;;  %v3869_v12 = vunpack.c.l.b16 %v3767_v46  ;;  %v3870_v3 = vunpack.c.l.b16 %v3768_v30  ;;  %v3763_v29 = vpack.c.bf16 %v3739_v40, %v3739_v40  ;;  %v3737_v25 = vmul.f32 %v3713_v5, %v7657_v61  ;;  %v3725_v5 = vld [vmem:[#allocation3 + $0x78] sm:$0xff]  ;;  %v3731_v40 = vld [vmem:[#allocation3 + $0xa8] sm:$0xff]  ;;  %v3732_v22 = vld [vmem:[#allocation3 + $0xb0] sm:$0xff] }
 0x8d6   : > { %3887 = vmatpush.bf16.msra.mxu3 %v3879_v55  ;;  %6342 = vrot.lane.b32.xlu0 %v6341_v57, %s6969_s22  ;;  %v3738_v32 = vmul.f32 %v3714_v6, %v7667_v26  ;;  %v3751_v42 = vmul.f32 %v3727_v60, %v7860_v38  ;;  %v3748_v16 = vmul.f32 %v3724_v47, %v7788_v8  ;;  %v3726_v6 = vld [vmem:[#allocation3 + $0x80] sm:$0xff]  ;;  %v3733_v30 = vld [vmem:[#allocation3 + $0xb8] sm:$0xff] }
 0x8d7   : > { %v3872_v41 = vpack.c.b16 %v3870_v3, %v3869_v12  ;;  %v3815_v7 = vunpack.c.l.b16 %v3763_v29  ;;  %v3761_v18 = vpack.c.bf16 %v3737_v25, %v3737_v25  ;;  %v3754_v44 = vmul.f32 %v3730_v39, %v7862_v13  ;;  %v9013_v12 = vld [vmem:[#allocation52_spill] sm:$0xff] }
 0x8d8   : > { %v3762_v27 = vpack.c.bf16 %v3738_v32, %v3738_v32  ;;  %v3775_v20 = vpack.c.bf16 %v3751_v42, %v3751_v42  ;;  %v3772_v37 = vpack.c.bf16 %v3748_v16, %v3748_v16  ;;  %v3746_v61 = vmul.f32 %v3722_v15, %v7806_v62  ;;  %v5834_v25 = vld [vmem:[%s7328_s7 + $0x38] sm:$0xff] }
 0x8d9   : > { %3804 = vmatpush.bf16.msra.mxu1 %v3788_v1  ;;  %3860 = vmatpush.bf16.msra.mxu2 %v3844_v63  ;;  %v3817_v57 = vpack.c.b16 %v3815_v7, %v3815_v7  ;;  %v3813_v26 = vunpack.c.l.b16 %v3761_v18  ;;  %v3778_v49 = vpack.c.bf16 %v3754_v44, %v3754_v44  ;;  %v3747_v38 = vmul.f32 %v3723_v58, %v7831_v0  ;;  %v5833_v44 = vld [vmem:[%s7328_s7 + $0x30] sm:$0xff] }
 0x8da   : > { %3888 = vmatpush.bf16.msra.mxu3 %v3872_v41  ;;  %v3814_v8 = vunpack.c.l.b16 %v3762_v27  ;;  %v3927_v23 = vunpack.c.l.b16 %v3775_v20  ;;  %v3899_v43 = vunpack.c.l.b16 %v3772_v37  ;;  %v3770_v11 = vpack.c.bf16 %v3746_v61, %v3746_v61  ;;  %v5832_v61 = vld [vmem:[%s7328_s7 + $0x28] sm:$0xff] }
 0x8db   : > { %v3823_v13 = vsel %vm2640_vm9, %v3817_v57, 0  ;;  %v3955_v31 = vunpack.c.l.b16 %v3778_v49  ;;  %v3771_v17 = vpack.c.bf16 %v3747_v38, %v3747_v38  ;;  %v3752_v62 = vmul.f32 %v3728_v36, %v7900_v50  ;;  %v5830_v36 = vld [vmem:[%s7328_s7 + $0x18] sm:$0xff]  ;;  %v5829_v57 = vld [vmem:[%s7328_s7 + $0x10] sm:$0xff] }
 0x8dc   : > { %5604 = vmatmul.msk.bf16.vlgmr.msra.gmra.mxu1 %vm2304_vm8, %v8075_v9  ;;  %5606 = vmatmul.msk.bf16.vlgmr.msra.gmra.mxu2 %vm2304_vm8, %v8133_v35  ;;  %v3816_v0 = vpack.c.b16 %v3814_v8, %v3813_v26  ;;  %v3929_v51 = vpack.c.b16 %v3927_v23, %v3927_v23  ;;  %v3901_v2 = vpack.c.b16 %v3899_v43, %v3899_v43  ;;  %v3897_v53 = vunpack.c.l.b16 %v3770_v11  ;;  %v5828_v26 = vld [vmem:[%s7328_s7 + $0x8] sm:$0xff]  ;;  %v9014_v23 = vld [vmem:[#allocation53_spill] sm:$0xff] }
 0x8dd   : > { %3831 = vmatpush.bf16.msrb.mxu1 %v3823_v13  ;;  %5607 = vmatmul.msk.bf16.vlgmr.msra.gmra.mxu3 %vm2304_vm8, %v8148_v14  ;;  %v3957_v45 = vpack.c.b16 %v3955_v31, %v3955_v31  ;;  %v3898_v1 = vunpack.c.l.b16 %v3771_v17  ;;  %v3753_v50 = vmul.f32 %v3729_v52, %v8162_v54  ;;  %v3776_v46 = vpack.c.bf16 %v3752_v62, %v3752_v62 }
 0x8de   : > { %v3935_v9 = vsel %vm2640_vm9, %v3929_v51, 0  ;;  %v3907_v35 = vsel %vm2640_vm9, %v3901_v2, 0  ;;  %v3749_v60 = vmul.f32 %v3725_v5, %v7827_v33  ;;  %v3750_v47 = vmul.f32 %v3726_v6, %v7844_v59 }
 0x8df   : > { %3915 = vmatpush.bf16.msra.mxu0 %v3907_v35  ;;  %v3963_v14 = vsel %vm2640_vm9, %v3957_v45, 0  ;;  %v3900_v19 = vpack.c.b16 %v3898_v1, %v3897_v53  ;;  %v3777_v55 = vpack.c.bf16 %v3753_v50, %v3753_v50  ;;  %v3953_v63 = vunpack.c.l.b16 %v3776_v46  ;;  %v9015_v50 = vld [vmem:[#allocation58_spill] sm:$0xff]  ;;  %v9018_v35 = vld [vmem:[#allocation61_spill] sm:$0xff] }
 0x8e0   : > { %3971 = vmatpush.bf16.msrb.mxu2 %v3963_v14  ;;  %v3773_v54 = vpack.c.bf16 %v3749_v60, %v3749_v60  ;;  %v3774_v39 = vpack.c.bf16 %v3750_v47, %v3750_v47  ;;  %v3757_v3 = vmul.f32 %v3733_v30, %v9013_v12  ;;  %v3755_v29 = vmul.f32 %v3731_v40, %v8176_v10  ;;  %v9017_v40 = vld [vmem:[#allocation59_spill] sm:$0xff] }
 0x8e1   : > { %3832 = vmatpush.bf16.msrb.mxu1 %v3816_v0  ;;  %v3954_v33 = vunpack.c.l.b16 %v3777_v55  ;;  %v3756_v59 = vmul.f32 %v3732_v22, %v8169_v4  ;;  %v9019_v22 = vld [vmem:[#allocation60_spill] sm:$0xff]  ;;  %v9020_v55 = vld [vmem:[#allocation67_spill] sm:$0xff] }
 0x8e2   : > { %v3925_v15 = vunpack.c.l.b16 %v3773_v54  ;;  %v3926_v32 = vunpack.c.l.b16 %v3774_v39  ;;  %v3781_v42 = vpack.c.bf16 %v3757_v3, %v3757_v3  ;;  %v3779_v16 = vpack.c.bf16 %v3755_v29, %v3755_v29  ;;  %v9021_v39 = vld [vmem:[#allocation62_spill] sm:$0xff] }
 0x8e3   : > { %3916 = vmatpush.bf16.msra.mxu0 %v3900_v19  ;;  %v3956_v58 = vpack.c.b16 %v3954_v33, %v3953_v63  ;;  %v3780_v41 = vpack.c.bf16 %v3756_v59, %v3756_v59 }
 0x8e4   : > { %v3928_v7 = vpack.c.b16 %v3926_v32, %v3925_v15  ;;  %v3983_v18 = vunpack.c.l.b16 %v3781_v42  ;;  %v3981_v10 = vunpack.c.l.b16 %v3779_v16  ;;  %v9022_v32 = vld [vmem:[#allocation69_spill] sm:$0xff]  ;;  %v9023_v16 = vld [vmem:[#allocation64_spill] sm:$0xff] }
 0x8e5   : > { %3943 = vmatpush.bf16.msra.mxu1 %v3935_v9  ;;  %3972 = vmatpush.bf16.msrb.mxu2 %v3956_v58  ;;  %v3982_v27 = vunpack.c.l.b16 %v3780_v41 }
 0x8e6   : > { %5608 = vmatmul.msk.bf16.vlgmr.msra.gmra.mxu0 %vm2304_vm8, %v8189_v21  ;;  %v3985_v4 = vpack.c.b16 %v3983_v18, %v3983_v18  ;;  %v5831_v21 = vld [vmem:[%s7328_s7 + $0x20] sm:$0xff]  ;;  %v9024_v18 = vld [vmem:[#allocation68_spill] sm:$0xff] }
 0x8e7   : > { %4207 = vmatpush.bf16.msrb.mxu0 %v5834_v25  ;;  %v3984_v37 = vpack.c.b16 %v3982_v27, %v3981_v10 }
 0x8e8   : > { %v3991_v20 = vsel %vm2640_vm9, %v3985_v4, 0  ;;  %vm4122_vm9 = vcmask 523264   ;;  %v9025_v4 = vld [vmem:[#allocation65_spill] sm:$0xff] }
 0x8e9   : > { %3944 = vmatpush.bf16.msra.mxu1 %v3928_v7  ;;  %3999 = vmatpush.bf16.msrb.mxu3 %v3991_v20 }
 0x8eb   : > { %4208 = vmatpush.bf16.msrb.mxu0 %v5833_v44 }
 0x8ec   : > { %5605 = vmatmul.msk.bf16.vlgmr.msrb.gmra.mxu1 %vm2304_vm8, %v8098_v56  ;;  %5610 = vmatmul.msk.bf16.vlgmr.msrb.gmra.mxu2 %vm2304_vm8, %v8200_v28  ;;  %v5827_v56 = vld [vmem:[%s7328_s7] sm:$0xff]  ;;  %s9040_s7 = scalar_lea.vmem [#allocation11], %s7315_s17 }
 0x8ed   : > { %4000 = vmatpush.bf16.msrb.mxu3 %v3984_v37 }
 0x8ef   : > { %4209 = vmatpush.bf16.msrb.mxu0 %v5832_v61 }
 0x8f0   : > { %5611 = vmatmul.msk.bf16.vlgmr.msrb.gmra.mxu3 %vm2304_vm8, %v8194_v34 }
 0x8f3   : > { %4210 = vmatpush.bf16.msrb.mxu0 %v5831_v21  ;;  %v9026_v21 = vld [vmem:[#allocation66_spill] sm:$0xff] }
 0x8f7   : > { %4211 = vmatpush.bf16.msrb.mxu0 %v5830_v36 }
 0x8fb   : > { %4212 = vmatpush.bf16.msrb.mxu0 %v5829_v57  ;;  %v9027_v57 = vld [vmem:[#allocation63_spill] sm:$0xff] }
 0x8fc   : > { %5609 = vmatmul.msk.bf16.vlgmr.msra.gmra.mxu1 %vm2304_vm8, %v8184_v48  ;;  %vm4129_vm8 = vcmask 785408  }
 0x8ff   : > { %4213 = vmatpush.bf16.msrb.mxu0 %v5828_v26 }
 0x903   : > { %4214 = vmatpush.bf16.msrb.mxu0 %v5827_v56 }
 0x93f   : > { %v6338_v49 = vpop.permute.xlu0 %6337  ;;  %v6348_v8 = vpop.permute.xlu1 %6347 }
 0x940   : > { %v6340_v28 = vunpack.i.h.bf16 %v6338_v49  ;;  %v6339_v38 = vunpack.i.l.bf16 %v6338_v49  ;;  %v6350_v11 = vunpack.i.h.bf16 %v6348_v8  ;;  %v6349_v52 = vunpack.i.l.bf16 %v6348_v8  ;;  %v8552_v49 = vld [vmem:[%s9028_s19] ss:$0 sm:$0xff] }
 0x942   : > { %v4117_v34 = vsel %vm1903_vm7, %v8146_v24, %v6340_v28  ;;  %v4116_v43 = vsel %vm1903_vm7, %v9014_v23, %v6339_v38 }
 0x948   : > { %v6343_v48 = vpop.permute.xlu0 %6342 }
 0x949   : > { %v6345_v13 = vunpack.i.h.bf16 %v6343_v48  ;;  %v6344_v31 = vunpack.i.l.bf16 %v6343_v48 }
 0x94b   : > { %v4123_v17 = vsel %vm4122_vm9, %v4116_v43, %v6344_v31  ;;  %v4124_v62 = vsel %vm4122_vm9, %v4117_v34, %v6345_v13  ;;  %v9029_v34 = vld [vmem:[#allocation47_spill] sm:$0xff] }
 0x94c   : > { %v4130_v5 = vsel %vm4129_vm8, %v4123_v17, %v6349_v52  ;;  %v4131_v6 = vsel %vm4129_vm8, %v4124_v62, %v6350_v11  ;;  %v9030_v62 = vld [vmem:[#allocation50_spill] sm:$0xff] }
 0x94d   : > { %v4136_v0 = vpack.c.bf16 %v4131_v6, %v4130_v5 }
 0x94f   : > { %4215 = vmatmul.bf16.vlgmr.msrb.gmra.mxu0 %v4136_v0 }
 0x959   : > { %v3806_v24 = vpop.f32.mrf.mxu1 }
 0x95a   : > { %v4012_v48 = vperm.slane %v3806_v24, 0  ;;  %v9032_v24 = vld [vmem:[#allocation55_spill] sm:$0xff] }
 0x95f   : > { %v3862_v51 = vpop.f32.mrf.mxu2 }
 0x960   : > { %v4014_v2 = vperm.slane %v3862_v51, 0  ;;  %v3890_v53 = vpop.f32.mrf.mxu3 }
 0x961   : > { %v4015_v45 = vperm.slane %v3890_v53, 0  ;;  %v3808_v1 = vpop.f32.mrf.mxu1  ;;  %v9031_v53 = vld [vmem:[#allocation54_spill] sm:$0xff] }
 0x962   : > { %v4028_v30 = vsel %vm1213_vm1, %v4014_v2, %v9015_v50 }
 0x963   : > { %v6351_v9 = vpack.i.bf16 %v9017_v40, %v4028_v30  ;;  %v4031_v60 = vsel %vm1213_vm1, %v4015_v45, %v9018_v35  ;;  %v3918_v47 = vpop.f32.mrf.mxu0  ;;  %v4022_v45 = vsel %vm1213_vm1, %v4012_v48, %v9031_v53 }
 0x964   : > { %v6366_v14 = vpack.i.bf16 %v4031_v60, %v9019_v22  ;;  %v4016_v19 = vperm.slane %v3918_v47, 0 }
 0x965   : > { %6352 = vrot.lane.b32.xlu1 %v6351_v9, %s6970_s14 }
 0x966   : > { %6367 = vrot.lane.b32.xlu0 %v6366_v14, %s6970_s14  ;;  %v4034_v63 = vsel %vm1213_vm1, %v4016_v19, %v9020_v55 }
 0x967   : > { %v3864_v54 = vpop.f32.mrf.mxu2  ;;  %v6356_v12 = vpack.i.bf16 %v9021_v39, %v4034_v63  ;;  %v9033_v63 = vld [vmem:[#allocation56_spill] sm:$0xff] }
 0x968   : > { %v3892_v3 = vpop.f32.mrf.mxu3 }
 0x969   : > { %v3834_v29 = vpop.f32.mrf.mxu1  ;;  %6357 = vrot.lane.b32.xlu2 %v6356_v12, %s6969_s22 }
 0x96a   : > { %v4013_v14 = vperm.slane %v3834_v29, 0 }
 0x96b   : > { %v3920_v25 = vpop.f32.mrf.mxu0 }
 0x96c   : > { %v9034_v25 = vld [vmem:[#allocation57_spill] sm:$0xff] }
 0x96f   : > { %v3974_v33 = vpop.f32.mrf.mxu2 }
 0x970   : > { %v4018_v59 = vperm.slane %v3974_v33, 0  ;;  %v4025_v33 = vsel %vm1213_vm1, %v4013_v14, %v9034_v25  ;;  %v5843_v25 = vld [vmem:[%s7348_s18 + $0x44] sm:$0xf] }
 0x971   : > { %v3836_v15 = vpop.f32.mrf.mxu1 }
 0x972   : > { %v4040_v42 = vsel %vm1213_vm1, %v4018_v59, %v9022_v32 }
 0x973   : > { %v6361_v58 = vpack.i.bf16 %v9023_v16, %v4040_v42  ;;  %v4002_v41 = vpop.f32.mrf.mxu3 }
 0x974   : > { %v4019_v7 = vperm.slane %v4002_v41, 0 }
 0x975   : > { %6362 = vrot.lane.b32.xlu2 %v6361_v58, %s6968_s27 }
 0x976   : > { %v4043_v44 = vsel %vm1213_vm1, %v4019_v7, %v9024_v18 }
 0x977   : > { %v3976_v10 = vpop.f32.mrf.mxu2  ;;  %v6376_v20 = vpack.i.bf16 %v4043_v44, %v9025_v4  ;;  %v9035_v44 = vld [vmem:[#allocation46_spill] sm:$0xff] }
 0x979   : > { %v3946_v27 = vpop.f32.mrf.mxu1 }
 0x97a   : > { %v4017_v37 = vperm.slane %v3946_v27, 0 }
 0x97b   : > { %v4004_v61 = vpop.f32.mrf.mxu3 }
 0x97c   : > { %v4037_v36 = vsel %vm1213_vm1, %v4017_v37, %v9026_v21  ;;  %v9037_v61 = vld [vmem:[#allocation49_spill] sm:$0xff] }
 0x97d   : > { %v6371_v26 = vpack.i.bf16 %v4037_v36, %v9027_v57  ;;  %6377 = vrot.lane.b32.xlu2 %v6376_v20, %s6968_s27  ;;  %v9036_v20 = vld [vmem:[#allocation51_spill] sm:$0xff] }
 0x97f   : > { %6372 = vrot.lane.b32.xlu1 %v6371_v26, %s6969_s22  ;;  %s9045_s22 = sld [smem:[#allocation84_spill]] (!%p5507_p6) }
 0x981   : > { %v3948_v56 = vpop.f32.mrf.mxu1 }
 0x9c3   : > { %v6358_v28 = vpop.permute.xlu2 %6357 }
 0x9c4   : > { %v6360_v13 = vunpack.i.h.bf16 %v6358_v28  ;;  %v6359_v31 = vunpack.i.l.bf16 %v6358_v28 }
 0x9cc   : > { %v4216_v38 = vpop.f32.mrf.mxu0 }
 0x9cd   : > { %v4217_v8 = vadd.f32 %v8552_v49, %v4216_v38 }
 0x9cf   : > { %v8556_v23 = vadd.f32 %v4217_v8, %v9029_v34  ;;  %v6363_v52 = vpop.permute.xlu2 %6362  ;;  %v9038_v8 = vld [vmem:[#allocation45_spill] sm:$0xff] }
 0x9d0   : > { %v6365_v51 = vunpack.i.h.bf16 %v6363_v52  ;;  %v6364_v2 = vunpack.i.l.bf16 %v6363_v52  ;;  %v9039_v52 = vld [vmem:[#allocation48_spill] sm:$0xff] }
 0x9d1   : > { %4239 = vadd.xlane.f32.xlu0 %v8556_v23 }
 0x9d4   : > { %v4218_v43 = vpop.f32.mrf.mxu0 }
 0x9d5   : > { %v4219_v11 = vadd.f32 %v8552_v49, %v4218_v43 }
 0x9d7   : > { %v6353_v17 = vpop.permute.xlu1 %6352  ;;  %v8561_v5 = vadd.f32 %v4219_v11, %v9030_v62  ;;  %v6378_v19 = vpop.permute.xlu2 %6377  ;;  %v5850_v62 = vld [vmem:[%s7348_s18 + $0x74] sm:$0xf0] }
 0x9d8   : > { %v6355_v6 = vunpack.i.h.bf16 %v6353_v17  ;;  %v6354_v0 = vunpack.i.l.bf16 %v6353_v17  ;;  %v6368_v47 = vpop.permute.xlu0 %6367  ;;  %v6380_v12 = vunpack.i.h.bf16 %v6378_v19  ;;  %v6379_v3 = vunpack.i.l.bf16 %v6378_v19  ;;  %v5702_v17 = vld [vmem:[%s7348_s18 + $0x70] sm:$0xf] }
 0x9d9   : > { %4241 = vadd.xlane.f32.xlu1 %v8561_v5  ;;  %v6369_v22 = vunpack.i.l.bf16 %v6368_v47  ;;  %v6370_v55 = vunpack.i.h.bf16 %v6368_v47  ;;  %v5846_v47 = vld [vmem:[%s7348_s18 + $0x54] sm:$0xf0] }
 0x9da   : > { %v4119_v1 = vsel %vm1903_vm7, %v9032_v24, %v6355_v6  ;;  %v4118_v50 = vsel %vm1903_vm7, %v4022_v45, %v6354_v0  ;;  %v5849_v6 = vld [vmem:[%s7348_s18 + $0x74] sm:$0xf]  ;;  %v5694_v24 = vld [vmem:[%s7348_s18 + $0x60] sm:$0xf] }
 0x9db   : > { %v4126_v30 = vsel %vm4122_vm9, %v4119_v1, %v6360_v13  ;;  %v4125_v40 = vsel %vm4122_vm9, %v4118_v50, %v6359_v31  ;;  %v4120_v54 = vsel %vm1903_vm7, %v9033_v63, %v6369_v22  ;;  %v4121_v32 = vsel %vm1903_vm7, %v4025_v33, %v6370_v55  ;;  %v5848_v1 = vld [vmem:[%s7348_s18 + $0x64] sm:$0xf0]  ;;  %v5847_v50 = vld [vmem:[%s7348_s18 + $0x64] sm:$0xf]  ;;  %v5845_v22 = vld [vmem:[%s7348_s18 + $0x54] sm:$0xf] }
 0x9dc   : > { %v4132_v9 = vsel %vm4129_vm8, %v4125_v40, %v6364_v2  ;;  %v4133_v35 = vsel %vm4129_vm8, %v4126_v30, %v6365_v51  ;;  %v5703_v51 = vor.u32 %v5850_v62, %v5702_v17  ;;  %v5704_v2 = vld [vmem:[%s7348_s18 + $0x78] sm:$0xf0]  ;;  %v5695_v30 = vor.u32 %v5848_v1, %v5694_v24  ;;  %v5696_v40 = vld [vmem:[%s7348_s18 + $0x68] sm:$0xf0]  ;;  %v5835_v62 = vld [vmem:[%s7348_s18 + $0x4] sm:$0xf] }
 0x9dd   : > { %v4137_v60 = vpack.c.bf16 %v4133_v35, %v4132_v9  ;;  %v5707_v53 = vor.u32 %v5849_v6, %v5704_v2  ;;  %v5699_v35 = vor.u32 %v5847_v50, %v5696_v40  ;;  %v5688_v55 = vld [vmem:[%s7348_s18 + $0x58] sm:$0xf0]  ;;  %v5648_v6 = vld [vmem:[%s7348_s18 + $0x8] sm:$0xf0] }
 0x9de   : > { %4482 = vmatpush.bf16.msrb.mxu1 %v5703_v51 }
 0x9df   : > { %4220 = vmatmul.bf16.gmra.mxu0 %v4137_v60  ;;  %4506 = vmatpush.bf16.msra.mxu2 %v5707_v53  ;;  %v5686_v60 = vld [vmem:[%s7348_s18 + $0x50] sm:$0xf] }
 0x9e0   : > { %v5687_v19 = vor.u32 %v5846_v47, %v5686_v60 }
 0x9e2   : > { %4483 = vmatpush.bf16.msrb.mxu1 %v5695_v30 }
 0x9e3   : > { %4507 = vmatpush.bf16.msra.mxu2 %v5699_v35 }
 0x9e6   : > { %4484 = vmatpush.bf16.msrb.mxu1 %v5687_v19 }
 0x9f1   : > { %v6373_v39 = vpop.permute.xlu1 %6372 }
 0x9f2   : > { %v6375_v59 = vunpack.i.h.bf16 %v6373_v39  ;;  %v6374_v15 = vunpack.i.l.bf16 %v6373_v39 }
 0x9f4   : > { %v4127_v42 = vsel %vm4122_vm9, %v4120_v54, %v6374_v15  ;;  %v4128_v29 = vsel %vm4122_vm9, %v4121_v32, %v6375_v59  ;;  %v5691_v54 = vor.u32 %v5845_v22, %v5688_v55  ;;  %v5680_v59 = vld [vmem:[%s7348_s18 + $0x48] sm:$0xf0] }
 0x9f5   : > { %v4134_v16 = vsel %vm4129_vm8, %v4127_v42, %v6379_v3  ;;  %v4135_v58 = vsel %vm4129_vm8, %v4128_v29, %v6380_v12  ;;  %v5678_v12 = vld [vmem:[%s7348_s18 + $0x40] sm:$0xf]  ;;  %v5844_v3 = vld [vmem:[%s7348_s18 + $0x44] sm:$0xf0]  ;;  %v5683_v32 = vor.u32 %v5843_v25, %v5680_v59  ;;  %v5670_v42 = vld [vmem:[%s7348_s18 + $0x30] sm:$0xf] }
 0x9f6   : > { %v4138_v41 = vpack.c.bf16 %v4135_v58, %v4134_v16  ;;  %4508 = vmatpush.bf16.msra.mxu2 %v5691_v54  ;;  %v5679_v33 = vor.u32 %v5844_v3, %v5678_v12  ;;  %v5842_v29 = vld [vmem:[%s7348_s18 + $0x34] sm:$0xf0]  ;;  %v5841_v16 = vld [vmem:[%s7348_s18 + $0x34] sm:$0xf] }
 0x9f8   : > { %4225 = vmatmul.bf16.gmra.mxu0 %v4138_v41  ;;  %4485 = vmatpush.bf16.msrb.mxu1 %v5679_v33  ;;  %v5671_v41 = vor.u32 %v5842_v29, %v5670_v42 }
 0x9fa   : > { %4509 = vmatpush.bf16.msra.mxu2 %v5683_v32 }
 0x9fc   : > { %4486 = vmatpush.bf16.msrb.mxu1 %v5671_v41 }
 0xa44   : > { %v4240_v10 = vpop.xlane.xlu0 %4239 }
 0xa45   : > { %v4251_v37 = vmul.f32 %v4240_v10, %v9036_v20 }
 0xa47   : > { %v8596_v36 = vsub.f32 %v8556_v23, %v4251_v37 }
 0xa49   : > { %v4263_v57 = vmul.f32 %v8596_v36, %v8596_v36 }
 0xa4c   : > { %v4242_v26 = vpop.xlane.xlu1 %4241 }
 0xa4d   : > { %v4252_v38 = vmul.f32 %v4242_v26, %v9036_v20 }
 0xa4f   : > { %v8607_v43 = vsub.f32 %v8561_v5, %v4252_v38  ;;  %v5837_v38 = vld [vmem:[%s7348_s18 + $0x14] sm:$0xf] }
 0xa51   : > { %v4264_v31 = vmul.f32 %v8607_v43, %v8607_v43 }
 0xa5c   : > { %v4221_v7 = vpop.f32.mrf.mxu0 }
 0xa5d   : > { %v4222_v18 = vadd.f32 %v8552_v49, %v4221_v7  ;;  %v5672_v7 = vld [vmem:[%s7348_s18 + $0x38] sm:$0xf0] }
 0xa5f   : > { %v8586_v46 = vadd.f32 %v4222_v18, %v9035_v44  ;;  %v5675_v44 = vor.u32 %v5841_v16, %v5672_v7 }
 0xa61   : > { %4243 = vadd.xlane.f32.xlu2 %v8586_v46  ;;  %4510 = vmatpush.bf16.msra.mxu2 %v5675_v44 }
 0xa64   : > { %v4223_v27 = vpop.f32.mrf.mxu0 }
 0xa65   : > { %v4224_v4 = vadd.f32 %v8552_v49, %v4223_v27  ;;  %v5662_v27 = vld [vmem:[%s7348_s18 + $0x20] sm:$0xf] }
 0xa67   : > { %v8592_v21 = vadd.f32 %v4224_v4, %v9037_v61  ;;  %v5840_v4 = vld [vmem:[%s7348_s18 + $0x24] sm:$0xf0]  ;;  %v5839_v61 = vld [vmem:[%s7348_s18 + $0x24] sm:$0xf] }
 0xa68   : > { %v5663_v37 = vor.u32 %v5840_v4, %v5662_v27 }
 0xa69   : > { %4245 = vadd.xlane.f32.xlu2 %v8592_v21 }
 0xa6a   : > { %4487 = vmatpush.bf16.msrb.mxu1 %v5663_v37 }
 0xa71   : > { %4269 = vadd.xlane.f32.xlu2 %v4263_v57  ;;  %v5664_v57 = vld [vmem:[%s7348_s18 + $0x28] sm:$0xf0] }
 0xa72   : > { %v5667_v26 = vor.u32 %v5839_v61, %v5664_v57 }
 0xa74   : > { %4511 = vmatpush.bf16.msra.mxu2 %v5667_v26 }
 0xa75   : > { %v4226_v56 = vpop.f32.mrf.mxu0 }
 0xa76   : > { %v4227_v28 = vadd.f32 %v8552_v49, %v4226_v56  ;;  %v5654_v56 = vld [vmem:[%s7348_s18 + $0x10] sm:$0xf] }
 0xa78   : > { %v8603_v34 = vadd.f32 %v4227_v28, %v9038_v8  ;;  %v5838_v28 = vld [vmem:[%s7348_s18 + $0x14] sm:$0xf0] }
 0xa79   : > { %v5655_v8 = vor.u32 %v5838_v28, %v5654_v56 }
 0xa7a   : > { %4247 = vadd.xlane.f32.xlu0 %v8603_v34 }
 0xa7b   : > { %4488 = vmatpush.bf16.msrb.mxu1 %v5655_v8 }
 0xa7d   : > { %v4228_v48 = vpop.f32.mrf.mxu0 }
 0xa7e   : > { %v4229_v11 = vadd.f32 %v8552_v49, %v4228_v48  ;;  %v5656_v48 = vld [vmem:[%s7348_s18 + $0x18] sm:$0xf0] }
 0xa7f   : > { %v5659_v17 = vor.u32 %v5837_v38, %v5656_v48 }
 0xa80   : > { %v8611_v13 = vadd.f32 %v4229_v11, %v9039_v52  ;;  %v5646_v11 = vld [vmem:[%s7348_s18] sm:$0xf]  ;;  %v5836_v52 = vld [vmem:[%s7348_s18 + $0x4] sm:$0xf0]  ;;  %s9041_s18 = scalar_lea.vmem [#allocation12], %s7315_s17 }
 0xa81   : > { %v5647_v51 = vor.u32 %v5836_v52, %v5646_v11  ;;  %4512 = vmatpush.bf16.msra.mxu2 %v5659_v17 }
 0xa82   : > { %4249 = vadd.xlane.f32.xlu1 %v8611_v13  ;;  %4271 = vadd.xlane.f32.xlu0 %v4264_v31 }
 0xa83   : > { %4489 = vmatpush.bf16.msrb.mxu1 %v5647_v51 }
 0xad4   : > { %v4244_v0 = vpop.xlane.xlu2 %4243 }
 0xad5   : > { %v4253_v49 = vmul.f32 %v4244_v0, %v9036_v20 }
 0xad7   : > { %v8622_v45 = vsub.f32 %v8586_v46, %v4253_v49  ;;  %v5651_v49 = vor.u32 %v5835_v62, %v5648_v6 }
 0xad9   : > { %v4265_v9 = vmul.f32 %v8622_v45, %v8622_v45  ;;  %4513 = vmatpush.bf16.msra.mxu2 %v5651_v49 }
 0xadb   : > { %4273 = vadd.xlane.f32.xlu1 %v4265_v9 }
 0xadc   : > { %v4246_v14 = vpop.xlane.xlu2 %4245 }
 0xadd   : > { %v4254_v63 = vmul.f32 %v4246_v14, %v9036_v20 }
 0xadf   : > { %v8636_v39 = vsub.f32 %v8592_v21, %v4254_v63 }
 0xae1   : > { %v4266_v15 = vmul.f32 %v8636_v39, %v8636_v39 }
 0xae3   : > { %4275 = vadd.xlane.f32.xlu2 %v4266_v15  ;;  %v8677_v15 = vld [vmem:[%s9040_s7] ss:$0 sm:$0xff] }
 0xae4   : > { %v4270_v58 = vpop.xlane.xlu2 %4269 }
 0xae5   : > { %v4281_v18 = vmul.f32 %v4270_v58, %v9036_v20  ;;  %v8683_v58 = vld [vmem:[%s9041_s18] ss:$0 sm:$0xff] }
 0xae7   : > { %v4287_v10 = vadd.f32 1e-06, %v4281_v18 }
 0xae9   : > { %6385 = vrsqrt.f32 %v4287_v10  ;;  %vm4299_vm7 = vweird.f32 %v4287_v10 }
 0xaed   : > { %v4248_v31 = vpop.xlane.xlu0 %4247 }
 0xaee   : > { %v4255_v0 = vmul.f32 %v4248_v31, %v9036_v20 }
 0xaef   : > { %v6386_v2 = vpop.eup %6385 }
 0xaf0   : > { %v8663_v53 = vsub.f32 %v8603_v34, %v4255_v0  ;;  %v4294_v24 = vmul.f32 %v6386_v2, %v4287_v10  ;;  %vm4300_vm1 = vweird.f32 %v6386_v2 }
 0xaf1   : > { %vm4301_vm11 = vmor %vm4299_vm7, %vm4300_vm1 }
 0xaf2   : > { %v4267_v1 = vmul.f32 %v8663_v53, %v8663_v53  ;;  %v4295_v50 = vmul.f32 %v6386_v2, %v4294_v24 }
 0xaf4   : > { %4277 = vadd.xlane.f32.xlu0 %v4267_v1  ;;  %v4296_v22 = vmul.f32 0.5, %v4295_v50 }
 0xaf5   : > { %v4250_v30 = vpop.xlane.xlu1 %4249  ;;  %v4272_v40 = vpop.xlane.xlu0 %4271 }
 0xaf6   : > { %v4256_v9 = vmul.f32 %v4250_v30, %v9036_v20  ;;  %v4282_v35 = vmul.f32 %v4272_v40, %v9036_v20  ;;  %v4297_v19 = vsub.f32 1.5, %v4296_v22 }
 0xaf8   : > { %v8670_v60 = vsub.f32 %v8611_v13, %v4256_v9  ;;  %v4288_v47 = vadd.f32 1e-06, %v4282_v35  ;;  %v4298_v63 = vmul.f32 %v6386_v2, %v4297_v19  ;;  %v5858_v19 = vld [vmem:[%s7356_s16 + $0x38] sm:$0xff] }
 0xaf9   : > { %4776 = vmatpush.bf16.msra.mxu3 %v5858_v19 }
 0xafa   : > { %6387 = vrsqrt.f32 %v4288_v47  ;;  %v4268_v14 = vmul.f32 %v8670_v60, %v8670_v60  ;;  %v4302_v3 = vsel %vm4301_vm11, %v6386_v2, %v4298_v63  ;;  %vm4309_vm13 = vweird.f32 %v4288_v47  ;;  %v5857_v63 = vld [vmem:[%s7356_s16 + $0x30] sm:$0xff] }
 0xafb   : > { %v4353_v59 = vmul.f32 %v4302_v3, %v8596_v36 }
 0xafc   : > { %4279 = vadd.xlane.f32.xlu1 %v4268_v14 }
 0xafd   : > { %v4362_v16 = vmul.f32 %v8677_v15, %v4353_v59  ;;  %4777 = vmatpush.bf16.msra.mxu3 %v5857_v63 }
 0xaff   : > { %v4371_v7 = vadd.f32 %v8683_v58, %v4362_v16  ;;  %v5855_v16 = vld [vmem:[%s7356_s16 + $0x20] sm:$0xff] }
 0xb00   : > { %v6388_v55 = vpop.eup %6387 }
 0xb01   : > { %v4304_v54 = vmul.f32 %v6388_v55, %v4288_v47  ;;  %vm4310_vm12 = vweird.f32 %v6388_v55 }
 0xb02   : > { %vm4311_vm14 = vmor %vm4309_vm13, %vm4310_vm12 }
 0xb03   : > { %v4305_v12 = vmul.f32 %v6388_v55, %v4304_v54  ;;  %v5866_v54 = vld [vmem:[%s7356_s16 + $0x78] sm:$0xff] }
 0xb04   : > { %4800 = vmatpush.bf16.msra.mxu0 %v5866_v54  ;;  %5879 = vmatpush.bf16.msrb.mxu2 %v5866_v54 }
 0xb05   : > { %v4306_v25 = vmul.f32 0.5, %v4305_v12 }
 0xb07   : > { %v4307_v33 = vsub.f32 1.5, %v4306_v25 }
 0xb09   : > { %v4308_v32 = vmul.f32 %v6388_v55, %v4307_v33  ;;  %v5856_v33 = vld [vmem:[%s7356_s16 + $0x28] sm:$0xff] }
 0xb0a   : > { %4778 = vmatpush.bf16.msra.mxu3 %v5856_v33 }
 0xb0b   : > { %v4312_v42 = vsel %vm4311_vm14, %v6388_v55, %v4308_v32  ;;  %v5865_v32 = vld [vmem:[%s7356_s16 + $0x70] sm:$0xff] }
 0xb0c   : > { %v4354_v29 = vmul.f32 %v4312_v42, %v8607_v43  ;;  %4801 = vmatpush.bf16.msra.mxu0 %v5865_v32  ;;  %5880 = vmatpush.bf16.msrb.mxu2 %v5865_v32 }
 0xb0e   : > { %v4363_v41 = vmul.f32 %v8677_v15, %v4354_v29  ;;  %4779 = vmatpush.bf16.msra.mxu3 %v5855_v16 }
 0xb10   : > { %v4372_v36 = vadd.f32 %v8683_v58, %v4363_v41 }
 0xb12   : > { %v4377_v18 = vpack.c.bf16 %v4372_v36, %v4371_v7  ;;  %v5864_v7 = vld [vmem:[%s7356_s16 + $0x68] sm:$0xff] }
 0xb13   : > { %4802 = vmatpush.bf16.msra.mxu0 %v5864_v7  ;;  %5881 = vmatpush.bf16.msrb.mxu2 %v5864_v7 }
 0xb14   : > { %4490 = vmatmul.bf16.vlgmr.msrb.gmra.mxu1 %v4377_v18  ;;  %4514 = vmatmul.bf16.vlgmr.msra.gmra.mxu2 %v4377_v18 }
 0xb4e   : > { %v4274_v44 = vpop.xlane.xlu1 %4273 }
 0xb4f   : > { %v4283_v10 = vmul.f32 %v4274_v44, %v9036_v20  ;;  %v5854_v44 = vld [vmem:[%s7356_s16 + $0x18] sm:$0xff] }
 0xb50   : > { %4780 = vmatpush.bf16.msra.mxu3 %v5854_v44 }
 0xb51   : > { %v4289_v27 = vadd.f32 1e-06, %v4283_v10 }
 0xb53   : > { %6389 = vrsqrt.f32 %v4289_v27  ;;  %vm4319_vm0 = vweird.f32 %v4289_v27 }
 0xb56   : > { %v4276_v43 = vpop.xlane.xlu2 %4275 }
 0xb57   : > { %v4284_v4 = vmul.f32 %v4276_v43, %v9036_v20 }
 0xb59   : > { %v6390_v37 = vpop.eup %6389  ;;  %v4290_v61 = vadd.f32 1e-06, %v4284_v4 }
 0xb5a   : > { %v4314_v57 = vmul.f32 %v6390_v37, %v4289_v27  ;;  %vm4320_vm15 = vweird.f32 %v6390_v37  ;;  %v5863_v27 = vld [vmem:[%s7356_s16 + $0x60] sm:$0xff] }
 0xb5b   : > { %6391 = vrsqrt.f32 %v4290_v61  ;;  %vm4321_vm2 = vmor %vm4319_vm0, %vm4320_vm15  ;;  %vm4329_vm4 = vweird.f32 %v4290_v61  ;;  %4803 = vmatpush.bf16.msra.mxu0 %v5863_v27  ;;  %5882 = vmatpush.bf16.msrb.mxu2 %v5863_v27 }
 0xb5c   : > { %v4315_v26 = vmul.f32 %v6390_v37, %v4314_v57 }
 0xb5e   : > { %v4316_v56 = vmul.f32 0.5, %v4315_v26 }
 0xb60   : > { %v4317_v28 = vsub.f32 1.5, %v4316_v56  ;;  %v4396_v56 = vld [vmem:[%s7350_s26] sm:$0x3]  ;;  %s9042_s26 = scalar_lea.vmem [#allocation18], %s7315_s17 }
 0xb61   : > { %v6392_v38 = vpop.eup %6391 }
 0xb62   : > { %v4318_v8 = vmul.f32 %v6390_v37, %v4317_v28  ;;  %v4324_v48 = vmul.f32 %v6392_v38, %v4290_v61  ;;  %vm4330_vm3 = vweird.f32 %v6392_v38  ;;  %v5862_v61 = vld [vmem:[%s7356_s16 + $0x58] sm:$0xff]  ;;  %v5852_v28 = vld [vmem:[%s7356_s16 + $0x8] sm:$0xff] }
 0xb63   : > { %vm4331_vm5 = vmor %vm4329_vm4, %vm4330_vm3  ;;  %4804 = vmatpush.bf16.msra.mxu0 %v5862_v61  ;;  %5883 = vmatpush.bf16.msrb.mxu2 %v5862_v61 }
 0xb64   : > { %v4325_v11 = vmul.f32 %v6392_v38, %v4324_v48  ;;  %v4322_v31 = vsel %vm4321_vm2, %v6390_v37, %v4318_v8  ;;  %v8718_v8 = vperm.slane %v4396_v56, 0  ;;  %v5860_v48 = vld [vmem:[%s7356_s16 + $0x48] sm:$0xff] }
 0xb65   : > { %v4355_v0 = vmul.f32 %v4322_v31, %v8622_v45 }
 0xb66   : > { %v4326_v52 = vmul.f32 0.5, %v4325_v11 }
 0xb67   : > { %v4278_v17 = vpop.xlane.xlu0 %4277  ;;  %v4364_v1 = vmul.f32 %v8677_v15, %v4355_v0 }
 0xb68   : > { %v4327_v62 = vsub.f32 1.5, %v4326_v52  ;;  %v4285_v6 = vmul.f32 %v4278_v17, %v9036_v20  ;;  %v5859_v52 = vld [vmem:[%s7356_s16 + $0x40] sm:$0xff]  ;;  %v8724_v17 = vperm.slane %v4396_v56, 1 }
 0xb69   : > { %v4373_v45 = vadd.f32 %v8683_v58, %v4364_v1 }
 0xb6a   : > { %v4328_v51 = vmul.f32 %v6392_v38, %v4327_v62  ;;  %v4291_v2 = vadd.f32 1e-06, %v4285_v6 }
 0xb6c   : > { %v4332_v49 = vsel %vm4331_vm5, %v6392_v38, %v4328_v51  ;;  %6393 = vrsqrt.f32 %v4291_v2  ;;  %vm4339_vm10 = vweird.f32 %v4291_v2 }
 0xb6d   : > { %v4356_v24 = vmul.f32 %v4332_v49, %v8636_v39 }
 0xb6f   : > { %v4280_v50 = vpop.xlane.xlu1 %4279  ;;  %v4365_v30 = vmul.f32 %v8677_v15, %v4356_v24 }
 0xb70   : > { %v4286_v40 = vmul.f32 %v4280_v50, %v9036_v20 }
 0xb71   : > { %v4374_v9 = vadd.f32 %v8683_v58, %v4365_v30 }
 0xb72   : > { %v6394_v35 = vpop.eup %6393  ;;  %v4292_v47 = vadd.f32 1e-06, %v4286_v40 }
 0xb73   : > { %v4334_v22 = vmul.f32 %v6394_v35, %v4291_v2  ;;  %v4378_v14 = vpack.c.bf16 %v4374_v9, %v4373_v45  ;;  %vm4340_vm6 = vweird.f32 %v6394_v35 }
 0xb74   : > { %6395 = vrsqrt.f32 %v4292_v47  ;;  %vm4341_vm9 = vmor %vm4339_vm10, %vm4340_vm6  ;;  %vm4349_vm1 = vweird.f32 %v4292_v47 }
 0xb75   : > { %v4335_v39 = vmul.f32 %v6394_v35, %v4334_v22  ;;  %4495 = vmatmul.bf16.gmra.mxu1 %v4378_v14  ;;  %4519 = vmatmul.bf16.gmra.mxu2 %v4378_v14 }
 0xb77   : > { %v4336_v55 = vmul.f32 0.5, %v4335_v39 }
 0xb79   : > { %v4337_v20 = vsub.f32 1.5, %v4336_v55 }
 0xb7a   : > { %v6396_v12 = vpop.eup %6395 }
 0xb7b   : > { %v4338_v3 = vmul.f32 %v6394_v35, %v4337_v20  ;;  %v4344_v25 = vmul.f32 %v6396_v12, %v4292_v47  ;;  %vm4350_vm8 = vweird.f32 %v6396_v12 }
 0xb7c   : > { %vm4351_vm7 = vmor %vm4349_vm1, %vm4350_vm8 }
 0xb7d   : > { %v4345_v59 = vmul.f32 %v6396_v12, %v4344_v25  ;;  %v4342_v42 = vsel %vm4341_vm9, %v6394_v35, %v4338_v3 }
 0xb7e   : > { %v4357_v36 = vmul.f32 %v4342_v42, %v8663_v53  ;;  %v5853_v53 = vld [vmem:[%s7356_s16 + $0x10] sm:$0xff] }
 0xb7f   : > { %v4346_v29 = vmul.f32 0.5, %v4345_v59  ;;  %4781 = vmatpush.bf16.msra.mxu3 %v5853_v53 }
 0xb80   : > { %v4366_v4 = vmul.f32 %v8677_v15, %v4357_v36 }
 0xb81   : > { %v4347_v41 = vsub.f32 1.5, %v4346_v29 }
 0xb82   : > { %v4375_v57 = vadd.f32 %v8683_v58, %v4366_v4 }
 0xb83   : > { %v4348_v18 = vmul.f32 %v6396_v12, %v4347_v41  ;;  %4782 = vmatpush.bf16.msra.mxu3 %v5852_v28 }
 0xb85   : > { %v4352_v10 = vsel %vm4351_vm7, %v6396_v12, %v4348_v18 }
 0xb86   : > { %v4358_v43 = vmul.f32 %v4352_v10, %v8670_v60  ;;  %v5861_v60 = vld [vmem:[%s7356_s16 + $0x50] sm:$0xff] }
 0xb87   : > { %4805 = vmatpush.bf16.msra.mxu0 %v5861_v60  ;;  %5884 = vmatpush.bf16.msrb.mxu2 %v5861_v60 }
 0xb88   : > { %v4367_v37 = vmul.f32 %v8677_v15, %v4358_v43  ;;  %v5851_v15 = vld [vmem:[%s7356_s16] sm:$0xff] }
 0xb89   : > { %4783 = vmatpush.bf16.msra.mxu3 %v5851_v15 }
 0xb8a   : > { %v4376_v26 = vadd.f32 %v8683_v58, %v4367_v37 }
 0xb8b   : > { %4806 = vmatpush.bf16.msra.mxu0 %v5860_v48  ;;  %5885 = vmatpush.bf16.msrb.mxu2 %v5860_v48 }
 0xb8c   : > { %v4379_v38 = vpack.c.bf16 %v4376_v26, %v4375_v57 }
 0xb8e   : > { %4500 = vmatmul.bf16.gmra.mxu1 %v4379_v38  ;;  %4524 = vmatmul.bf16.gmra.mxu2 %v4379_v38 }
 0xb8f   : > { %4807 = vmatpush.bf16.msra.mxu0 %v5859_v52  ;;  %5886 = vmatpush.bf16.msrb.mxu2 %v5859_v52 }
 0xb91   : > { %v4491_v11 = vpop.f32.mrf.mxu1 }
 0xb92   : > { %v4492_v58 = vadd.f32 %v4491_v11, %v8718_v8 }
 0xb94   : > { %v4542_v31 = vmul.f32 0.044715, %v4492_v58  ;;  %v4530_v32 = vmul.f32 0.5, %v4492_v58 }
 0xb96   : > { %v4554_v62 = vmul.f32 %v4542_v31, %v4492_v58 }
 0xb97   : > { %v4515_v6 = vpop.f32.mrf.mxu2 }
 0xb98   : > { %v4566_v0 = vmul.f32 %v4554_v62, %v4492_v58  ;;  %v4516_v51 = vadd.f32 %v4515_v6, %v8724_v17 }
 0xb99   : > { %v4493_v2 = vpop.f32.mrf.mxu1 }
 0xb9a   : > { %v4578_v49 = vadd.f32 %v4566_v0, %v4492_v58  ;;  %v4543_v24 = vmul.f32 0.044715, %v4516_v51  ;;  %v4494_v1 = vadd.f32 %v4493_v2, %v8718_v8  ;;  %v4531_v10 = vmul.f32 0.5, %v4516_v51 }
 0xb9c   : > { %v4555_v50 = vmul.f32 %v4543_v24, %v4516_v51  ;;  %v4544_v30 = vmul.f32 0.044715, %v4494_v1  ;;  %v4590_v40 = vmul.f32 0.7978846, %v4578_v49  ;;  %v4532_v42 = vmul.f32 0.5, %v4494_v1 }
 0xb9e   : > { %v4567_v45 = vmul.f32 %v4555_v50, %v4516_v51  ;;  %v4556_v9 = vmul.f32 %v4544_v30, %v4494_v1  ;;  %6397 = vtanh.f32 %v4590_v40 }
 0xb9f   : > { %v4517_v35 = vpop.f32.mrf.mxu2 }
 0xba0   : > { %v4579_v47 = vadd.f32 %v4567_v45, %v4516_v51  ;;  %v4568_v22 = vmul.f32 %v4556_v9, %v4494_v1  ;;  %v4518_v14 = vadd.f32 %v4517_v35, %v8724_v17 }
 0xba2   : > { %v4580_v19 = vadd.f32 %v4568_v22, %v4494_v1  ;;  %v4545_v39 = vmul.f32 0.044715, %v4518_v14  ;;  %v4591_v55 = vmul.f32 0.7978846, %v4579_v47  ;;  %v4533_v27 = vmul.f32 0.5, %v4518_v14 }
 0xba4   : > { %v4592_v63 = vmul.f32 0.7978846, %v4580_v19  ;;  %v4557_v20 = vmul.f32 %v4545_v39, %v4518_v14  ;;  %v6398_v12 = vpop.eup %6397 }
 0xba5   : > { %v4614_v33 = vadd.f32 1.0, %v6398_v12 }
 0xba6   : > { %v4569_v54 = vmul.f32 %v4557_v20, %v4518_v14  ;;  %6399 = vtanh.f32 %v4592_v63 }
 0xba7   : > { %6401 = vtanh.f32 %v4591_v55  ;;  %v4626_v41 = vmul.f32 %v4614_v33, %v4530_v32 }
 0xba8   : > { %v4581_v3 = vadd.f32 %v4569_v54, %v4518_v14 }
 0xbaa   : > { %v4593_v25 = vmul.f32 0.7978846, %v4581_v3 }
 0xbac   : > { %v6400_v59 = vpop.eup %6399  ;;  %6403 = vtanh.f32 %v4593_v25 }
 0xbad   : > { %v4616_v29 = vadd.f32 1.0, %v6400_v59  ;;  %v6402_v16 = vpop.eup %6401 }
 0xbae   : > { %v4615_v18 = vadd.f32 1.0, %v6402_v16 }
 0xbaf   : > { %v4628_v7 = vmul.f32 %v4616_v29, %v4532_v42 }
 0xbb0   : > { %v4627_v4 = vmul.f32 %v4615_v18, %v4531_v10 }
 0xbb1   : > { %v4638_v36 = vpack.c.bf16 %v4628_v7, %v4626_v41 }
 0xbb2   : > { %v6404_v44 = vpop.eup %6403 }
 0xbb3   : > { %4784 = vmatmul.bf16.vlgmr.msra.gmra.mxu3 %v4638_v36  ;;  %v4617_v43 = vadd.f32 1.0, %v6404_v44 }
 0xbb5   : > { %v4629_v53 = vmul.f32 %v4617_v43, %v4533_v27 }
 0xbb7   : > { %v4639_v37 = vpack.c.bf16 %v4629_v53, %v4627_v4 }
 0xbb9   : > { %4808 = vmatmul.bf16.vlgmr.msra.gmra.mxu0 %v4639_v37 }
 0xbf2   : > { %v4496_v61 = vpop.f32.mrf.mxu1 }
 0xbf3   : > { %v4497_v57 = vadd.f32 %v4496_v61, %v8718_v8 }
 0xbf5   : > { %v4546_v26 = vmul.f32 0.044715, %v4497_v57  ;;  %v4534_v20 = vmul.f32 0.5, %v4497_v57 }
 0xbf7   : > { %v4558_v56 = vmul.f32 %v4546_v26, %v4497_v57 }
 0xbf8   : > { %v4520_v28 = vpop.f32.mrf.mxu2 }
 0xbf9   : > { %v4521_v60 = vadd.f32 %v4520_v28, %v8724_v17  ;;  %v4570_v38 = vmul.f32 %v4558_v56, %v4497_v57 }
 0xbfa   : > { %v4498_v15 = vpop.f32.mrf.mxu1 }
 0xbfb   : > { %v4547_v48 = vmul.f32 0.044715, %v4521_v60  ;;  %v4499_v11 = vadd.f32 %v4498_v15, %v8718_v8  ;;  %v4582_v58 = vadd.f32 %v4570_v38, %v4497_v57  ;;  %v4535_v18 = vmul.f32 0.5, %v4521_v60 }
 0xbfd   : > { %v4548_v52 = vmul.f32 0.044715, %v4499_v11  ;;  %v4559_v31 = vmul.f32 %v4547_v48, %v4521_v60  ;;  %v4594_v6 = vmul.f32 0.7978846, %v4582_v58  ;;  %v4536_v54 = vmul.f32 0.5, %v4499_v11 }
 0xbff   : > { %v4560_v62 = vmul.f32 %v4548_v52, %v4499_v11  ;;  %v4571_v0 = vmul.f32 %v4559_v31, %v4521_v60  ;;  %6405 = vtanh.f32 %v4594_v6 }
 0xc00   : > { %v4522_v51 = vpop.f32.mrf.mxu2 }
 0xc01   : > { %v4523_v2 = vadd.f32 %v4522_v51, %v8724_v17  ;;  %v4572_v49 = vmul.f32 %v4560_v62, %v4499_v11  ;;  %v4583_v24 = vadd.f32 %v4571_v0, %v4521_v60 }
 0xc03   : > { %v4549_v1 = vmul.f32 0.044715, %v4523_v2  ;;  %v4584_v50 = vadd.f32 %v4572_v49, %v4499_v11  ;;  %v4595_v45 = vmul.f32 0.7978846, %v4583_v24  ;;  %v4537_v44 = vmul.f32 0.5, %v4523_v2 }
 0xc05   : > { %v4596_v30 = vmul.f32 0.7978846, %v4584_v50  ;;  %v4561_v40 = vmul.f32 %v4549_v1, %v4523_v2  ;;  %v6406_v35 = vpop.eup %6405 }
 0xc06   : > { %v4618_v39 = vadd.f32 1.0, %v6406_v35 }
 0xc07   : > { %6407 = vtanh.f32 %v4596_v30  ;;  %v4573_v9 = vmul.f32 %v4561_v40, %v4523_v2 }
 0xc08   : > { %6409 = vtanh.f32 %v4595_v45  ;;  %v4630_v25 = vmul.f32 %v4618_v39, %v4534_v20 }
 0xc09   : > { %v4585_v47 = vadd.f32 %v4573_v9, %v4523_v2 }
 0xc0b   : > { %v4501_v22 = vpop.f32.mrf.mxu1  ;;  %v4597_v14 = vmul.f32 0.7978846, %v4585_v47 }
 0xc0c   : > { %v4502_v19 = vadd.f32 %v4501_v22, %v8718_v8 }
 0xc0d   : > { %v6408_v55 = vpop.eup %6407  ;;  %6411 = vtanh.f32 %v4597_v14 }
 0xc0e   : > { %v4550_v63 = vmul.f32 0.044715, %v4502_v19  ;;  %v4620_v12 = vadd.f32 1.0, %v6408_v55  ;;  %v6410_v3 = vpop.eup %6409  ;;  %v4538_v1 = vmul.f32 0.5, %v4502_v19 }
 0xc0f   : > { %v4619_v16 = vadd.f32 1.0, %v6410_v3 }
 0xc10   : > { %v4632_v33 = vmul.f32 %v4620_v12, %v4536_v54  ;;  %v4562_v59 = vmul.f32 %v4550_v63, %v4502_v19  ;;  %v6384_v54 = vld [vmem:[%s9042_s26] ss:$0 sm:$0xff] }
 0xc11   : > { %v4525_v32 = vpop.f32.mrf.mxu2  ;;  %v4631_v61 = vmul.f32 %v4619_v16, %v4535_v18 }
 0xc12   : > { %v4526_v42 = vadd.f32 %v4525_v32, %v8724_v17  ;;  %v4640_v29 = vpack.c.bf16 %v4632_v33, %v4630_v25  ;;  %v4574_v41 = vmul.f32 %v4562_v59, %v4502_v19 }
 0xc13   : > { %v6412_v7 = vpop.eup %6411  ;;  %v4503_v36 = vpop.f32.mrf.mxu1 }
 0xc14   : > { %v4551_v10 = vmul.f32 0.044715, %v4526_v42  ;;  %v4504_v27 = vadd.f32 %v4503_v36, %v8718_v8  ;;  %4789 = vmatmul.bf16.gmra.mxu3 %v4640_v29  ;;  %v4621_v43 = vadd.f32 1.0, %v6412_v7  ;;  %v4586_v4 = vadd.f32 %v4574_v41, %v4502_v19 }
 0xc15   : > { %v4539_v22 = vmul.f32 0.5, %v4526_v42 }
 0xc16   : > { %v4563_v53 = vmul.f32 %v4551_v10, %v4526_v42  ;;  %v4552_v37 = vmul.f32 0.044715, %v4504_v27  ;;  %v4633_v57 = vmul.f32 %v4621_v43, %v4537_v44  ;;  %v4598_v38 = vmul.f32 0.7978846, %v4586_v4 }
 0xc17   : > { %v4540_v50 = vmul.f32 0.5, %v4504_v27 }
 0xc18   : > { %v4575_v26 = vmul.f32 %v4563_v53, %v4526_v42  ;;  %v4641_v56 = vpack.c.bf16 %v4633_v57, %v4631_v61  ;;  %v4564_v28 = vmul.f32 %v4552_v37, %v4504_v27  ;;  %6413 = vtanh.f32 %v4598_v38 }
 0xc19   : > { %v4527_v15 = vpop.f32.mrf.mxu2 }
 0xc1a   : > { %v4587_v48 = vadd.f32 %v4575_v26, %v4526_v42  ;;  %v4528_v11 = vadd.f32 %v4527_v15, %v8724_v17  ;;  %4813 = vmatmul.bf16.gmra.mxu0 %v4641_v56  ;;  %v4576_v60 = vmul.f32 %v4564_v28, %v4504_v27 }
 0xc1c   : > { %v4553_v58 = vmul.f32 0.044715, %v4528_v11  ;;  %v4588_v52 = vadd.f32 %v4576_v60, %v4504_v27  ;;  %v4599_v8 = vmul.f32 0.7978846, %v4587_v48  ;;  %v4541_v14 = vmul.f32 0.5, %v4528_v11 }
 0xc1e   : > { %v4565_v31 = vmul.f32 %v4553_v58, %v4528_v11  ;;  %v4600_v62 = vmul.f32 0.7978846, %v4588_v52  ;;  %v6414_v0 = vpop.eup %6413 }
 0xc1f   : > { %v4622_v49 = vadd.f32 1.0, %v6414_v0 }
 0xc20   : > { %v4577_v6 = vmul.f32 %v4565_v31, %v4528_v11  ;;  %6415 = vtanh.f32 %v4600_v62 }
 0xc21   : > { %6417 = vtanh.f32 %v4599_v8  ;;  %v4634_v40 = vmul.f32 %v4622_v49, %v4538_v1 }
 0xc22   : > { %v4589_v51 = vadd.f32 %v4577_v6, %v4528_v11 }
 0xc24   : > { %v4601_v2 = vmul.f32 0.7978846, %v4589_v51 }
 0xc26   : > { %v6416_v24 = vpop.eup %6415  ;;  %6419 = vtanh.f32 %v4601_v2 }
 0xc27   : > { %v4624_v17 = vadd.f32 1.0, %v6416_v24  ;;  %v6418_v30 = vpop.eup %6417 }
 0xc28   : > { %v4623_v35 = vadd.f32 1.0, %v6418_v30 }
 0xc29   : > { %v4636_v45 = vmul.f32 %v4624_v17, %v4540_v50 }
 0xc2a   : > { %v4635_v55 = vmul.f32 %v4623_v35, %v4539_v22 }
 0xc2b   : > { %v4642_v9 = vpack.c.bf16 %v4636_v45, %v4634_v40 }
 0xc2c   : > { %v6420_v47 = vpop.eup %6419 }
 0xc2d   : > { %4794 = vmatmul.bf16.gmra.mxu3 %v4642_v9  ;;  %v4625_v39 = vadd.f32 1.0, %v6420_v47 }
 0xc2f   : > { %v4637_v63 = vmul.f32 %v4625_v39, %v4541_v14 }
 0xc31   : > { %v4643_v20 = vpack.c.bf16 %v4637_v63, %v4635_v55 }
 0xc33   : > { %4818 = vmatmul.bf16.vlgmr.msrb.gmra.mxu2 %v4643_v20 }
 0xc36   : > { %v4785_v19 = vpop.f32.mrf.mxu3  ;;  %v4809_v12 = vpop.f32.mrf.mxu0 }
 0xc37   : > { %v4786_v3 = vadd.f32 %v6384_v54, %v4785_v19 }
 0xc39   : > { %v4810_v25 = vadd.f32 %v4809_v12, %v4786_v3 }
 0xc3b   : > { %v4824_v33 = vadd.f32 %v4810_v25, %v8556_v23 }
 0xc3d   : > { %4830 = vst [vmem:[#allocation2 + $0x28] sm:$0xff] %v4824_v33 }
 0xc3e   : > { %v4787_v59 = vpop.f32.mrf.mxu3  ;;  %v4811_v29 = vpop.f32.mrf.mxu0 }
 0xc3f   : > { %v4788_v32 = vadd.f32 %v6384_v54, %v4787_v59 }
 0xc41   : > { %v4812_v16 = vadd.f32 %v4811_v29, %v4788_v32 }
 0xc43   : > { %v4825_v42 = vadd.f32 %v4812_v16, %v8561_v5 }
 0xc45   : > { %4831 = vst [vmem:[#allocation2 + $0x18] sm:$0xff] %v4825_v42 }
 0xc97   : > { %v4790_v41 = vpop.f32.mrf.mxu3  ;;  %v4814_v7 = vpop.f32.mrf.mxu0 }
 0xc98   : > { %v4791_v36 = vadd.f32 %v6384_v54, %v4790_v41 }
 0xc9a   : > { %v4815_v18 = vadd.f32 %v4814_v7, %v4791_v36 }
 0xc9c   : > { %v4826_v44 = vadd.f32 %v4815_v18, %v8586_v46 }
 0xc9e   : > { %4832 = vst [vmem:[#allocation2 + $0x20] sm:$0xff] %v4826_v44 }
 0xc9f   : > { %v4792_v10 = vpop.f32.mrf.mxu3  ;;  %v4816_v43 = vpop.f32.mrf.mxu0 }
 0xca0   : > { %v4793_v27 = vadd.f32 %v6384_v54, %v4792_v10 }
 0xca2   : > { %v4817_v4 = vadd.f32 %v4816_v43, %v4793_v27 }
 0xca4   : > { %v4827_v23 = vadd.f32 %v4817_v4, %v8592_v21 }
 0xca6   : > { %4833 = vst [vmem:[#allocation2 + $0x8] sm:$0xff] %v4827_v23 }
 0xcb0   : > { %v4795_v53 = vpop.f32.mrf.mxu3 }
 0xcb1   : > { %v4796_v37 = vadd.f32 %v6384_v54, %v4795_v53 }
 0xcb6   : > { %v4819_v61 = vpop.f32.mrf.mxu2 }
 0xcb7   : > { %v4820_v57 = vadd.f32 %v4819_v61, %v4796_v37 }
 0xcb8   : > { %v4797_v26 = vpop.f32.mrf.mxu3 }
 0xcb9   : > { %v4828_v5 = vadd.f32 %v4820_v57, %v8603_v34  ;;  %v4798_v56 = vadd.f32 %v6384_v54, %v4797_v26 }
 0xcbb   : > { %4834 = vst [vmem:[#allocation2] sm:$0xff] %v4828_v5 }
 0xcbe   : > { %v4821_v28 = vpop.f32.mrf.mxu2 }
 0xcbf   : > { %v4822_v38 = vadd.f32 %v4821_v28, %v4798_v56  ;;  %4838 = sbr.rel (%p5507_p6) target bundleno = 3552 (0xde0), region = 176 }
 0xcc1   : > { %v4829_v46 = vadd.f32 %v4822_v38, %v8611_v13 }
 0xcc3   : > { %4835 = vst [vmem:[#allocation2 + $0x10] sm:$0xff] %v4829_v46 }
 0xcc4   : > { %4849 = vadd.xlane.f32.xlu2 %v4828_v5  ;;  %4845 = vadd.xlane.f32.xlu1 %v4826_v44  ;;  %v9044_v34 = vld [vmem:[#allocation51_spill] sm:$0xff] }
 0xcc5   : > { %4841 = vadd.xlane.f32.xlu0 %v4824_v33 }
 0xccc   : > { %4851 = vadd.xlane.f32.xlu2 %v4829_v46  ;;  %4847 = vadd.xlane.f32.xlu1 %v4827_v23 }
 0xccd   : > { %4843 = vadd.xlane.f32.xlu0 %v4825_v42 }
 0xd37   : > { %v4850_v21 = vpop.xlane.xlu2 %4849  ;;  %v4846_v15 = vpop.xlane.xlu1 %4845 }
 0xd38   : > { %v4855_v48 = vmul.f32 %v4846_v15, %v9044_v34  ;;  %v4842_v11 = vpop.xlane.xlu0 %4841  ;;  %v4857_v30 = vmul.f32 %v4850_v21, %v9044_v34  ;;  %v6422_v15 = vld [vmem:[#allocation20] ss:$0 sm:$0xff] }
 0xd39   : > { %v4853_v60 = vmul.f32 %v4842_v11, %v9044_v34 }
 0xd3a   : > { %v8749_v58 = vsub.f32 %v4826_v44, %v4855_v48  ;;  %v8773_v45 = vsub.f32 %v4828_v5, %v4857_v30  ;;  %v8794_v5 = vld [vmem:[%s9045_s22] ss:$0 sm:$0xff] }
 0xd3b   : > { %v8751_v13 = vsub.f32 %v4824_v33, %v4853_v60 }
 0xd3c   : > { %v4867_v52 = vmul.f32 %v8749_v58, %v8749_v58  ;;  %v4869_v9 = vmul.f32 %v8773_v45, %v8773_v45 }
 0xd3d   : > { %v4865_v8 = vmul.f32 %v8751_v13, %v8751_v13 }
 0xd3e   : > { %4875 = vadd.xlane.f32.xlu2 %v4867_v52 }
 0xd3f   : > { %4871 = vadd.xlane.f32.xlu0 %v4865_v8  ;;  %v4852_v31 = vpop.xlane.xlu2 %4851  ;;  %v4848_v62 = vpop.xlane.xlu1 %4847 }
 0xd40   : > { %v4858_v6 = vmul.f32 %v4852_v31, %v9044_v34  ;;  %v4856_v0 = vmul.f32 %v4848_v62, %v9044_v34  ;;  %v4844_v51 = vpop.xlane.xlu0 %4843 }
 0xd41   : > { %v4854_v2 = vmul.f32 %v4844_v51, %v9044_v34 }
 0xd42   : > { %v8760_v49 = vsub.f32 %v4829_v46, %v4858_v6  ;;  %v8762_v24 = vsub.f32 %v4827_v23, %v4856_v0 }
 0xd43   : > { %v8764_v1 = vsub.f32 %v4825_v42, %v4854_v2 }
 0xd44   : > { %v4870_v50 = vmul.f32 %v8760_v49, %v8760_v49  ;;  %v4868_v17 = vmul.f32 %v8762_v24, %v8762_v24 }
 0xd45   : > { %v4866_v40 = vmul.f32 %v8764_v1, %v8764_v1 }
 0xd46   : > { %4881 = vadd.xlane.f32.xlu2 %v4870_v50 }
 0xd47   : > { %4877 = vadd.xlane.f32.xlu0 %v4868_v17  ;;  %4873 = vadd.xlane.f32.xlu1 %v4866_v40 }
 0xd4f   : > { %4879 = vadd.xlane.f32.xlu1 %v4869_v9 }
 0xdb1   : > { %v4876_v35 = vpop.xlane.xlu2 %4875 }
 0xdb2   : > { %v4885_v47 = vmul.f32 %v4876_v35, %v9044_v34  ;;  %v4872_v22 = vpop.xlane.xlu0 %4871 }
 0xdb3   : > { %v4883_v14 = vmul.f32 %v4872_v22, %v9044_v34 }
 0xdb4   : > { %v4891_v39 = vadd.f32 1e-06, %v4885_v47 }
 0xdb5   : > { %v4889_v55 = vadd.f32 1e-06, %v4883_v14 }
 0xdb6   : > { %6423 = vrsqrt.f32 %v4891_v39  ;;  %vm4921_vm11 = vweird.f32 %v4891_v39 }
 0xdb7   : > { %6425 = vrsqrt.f32 %v4889_v55  ;;  %vm4901_vm15 = vweird.f32 %v4889_v55 }
 0xdb9   : > { %v4882_v63 = vpop.xlane.xlu2 %4881 }
 0xdba   : > { %v4888_v20 = vmul.f32 %v4882_v63, %v9044_v34  ;;  %v4874_v54 = vpop.xlane.xlu1 %4873  ;;  %v4878_v19 = vpop.xlane.xlu0 %4877 }
 0xdbb   : > { %v4884_v12 = vmul.f32 %v4874_v54, %v9044_v34  ;;  %v4886_v3 = vmul.f32 %v4878_v19, %v9044_v34 }
 0xdbc   : > { %v6424_v25 = vpop.eup %6423  ;;  %v4894_v33 = vadd.f32 1e-06, %v4888_v20 }
 0xdbd   : > { %v6426_v59 = vpop.eup %6425  ;;  %v4916_v32 = vmul.f32 %v6424_v25, %v4891_v39  ;;  %v8782_v29 = vadd.f32 1e-06, %v4884_v12  ;;  %v8784_v16 = vadd.f32 1e-06, %v4886_v3  ;;  %vm4922_vm12 = vweird.f32 %v6424_v25 }
 0xdbe   : > { %v4896_v42 = vmul.f32 %v6426_v59, %v4889_v55  ;;  %6427 = vrsqrt.f32 %v4894_v33  ;;  %vm4902_vm13 = vweird.f32 %v6426_v59  ;;  %vm4923_vm14 = vmor %vm4921_vm11, %vm4922_vm12  ;;  %vm4951_vm2 = vweird.f32 %v4894_v33 }
 0xdbf   : > { %v4917_v41 = vmul.f32 %v6424_v25, %v4916_v32  ;;  %6429 = vrsqrt.f32 %v8782_v29  ;;  %vm4903_vm0 = vmor %vm4901_vm15, %vm4902_vm13  ;;  %vm4931_vm5 = vweird.f32 %v8784_v16  ;;  %vm4911_vm9 = vweird.f32 %v8782_v29 }
 0xdc0   : > { %v4897_v7 = vmul.f32 %v6426_v59, %v4896_v42  ;;  %6431 = vrsqrt.f32 %v8784_v16 }
 0xdc1   : > { %v4918_v36 = vmul.f32 0.5, %v4917_v41 }
 0xdc2   : > { %v4898_v18 = vmul.f32 0.5, %v4897_v7  ;;  %v4880_v44 = vpop.xlane.xlu1 %4879 }
 0xdc3   : > { %v4919_v10 = vsub.f32 1.5, %v4918_v36  ;;  %v4887_v27 = vmul.f32 %v4880_v44, %v9044_v34 }
 0xdc4   : > { %v6428_v43 = vpop.eup %6427  ;;  %v4899_v4 = vsub.f32 1.5, %v4898_v18 }
 0xdc5   : > { %v6430_v23 = vpop.eup %6429  ;;  %v4920_v53 = vmul.f32 %v6424_v25, %v4919_v10  ;;  %v4946_v37 = vmul.f32 %v6428_v43, %v4894_v33  ;;  %v8789_v61 = vadd.f32 1e-06, %v4887_v27  ;;  %vm4952_vm3 = vweird.f32 %v6428_v43 }
 0xdc6   : > { %v6432_v57 = vpop.eup %6431  ;;  %v4900_v26 = vmul.f32 %v6426_v59, %v4899_v4  ;;  %v4906_v56 = vmul.f32 %v6430_v23, %v8782_v29  ;;  %vm4912_vm4 = vweird.f32 %v6430_v23  ;;  %vm4953_vm10 = vmor %vm4951_vm2, %vm4952_vm3 }
 0xdc7   : > { %v4924_v28 = vsel %vm4923_vm14, %v6424_v25, %v4920_v53  ;;  %v4947_v38 = vmul.f32 %v6428_v43, %v4946_v37  ;;  %v4926_v46 = vmul.f32 %v6432_v57, %v8784_v16  ;;  %6433 = vrsqrt.f32 %v8789_v61  ;;  %vm4913_vm8 = vmor %vm4911_vm9, %vm4912_vm4 }
 0xdc8   : > { %v4957_v21 = vmul.f32 %v4924_v28, %v8749_v58  ;;  %v4904_v34 = vsel %vm4903_vm0, %v6426_v59, %v4900_v26  ;;  %v4907_v48 = vmul.f32 %v6430_v23, %v4906_v56  ;;  %vm4932_vm6 = vweird.f32 %v6432_v57 }
 0xdc9   : > { %v4955_v11 = vmul.f32 %v4904_v34, %v8751_v13  ;;  %v4948_v60 = vmul.f32 0.5, %v4947_v38  ;;  %v4927_v52 = vmul.f32 %v6432_v57, %v4926_v46  ;;  %vm4933_vm1 = vmor %vm4931_vm5, %vm4932_vm6  ;;  %vm4941_vm11 = vweird.f32 %v8789_v61 }
 0xdca   : > { %v4966_v8 = vmul.f32 %v8794_v5, %v4957_v21  ;;  %v4908_v31 = vmul.f32 0.5, %v4907_v48 }
 0xdcb   : > { %v4964_v62 = vmul.f32 %v8794_v5, %v4955_v11  ;;  %v4949_v6 = vsub.f32 1.5, %v4948_v60  ;;  %v4928_v58 = vmul.f32 0.5, %v4927_v52 }
 0xdcc   : > { %v4975_v0 = vadd.f32 %v6422_v15, %v4966_v8  ;;  %v4909_v51 = vsub.f32 1.5, %v4908_v31 }
 0xdcd   : > { %v4973_v2 = vadd.f32 %v6422_v15, %v4964_v62  ;;  %v4950_v13 = vmul.f32 %v6428_v43, %v4949_v6  ;;  %v4929_v50 = vsub.f32 1.5, %v4928_v58  ;;  %v6434_v17 = vpop.eup %6433 }
 0xdce   : > { %4981 = vst [vmem:[%s7402_s25 + $0x10] sm:$0xff] %v4975_v0  ;;  %v4910_v30 = vmul.f32 %v6430_v23, %v4909_v51  ;;  %v4936_v35 = vmul.f32 %v6434_v17, %v8789_v61  ;;  %vm4942_vm7 = vweird.f32 %v6434_v17 }
 0xdcf   : > { %4979 = vst [vmem:[%s7402_s25] sm:$0xff] %v4973_v2  ;;  %v4954_v40 = vsel %vm4953_vm10, %v6428_v43, %v4950_v13  ;;  %v4930_v9 = vmul.f32 %v6432_v57, %v4929_v50  ;;  %vm4943_vm12 = vmor %vm4941_vm11, %vm4942_vm7 }
 0xdd0   : > { %v4960_v47 = vmul.f32 %v4954_v40, %v8760_v49  ;;  %v4914_v22 = vsel %vm4913_vm8, %v6430_v23, %v4910_v30  ;;  %v4937_v55 = vmul.f32 %v6434_v17, %v4936_v35 }
 0xdd1   : > { %v4956_v14 = vmul.f32 %v4914_v22, %v8764_v1  ;;  %v4934_v39 = vsel %vm4933_vm1, %v6432_v57, %v4930_v9 }
 0xdd2   : > { %v4969_v63 = vmul.f32 %v8794_v5, %v4960_v47  ;;  %v4958_v20 = vmul.f32 %v4934_v39, %v8762_v24  ;;  %v4938_v19 = vmul.f32 0.5, %v4937_v55 }
 0xdd3   : > { %v4965_v54 = vmul.f32 %v8794_v5, %v4956_v14 }
 0xdd4   : > { %v4978_v12 = vadd.f32 %v6422_v15, %v4969_v63  ;;  %v4967_v49 = vmul.f32 %v8794_v5, %v4958_v20  ;;  %v4939_v25 = vsub.f32 1.5, %v4938_v19 }
 0xdd5   : > { %v4974_v3 = vadd.f32 %v6422_v15, %v4965_v54 }
 0xdd6   : > { %4984 = vst [vmem:[%s7402_s25 + $0x28] sm:$0xff] %v4978_v12  ;;  %v4976_v33 = vadd.f32 %v6422_v15, %v4967_v49  ;;  %v4940_v1 = vmul.f32 %v6434_v17, %v4939_v25 }
 0xdd7   : > { %4980 = vst [vmem:[%s7402_s25 + $0x8] sm:$0xff] %v4974_v3 }
 0xdd8   : > { %4982 = vst [vmem:[%s7402_s25 + $0x18] sm:$0xff] %v4976_v33  ;;  %v4944_v59 = vsel %vm4943_vm12, %v6434_v17, %v4940_v1 }
 0xdd9   : > { %v4959_v24 = vmul.f32 %v4944_v59, %v8773_v45 }
 0xddb   : > { %v4968_v32 = vmul.f32 %v8794_v5, %v4959_v24 }
 0xddd   : > { %v4977_v29 = vadd.f32 %v6422_v15, %v4968_v32 }
 0xddf   : > { %4983 = vst [vmem:[%s7402_s25 + $0x20] sm:$0xff] %v4977_v29 }
 0xde0 PF: > { %s9046_s14 = sld [smem:[#allocation39_spill]]  ;;  %s9052_s4 = smov %s6929_s30 }
 0xde1   : > { %s9047_s12 = sld [smem:[#allocation35_spill]]  ;;  %s9054_s25 = smov %s6945_s1 }
 0xde2   : > { %s9048_s24 = sld [smem:[#allocation42_spill]] }
 0xde3   : > { %s9049_s5 = sld [smem:[#allocation38_spill]] }
 0xde4   : > { %s9050_s13 = sld [smem:[#allocation40_spill]] }
 0xde5   : > { %s9051_s26 = sld [smem:[#allocation41_spill]] }
 0xde6   : > { %s54_s2 = sadd.s32 1, %s9046_s14  }
 0xde7   : > { %p51_p7 = scmp.ge.s32.totalorder %s54_s2, 14   ;;  %s9053_s30 = smov %s9047_s12 }
 0xde9   :  { %53 = sbr.rel (!%p51_p7) target bundleno = 41 (0x29), region = 306 }
 0xdea   : > { %s9055_s1 = smov %s9050_s13 }
 0xdee   :  { %5024 = vsyncpa [#allocation5], 1 }
 0xdef   :  { %5026 = vsyncpa [#allocation5 + $0x1], 1 }
 0xdf0   :  { %5027 = vsyncpa [#allocation7], 1 }
 0xdf1   :  { %5029 = vsyncpa [#allocation7 + $0x1], 1 }
 0xdf2   :  { %5030 = vsyncpa [#allocation10], 1 }
 0xdf3   :  { %5032 = vsyncpa [#allocation10 + $0x1], 1 }
 0xdf4   :  { %5033 = vsyncpa [#allocation13], 1 }
 0xdf5   :  { %5035 = vsyncpa [#allocation13 + $0x1], 1 }
 0xdf6   :  { %5036 = vsyncpa [#allocation16], 1 }
 0xdf7   :  { %5038 = vsyncpa [#allocation16 + $0x1], 1 }
 0xdf8   :  { %5039 = vsyncpa [#allocation19], 1 }
 0xdf9   :  { %5041 = vsyncpa [#allocation19 + $0x1], 1 }
 0xdfa   :  { %5042 = vsyncpa [#allocation22], 1 }
 0xdfb   :  { %5043 = vsyncpa [#allocation25], 1 }

</bundles_post_ra>
